<compile_context>
chip_gen: v7x
topology: tpu7x:2x2x1
jax: 0.10.0
libtpu: 0.0.40
codegen_flags: <defaults>
</compile_context>

<pallas_src>
import functools

import jax
import jax.numpy as jnp
from jax.experimental import pallas as pl
from jax.experimental.pallas import tpu as pltpu

EPS = 1e-5
# Explicit scoped-VMEM budget: safe on v5e/v6e (128 MiB) and v7x (64 MiB).
VMEM_LIMIT_BYTES = 32 * 1024 * 1024


# ----------------------------------------------------------------------------
# In-kernel helpers
# ----------------------------------------------------------------------------
def _zero_border(pad_ref, H, W):
    """Zero only the 1-wide border of a (nb, H+2, W+2, C) padded scratch.

    Done every grid step (NOT behind pl.when(program_id == 0)): each core has
    its own scratch under megacore sharding.
    """
    nb = pad_ref.shape[0]
    C = pad_ref.shape[-1]
    dt = pad_ref.dtype
    row = jnp.zeros((nb, 1, W + 2, C), dt)
    col = jnp.zeros((nb, H + 2, 1, C), dt)
    pad_ref[:, 0:1, :, :] = row
    pad_ref[:, H + 1:H + 2, :, :] = row
    pad_ref[:, :, 0:1, :] = col
    pad_ref[:, :, W + 1:W + 2, :] = col


def _im2col_matmul(pad_ref, w_ref, patch_ref, H, W):
    """3x3 conv from a padded VMEM scratch as ONE im2col matmul (K = 9*Ci).

    pad_ref:   (nb, H+2, W+2, Ci) scratch ref, matmul dtype (padded input)
    w_ref:     (9*Ci, Co) ref, matmul dtype, rows ordered (dy, dx, ci)
    patch_ref: (nb*H*W, 9*Ci) scratch ref, matmul dtype
    returns:   (nb*H*W, Co) float32 accumulator
    """
    nb, _, _, Ci = pad_ref.shape
    M = nb * H * W
    # 9 static-offset window copies.  Scratch, patch and weights share
    # conv_dtype, so there are NO per-tap dtype casts; one K=9*Ci MXU matmul.
    for dy in range(3):
        for dx in range(3):
            k = dy * 3 + dx
            patch_ref[:, k * Ci:(k + 1) * Ci] = (
                pad_ref[:, dy:dy + H, dx:dx + W, :].reshape(M, Ci))
    return jnp.dot(patch_ref[...], w_ref[...],
                   preferred_element_type=jnp.float32)


def _tile_stats(v, stats_ref):
    """Per-tile BN partials: channel sum + CENTERED sum of squares (f32).

    Centered per-tile sums + Chan's combine in _finalize_bn avoid the
    catastrophic cancellation of E[x^2]-E[x]^2 at production sizes.
    """
    M, Co = v.shape
    s = jnp.sum(v, axis=0, keepdims=True)                  # (1, Co)
    mu = s * (1.0 / M)
    css = jnp.sum((v - mu) ** 2, axis=0, keepdims=True)    # (1, Co)
    stats_ref[0:1, 0:1, :] = s.reshape(1, 1, Co)
    stats_ref[0:1, 1:2, :] = css.reshape(1, 1, Co)


# ----------------------------------------------------------------------------
# Kernel 1: fused padding + conv1 + BN1 partial statistics
# ----------------------------------------------------------------------------
def _conv_stats_kernel(x_ref, w_ref, yraw_ref, stats_ref, xpad_ref, patch_ref):
    nb, H, W, _ = x_ref.shape
    Co = w_ref.shape[-1]
    # In-kernel padding: zero the 1-wide border of the conv_dtype scratch and
    # copy the interior straight from the (already conv_dtype) input block.
    # No upcast of the input block, no wrapper-side jnp.pad HBM round-trip.
    _zero_border(xpad_ref, H, W)
    xpad_ref[:, 1:H + 1, 1:W + 1, :] = x_ref[...]
    y = _im2col_matmul(xpad_ref, w_ref, patch_ref, H, W)      # (M, Co) f32
    # Stats from the f32 accumulator BEFORE the (possibly bf16) downcast.
    _tile_stats(y, stats_ref)
    yraw_ref[...] = y.reshape(nb, H, W, Co).astype(yraw_ref.dtype)


# ----------------------------------------------------------------------------
# Kernel 2: BN1 apply + ReLU + conv2 + BN2 partial statistics
# ----------------------------------------------------------------------------
def _bn_relu_conv_stats_kernel(yraw_ref, scale_ref, shift_ref, w_ref,
                               zraw_ref, stats_ref, ypad_ref, patch_ref):
    nb, H, W, _ = yraw_ref.shape
    Co = w_ref.shape[-1]
    # BN1 apply as a single scale/shift FMA (conv_dtype block * f32 scale ->
    # f32 math) + ReLU.  The padded intermediate only exists in a conv_dtype
    # VMEM scratch and is downcast exactly once on the interior write.
    y = jnp.maximum(yraw_ref[...] * scale_ref[...] + shift_ref[...], 0.0)
    _zero_border(ypad_ref, H, W)
    ypad_ref[:, 1:H + 1, 1:W + 1, :] = y.astype(ypad_ref.dtype)
    z = _im2col_matmul(ypad_ref, w_ref, patch_ref, H, W)      # (M, Co) f32
    _tile_stats(z, stats_ref)
    zraw_ref[...] = z.reshape(nb, H, W, Co).astype(zraw_ref.dtype)


# ----------------------------------------------------------------------------
# Kernel 3: BN2 apply + residual add + ReLU on a lane-dense (bt, H, W*C) block
# ----------------------------------------------------------------------------
def _bn_add_relu_kernel(zraw_ref, xres_ref, scale_ref, shift_ref, out_ref):
    out_ref[...] = jnp.maximum(
        zraw_ref[...] * scale_ref[...] + shift_ref[...] + xres_ref[...], 0.0)


# ----------------------------------------------------------------------------
# Plain-JAX glue: finalize BN statistics (tiny cross-tile reduction)
# ----------------------------------------------------------------------------
def _finalize_bn(stats, gamma, beta, m_tile, count):
    """(tiles, 2, C) partials [sum, centered SS] -> per-channel (scale, shift)."""
    sums = stats[:, 0, :].astype(jnp.float32)       # (tiles, C)
    css = stats[:, 1, :].astype(jnp.float32)        # (tiles, C)
    tile_mean = sums / m_tile
    mean = jnp.sum(sums, axis=0) / count
    # Chan et al. parallel combine: SS = sum(SS_t) + n_t * sum((mu_t - mu)^2)
    var = (jnp.sum(css, axis=0)
           + m_tile * jnp.sum((tile_mean - mean[None, :]) ** 2, axis=0)) / count
    scale = gamma.astype(jnp.float32) * jax.lax.rsqrt(var + EPS)
    shift = beta.astype(jnp.float32) - mean * scale
    return scale, shift


def _pack_weight(w_oihw, conv_dtype):
    """OIHW -> HWIO -> (9*Ci, Co); row index = (dy*3+dx)*Ci + ci (im2col order)."""
    co, ci = w_oihw.shape[0], w_oihw.shape[1]
    return jnp.transpose(w_oihw, (2, 3, 1, 0)).reshape(9 * ci, co).astype(conv_dtype)


# ----------------------------------------------------------------------------
# NHWC-native implementation (preferred layout: no transposes, chainable)
# ----------------------------------------------------------------------------
def _basic_block_nhwc(x_nhwc, w1_oihw, g1, b1, w2_oihw, g2, b2,
                      *, conv_dtype=jnp.bfloat16, batch_tile=1):
    N, H, W, C = x_nhwc.shape
    P = w1_oihw.shape[0]
    assert P == C, "identity shortcut requires planes == inplanes (downsample=None)"
    bt = batch_tile
    assert N % bt == 0
    nt = N // bt
    m_tile = bt * H * W            # rows per im2col matmul (>=512 ideal at scale)
    m_total = N * H * W
    csize = jnp.dtype(conv_dtype).itemsize
    cparams = pltpu.CompilerParams(dimension_semantics=("parallel",),
                                   vmem_limit_bytes=VMEM_LIMIT_BYTES)

    x_conv = x_nhwc.astype(conv_dtype)          # conv1 operand dtype
    w1 = _pack_weight(w1_oihw, conv_dtype)
    w2 = _pack_weight(w2_oihw, conv_dtype)

    # ---- kernel 1: pad + conv1 + BN1 partial stats ---------------------------
    y_raw, stats1 = pl.pallas_call(
        _conv_stats_kernel,
        out_shape=(jax.ShapeDtypeStruct((N, H, W, P), conv_dtype),
                   jax.ShapeDtypeStruct((nt, 2, P), jnp.float32)),
        grid_spec=pltpu.PrefetchScalarGridSpec(
            num_scalar_prefetch=0,
            grid=(nt,),
            in_specs=[
                pl.BlockSpec((bt, H, W, C), lambda i: (i, 0, 0, 0)),
                pl.BlockSpec((9 * C, P), lambda i: (0, 0)),
            ],
            out_specs=(
                pl.BlockSpec((bt, H, W, P), lambda i: (i, 0, 0, 0)),
                pl.BlockSpec((1, 2, P), lambda i: (i, 0, 0)),
            ),
            scratch_shapes=[pltpu.VMEM((bt, H + 2, W + 2, C), conv_dtype),
                            pltpu.VMEM((m_tile, 9 * C), conv_dtype)],
        ),
        compiler_params=cparams,
        cost_estimate=pl.CostEstimate(
            flops=2 * m_total * 9 * C * P, transcendentals=0,
            bytes_accessed=(m_total * C * csize + 9 * C * P * csize
                            + m_total * P * csize + nt * 2 * P * 4)),
    )(x_conv, w1)

    scale1, shift1 = _finalize_bn(stats1, g1, b1, m_tile, m_total)

    # ---- kernel 2: BN1 apply + ReLU + conv2 + BN2 partial stats --------------
    z_raw, stats2 = pl.pallas_call(
        _bn_relu_conv_stats_kernel,
        out_shape=(jax.ShapeDtypeStruct((N, H, W, P), conv_dtype),
                   jax.ShapeDtypeStruct((nt, 2, P), jnp.float32)),
        grid_spec=pltpu.PrefetchScalarGridSpec(
            num_scalar_prefetch=0,
            grid=(nt,),
            in_specs=[
                pl.BlockSpec((bt, H, W, P), lambda i: (i, 0, 0, 0)),
                pl.BlockSpec((1, P), lambda i: (0, 0)),
                pl.BlockSpec((1, P), lambda i: (0, 0)),
                pl.BlockSpec((9 * P, P), lambda i: (0, 0)),
            ],
            out_specs=(
                pl.BlockSpec((bt, H, W, P), lambda i: (i, 0, 0, 0)),
                pl.BlockSpec((1, 2, P), lambda i: (i, 0, 0)),
            ),
            scratch_shapes=[pltpu.VMEM((bt, H + 2, W + 2, P), conv_dtype),
                            pltpu.VMEM((m_tile, 9 * P), conv_dtype)],
        ),
        compiler_params=cparams,
        cost_estimate=pl.CostEstimate(
            flops=2 * m_total * 9 * P * P + 3 * m_total * P, transcendentals=0,
            bytes_accessed=(2 * m_total * P * csize + 9 * P * P * csize
                            + 2 * P * 4 + nt * 2 * P * 4)),
    )(y_raw, scale1.reshape(1, P), shift1.reshape(1, P), w2)

    scale2, shift2 = _finalize_bn(stats2, g2, b2, m_tile, m_total)

    # ---- kernel 3: BN2 apply + residual + ReLU on lane-dense (N, H, W*P) -----
    WP = W * P
    z_fold = z_raw.reshape(N, H, WP)
    x_fold = x_nhwc.astype(jnp.float32).reshape(N, H, WP)   # exact f32 residual
    scale2_f = jnp.tile(scale2.reshape(1, P), (W, 1)).reshape(1, WP)
    shift2_f = jnp.tile(shift2.reshape(1, P), (W, 1)).reshape(1, WP)
    out_fold = pl.pallas_call(
        _bn_add_relu_kernel,
        out_shape=jax.ShapeDtypeStruct((N, H, WP), jnp.float32),
        grid_spec=pltpu.PrefetchScalarGridSpec(
            num_scalar_prefetch=0,
            grid=(nt,),
            in_specs=[
                pl.BlockSpec((bt, H, WP), lambda i: (i, 0, 0)),
                pl.BlockSpec((bt, H, WP), lambda i: (i, 0, 0)),
                pl.BlockSpec((1, WP), lambda i: (0, 0)),
                pl.BlockSpec((1, WP), lambda i: (0, 0)),
            ],
            out_specs=pl.BlockSpec((bt, H, WP), lambda i: (i, 0, 0)),
        ),
        compiler_params=cparams,
        cost_estimate=pl.CostEstimate(
            flops=4 * m_total * P, transcendentals=0,
            bytes_accessed=m_total * P * (csize + 8) + 2 * WP * 4),
    )(z_fold, x_fold, scale2_f, shift2_f)

    return out_fold.reshape(N, H, W, P)


# NHWC entry point (use this when chaining blocks; stays NHWC end-to-end).
basic_block_nhwc = jax.jit(_basic_block_nhwc,
                           static_argnames=("conv_dtype", "batch_tile"))


# ----------------------------------------------------------------------------
# PyTorch-layout wrapper (NCHW in / NCHW out) — matches the module spec.
# The two transposes exist only to match the spec; they are full-HBM XLA passes,
# so prefer basic_block_nhwc for chained blocks.
# ----------------------------------------------------------------------------
@functools.partial(jax.jit, static_argnames=("conv_dtype", "batch_tile"))
def basic_block(x_nchw, w1_oihw, g1, b1, w2_oihw, g2, b2,
                *, conv_dtype=jnp.bfloat16, batch_tile=1):
    x_nhwc = jnp.transpose(x_nchw, (0, 2, 3, 1))
    out_nhwc = _basic_block_nhwc(x_nhwc, w1_oihw, g1, b1, w2_oihw, g2, b2,
                                 conv_dtype=conv_dtype, batch_tile=batch_tile)
    return jnp.transpose(out_nhwc, (0, 3, 1, 2))


# ----------------------------------------------------------------------------
# Pure-JAX reference matching PyTorch BasicBlock.forward (training-mode BN)
# ----------------------------------------------------------------------------
def reference(x_nchw, w1_oihw, g1, b1, w2_oihw, g2, b2):
    def conv(x, w):
        return jax.lax.conv_general_dilated(
            x, w, window_strides=(1, 1), padding=((1, 1), (1, 1)),
            dimension_numbers=('NCHW', 'OIHW', 'NCHW'))

    def bn(y, g, b):
        mean = jnp.mean(y, axis=(0, 2, 3), keepdims=True)
        var = jnp.mean((y - mean) ** 2, axis=(0, 2, 3), keepdims=True)
        return ((y - mean) * jax.lax.rsqrt(var + EPS)
                * g.reshape(1, -1, 1, 1) + b.reshape(1, -1, 1, 1))

    out = jax.nn.relu(bn(conv(x_nchw, w1_oihw), g1, b1))
    out = bn(conv(out, w2_oihw), g2, b2)
    return jax.nn.relu(out + x_nchw)


if __name__ == "__main__":
    # Small shapes: inplanes = planes = 8, batch 2, 16x16 spatial, stride 1
    # (W*P = 128 -> lane-dense folded K3 blocks).
    N, C, H, W = 2, 8, 16, 16
    P = C  # planes == inplanes so the identity shortcut is valid (downsample=None)

    key = jax.random.PRNGKey(0)
    kx, kw1, kw2, kg1, kb1, kg2, kb2 = jax.random.split(key, 7)

    x = jax.random.normal(kx, (N, C, H, W), dtype=jnp.float32)
    bound1 = 1.0 / (C * 9) ** 0.5
    w1 = jax.random.uniform(kw1, (P, C, 3, 3), jnp.float32, -bound1, bound1)
    bound2 = 1.0 / (P * 9) ** 0.5
    w2 = jax.random.uniform(kw2, (P, P, 3, 3), jnp.float32, -bound2, bound2)
    g1 = 1.0 + 0.1 * jax.random.normal(kg1, (P,), jnp.float32)
    b1 = 0.1 * jax.random.normal(kb1, (P,), jnp.float32)
    g2 = 1.0 + 0.1 * jax.random.normal(kg2, (P,), jnp.float32)
    b2 = 0.1 * jax.random.normal(kb2, (P,), jnp.float32)

    ref = reference(x, w1, g1, b1, w2, g2, b2)

    # Exact-precision path (f32 MXU operands / f32 intermediates): tight check.
    out_f32 = jax.block_until_ready(
        basic_block(x, w1, g1, b1, w2, g2, b2, conv_dtype=jnp.float32))
    assert out_f32.shape == (N, P, H, W)
    err32 = float(jnp.max(jnp.abs(out_f32 - ref)))
    assert jnp.allclose(out_f32, ref, atol=1e-3, rtol=1e-3), err32

    # bf16 fast path (bf16 MXU operands, scratch and HBM intermediates;
    # f32 accumulation / BN statistics).
    out_bf16 = jax.block_until_ready(
        basic_block(x, w1, g1, b1, w2, g2, b2, conv_dtype=jnp.bfloat16))
    err16 = float(jnp.max(jnp.abs(out_bf16 - ref)))
    assert jnp.allclose(out_bf16, ref, atol=5e-2, rtol=5e-2), err16

    print("KERNEL_OK")
</pallas_src>

<mosaic_0001>
module attributes {stable_mosaic.version = 11 : i64} {
  func.func @_conv_stats_kernel(%arg0: i32, %arg1: memref<1x16x16x8xf32, #tpu.memory_space<vmem>>, %arg2: memref<72x8xf32, #tpu.memory_space<vmem>>, %arg3: memref<1x16x16x8xf32, #tpu.memory_space<vmem>>, %arg4: memref<1x2x8xf32, #tpu.memory_space<vmem>>, %arg5: memref<1x18x18x8xf32, #tpu.memory_space<vmem>>, %arg6: memref<256x72xf32, #tpu.memory_space<vmem>>) attributes {dimension_semantics = [#tpu.dimension_semantics<parallel>], iteration_bounds = array<i64: 2>, scalar_prefetch = 0 : i64, scratch_operands = 2 : i64, tpu.core_type = #tpu.core_type<tc>, window_params = [{transform_indices = @transform_0, window_bounds = array<i64: 1, 16, 16, 8>}, {pipeline_mode = #tpu.pipeline_mode<synchronous>, transform_indices = @transform_1, window_bounds = array<i64: 72, 8>}, {transform_indices = @transform_2, window_bounds = array<i64: 1, 16, 16, 8>}, {transform_indices = @transform_3, window_bounds = array<i64: 1, 2, 8>}]} {
    %cst = arith.constant 0.000000e+00 : f32
    %0 = vector.broadcast %cst : f32 to vector<1x1x18x8xf32>
    %cst_0 = arith.constant 0.000000e+00 : f32
    %1 = vector.broadcast %cst_0 : f32 to vector<1x18x1x8xf32>
    %c0 = arith.constant 0 : index
    %c0_1 = arith.constant 0 : index
    %c0_2 = arith.constant 0 : index
    %c0_3 = arith.constant 0 : index
    %2 = vector.load %arg5[%c0, %c0_1, %c0_2, %c0_3] : memref<1x18x18x8xf32, #tpu.memory_space<vmem>>, vector<1x1x18x8xf32>
    tpu.vector_store %arg5[%c0, %c0_1, %c0_2, %c0_3], %0 {strides = array<i32>} : memref<1x18x18x8xf32, #tpu.memory_space<vmem>>, vector<1x1x18x8xf32>,
    %c0_4 = arith.constant 0 : index
    %c17 = arith.constant 17 : index
    %c0_5 = arith.constant 0 : index
    %c0_6 = arith.constant 0 : index
    %3 = vector.load %arg5[%c0_4, %c17, %c0_5, %c0_6] : memref<1x18x18x8xf32, #tpu.memory_space<vmem>>, vector<1x1x18x8xf32>
    tpu.vector_store %arg5[%c0_4, %c17, %c0_5, %c0_6], %0 {strides = array<i32>} : memref<1x18x18x8xf32, #tpu.memory_space<vmem>>, vector<1x1x18x8xf32>,
    %c0_7 = arith.constant 0 : index
    %c0_8 = arith.constant 0 : index
    %c0_9 = arith.constant 0 : index
    %c0_10 = arith.constant 0 : index
    %4 = vector.load %arg5[%c0_7, %c0_8, %c0_9, %c0_10] : memref<1x18x18x8xf32, #tpu.memory_space<vmem>>, vector<1x18x1x8xf32>
    tpu.vector_store %arg5[%c0_7, %c0_8, %c0_9, %c0_10], %1 {strides = array<i32>} : memref<1x18x18x8xf32, #tpu.memory_space<vmem>>, vector<1x18x1x8xf32>,
    %c0_11 = arith.constant 0 : index
    %c0_12 = arith.constant 0 : index
    %c17_13 = arith.constant 17 : index
    %c0_14 = arith.constant 0 : index
    %5 = vector.load %arg5[%c0_11, %c0_12, %c17_13, %c0_14] : memref<1x18x18x8xf32, #tpu.memory_space<vmem>>, vector<1x18x1x8xf32>
    tpu.vector_store %arg5[%c0_11, %c0_12, %c17_13, %c0_14], %1 {strides = array<i32>} : memref<1x18x18x8xf32, #tpu.memory_space<vmem>>, vector<1x18x1x8xf32>,
    %c0_15 = arith.constant 0 : index
    %c0_16 = arith.constant 0 : index
    %c0_17 = arith.constant 0 : index
    %c0_18 = arith.constant 0 : index
    %6 = vector.load %arg1[%c0_15, %c0_16, %c0_17, %c0_18] : memref<1x16x16x8xf32, #tpu.memory_space<vmem>>, vector<1x16x16x8xf32>
    %c0_19 = arith.constant 0 : index
    %c1 = arith.constant 1 : index
    %c1_20 = arith.constant 1 : index
    %c0_21 = arith.constant 0 : index
    %7 = vector.load %arg5[%c0_19, %c1, %c1_20, %c0_21] : memref<1x18x18x8xf32, #tpu.memory_space<vmem>>, vector<1x16x16x8xf32>
    tpu.vector_store %arg5[%c0_19, %c1, %c1_20, %c0_21], %6 {strides = array<i32>} : memref<1x18x18x8xf32, #tpu.memory_space<vmem>>, vector<1x16x16x8xf32>,
    %c0_22 = arith.constant 0 : index
    %c0_23 = arith.constant 0 : index
    %c0_24 = arith.constant 0 : index
    %c0_25 = arith.constant 0 : index
    %8 = vector.load %arg5[%c0_22, %c0_23, %c0_24, %c0_25] : memref<1x18x18x8xf32, #tpu.memory_space<vmem>>, vector<1x16x16x8xf32>
    %9 = vector.shape_cast %8 : vector<1x16x16x8xf32> to vector<256x8xf32>
    %c0_26 = arith.constant 0 : index
    %c0_27 = arith.constant 0 : index
    %10 = vector.load %arg6[%c0_26, %c0_27] : memref<256x72xf32, #tpu.memory_space<vmem>>, vector<256x8xf32>
    tpu.vector_store %arg6[%c0_26, %c0_27], %9 {strides = array<i32>} : memref<256x72xf32, #tpu.memory_space<vmem>>, vector<256x8xf32>,
    %c0_28 = arith.constant 0 : index
    %c0_29 = arith.constant 0 : index
    %c1_30 = arith.constant 1 : index
    %c0_31 = arith.constant 0 : index
    %11 = vector.load %arg5[%c0_28, %c0_29, %c1_30, %c0_31] : memref<1x18x18x8xf32, #tpu.memory_space<vmem>>, vector<1x16x16x8xf32>
    %12 = vector.shape_cast %11 : vector<1x16x16x8xf32> to vector<256x8xf32>
    %c0_32 = arith.constant 0 : index
    %c8 = arith.constant 8 : index
    %13 = vector.load %arg6[%c0_32, %c8] : memref<256x72xf32, #tpu.memory_space<vmem>>, vector<256x8xf32>
    tpu.vector_store %arg6[%c0_32, %c8], %12 {strides = array<i32>} : memref<256x72xf32, #tpu.memory_space<vmem>>, vector<256x8xf32>,
    %c0_33 = arith.constant 0 : index
    %c0_34 = arith.constant 0 : index
    %c2 = arith.constant 2 : index
    %c0_35 = arith.constant 0 : index
    %14 = vector.load %arg5[%c0_33, %c0_34, %c2, %c0_35] : memref<1x18x18x8xf32, #tpu.memory_space<vmem>>, vector<1x16x16x8xf32>
    %15 = vector.shape_cast %14 : vector<1x16x16x8xf32> to vector<256x8xf32>
    %c0_36 = arith.constant 0 : index
    %c16 = arith.constant 16 : index
    %16 = vector.load %arg6[%c0_36, %c16] : memref<256x72xf32, #tpu.memory_space<vmem>>, vector<256x8xf32>
    tpu.vector_store %arg6[%c0_36, %c16], %15 {strides = array<i32>} : memref<256x72xf32, #tpu.memory_space<vmem>>, vector<256x8xf32>,
    %c0_37 = arith.constant 0 : index
    %c1_38 = arith.constant 1 : index
    %c0_39 = arith.constant 0 : index
    %c0_40 = arith.constant 0 : index
    %17 = vector.load %arg5[%c0_37, %c1_38, %c0_39, %c0_40] : memref<1x18x18x8xf32, #tpu.memory_space<vmem>>, vector<1x16x16x8xf32>
    %18 = vector.shape_cast %17 : vector<1x16x16x8xf32> to vector<256x8xf32>
    %c0_41 = arith.constant 0 : index
    %c24 = arith.constant 24 : index
    %19 = vector.load %arg6[%c0_41, %c24] : memref<256x72xf32, #tpu.memory_space<vmem>>, vector<256x8xf32>
    tpu.vector_store %arg6[%c0_41, %c24], %18 {strides = array<i32>} : memref<256x72xf32, #tpu.memory_space<vmem>>, vector<256x8xf32>,
    %c0_42 = arith.constant 0 : index
    %c1_43 = arith.constant 1 : index
    %c1_44 = arith.constant 1 : index
    %c0_45 = arith.constant 0 : index
    %20 = vector.load %arg5[%c0_42, %c1_43, %c1_44, %c0_45] : memref<1x18x18x8xf32, #tpu.memory_space<vmem>>, vector<1x16x16x8xf32>
    %21 = vector.shape_cast %20 : vector<1x16x16x8xf32> to vector<256x8xf32>
    %c0_46 = arith.constant 0 : index
    %c32 = arith.constant 32 : index
    %22 = vector.load %arg6[%c0_46, %c32] : memref<256x72xf32, #tpu.memory_space<vmem>>, vector<256x8xf32>
    tpu.vector_store %arg6[%c0_46, %c32], %21 {strides = array<i32>} : memref<256x72xf32, #tpu.memory_space<vmem>>, vector<256x8xf32>,
    %c0_47 = arith.constant 0 : index
    %c1_48 = arith.constant 1 : index
    %c2_49 = arith.constant 2 : index
    %c0_50 = arith.constant 0 : index
    %23 = vector.load %arg5[%c0_47, %c1_48, %c2_49, %c0_50] : memref<1x18x18x8xf32, #tpu.memory_space<vmem>>, vector<1x16x16x8xf32>
    %24 = vector.shape_cast %23 : vector<1x16x16x8xf32> to vector<256x8xf32>
    %c0_51 = arith.constant 0 : index
    %c40 = arith.constant 40 : index
    %25 = vector.load %arg6[%c0_51, %c40] : memref<256x72xf32, #tpu.memory_space<vmem>>, vector<256x8xf32>
    tpu.vector_store %arg6[%c0_51, %c40], %24 {strides = array<i32>} : memref<256x72xf32, #tpu.memory_space<vmem>>, vector<256x8xf32>,
    %c0_52 = arith.constant 0 : index
    %c2_53 = arith.constant 2 : index
    %c0_54 = arith.constant 0 : index
    %c0_55 = arith.constant 0 : index
    %26 = vector.load %arg5[%c0_52, %c2_53, %c0_54, %c0_55] : memref<1x18x18x8xf32, #tpu.memory_space<vmem>>, vector<1x16x16x8xf32>
    %27 = vector.shape_cast %26 : vector<1x16x16x8xf32> to vector<256x8xf32>
    %c0_56 = arith.constant 0 : index
    %c48 = arith.constant 48 : index
    %28 = vector.load %arg6[%c0_56, %c48] : memref<256x72xf32, #tpu.memory_space<vmem>>, vector<256x8xf32>
    tpu.vector_store %arg6[%c0_56, %c48], %27 {strides = array<i32>} : memref<256x72xf32, #tpu.memory_space<vmem>>, vector<256x8xf32>,
    %c0_57 = arith.constant 0 : index
    %c2_58 = arith.constant 2 : index
    %c1_59 = arith.constant 1 : index
    %c0_60 = arith.constant 0 : index
    %29 = vector.load %arg5[%c0_57, %c2_58, %c1_59, %c0_60] : memref<1x18x18x8xf32, #tpu.memory_space<vmem>>, vector<1x16x16x8xf32>
    %30 = vector.shape_cast %29 : vector<1x16x16x8xf32> to vector<256x8xf32>
    %c0_61 = arith.constant 0 : index
    %c56 = arith.constant 56 : index
    %31 = vector.load %arg6[%c0_61, %c56] : memref<256x72xf32, #tpu.memory_space<vmem>>, vector<256x8xf32>
    tpu.vector_store %arg6[%c0_61, %c56], %30 {strides = array<i32>} : memref<256x72xf32, #tpu.memory_space<vmem>>, vector<256x8xf32>,
    %c0_62 = arith.constant 0 : index
    %c2_63 = arith.constant 2 : index
    %c2_64 = arith.constant 2 : index
    %c0_65 = arith.constant 0 : index
    %32 = vector.load %arg5[%c0_62, %c2_63, %c2_64, %c0_65] : memref<1x18x18x8xf32, #tpu.memory_space<vmem>>, vector<1x16x16x8xf32>
    %33 = vector.shape_cast %32 : vector<1x16x16x8xf32> to vector<256x8xf32>
    %c0_66 = arith.constant 0 : index
    %c64 = arith.constant 64 : index
    %34 = vector.load %arg6[%c0_66, %c64] : memref<256x72xf32, #tpu.memory_space<vmem>>, vector<256x8xf32>
    tpu.vector_store %arg6[%c0_66, %c64], %33 {strides = array<i32>} : memref<256x72xf32, #tpu.memory_space<vmem>>, vector<256x8xf32>,
    %c0_67 = arith.constant 0 : index
    %c0_68 = arith.constant 0 : index
    %35 = vector.load %arg6[%c0_67, %c0_68] : memref<256x72xf32, #tpu.memory_space<vmem>>, vector<256x72xf32>
    %c0_69 = arith.constant 0 : index
    %c0_70 = arith.constant 0 : index
    %36 = vector.load %arg2[%c0_69, %c0_70] : memref<72x8xf32, #tpu.memory_space<vmem>>, vector<72x8xf32>
    %cst_71 = arith.constant dense<0.000000e+00> : vector<256x8xf32>
    %37 = tpu.matmul %35, %36, %cst_71 {dimension_numbers = #tpu.dot_dimension_numbers<[1], [0], [0], [1], [0, 0, 1, 1], [], []>} : vector<256x72xf32>, vector<72x8xf32>, vector<256x8xf32> -> vector<256x8xf32>
    %cst_72 = arith.constant dense<0.000000e+00> : vector<8xf32>
    %38 = vector.multi_reduction <add>, %37, %cst_72 [0] : vector<256x8xf32> to vector<8xf32>
    %39 = vector.shape_cast %38 : vector<8xf32> to vector<1x8xf32>
    %cst_73 = arith.constant 3.906250e-03 : f32
    %40 = vector.broadcast %cst_73 : f32 to vector<1x8xf32>
    %41 = arith.mulf %39, %40 : vector<1x8xf32>
    %42 = vector.broadcast %41 : vector<1x8xf32> to vector<256x8xf32>
    %43 = arith.subf %37, %42 : vector<256x8xf32>
    %44 = arith.mulf %43, %43 : vector<256x8xf32>
    %cst_74 = arith.constant dense<0.000000e+00> : vector<8xf32>
    %45 = vector.multi_reduction <add>, %44, %cst_74 [0] : vector<256x8xf32> to vector<8xf32>
    %46 = vector.shape_cast %45 : vector<8xf32> to vector<1x8xf32>
    %47 = vector.shape_cast %39 : vector<1x8xf32> to vector<1x1x8xf32>
    %c0_75 = arith.constant 0 : index
    %c0_76 = arith.constant 0 : index
    %c0_77 = arith.constant 0 : index
    %48 = vector.load %arg4[%c0_75, %c0_76, %c0_77] : memref<1x2x8xf32, #tpu.memory_space<vmem>>, vector<1x1x8xf32>
    tpu.vector_store %arg4[%c0_75, %c0_76, %c0_77], %47 {strides = array<i32>} : memref<1x2x8xf32, #tpu.memory_space<vmem>>, vector<1x1x8xf32>,
    %49 = vector.shape_cast %46 : vector<1x8xf32> to vector<1x1x8xf32>
    %c0_78 = arith.constant 0 : index
    %c1_79 = arith.constant 1 : index
    %c0_80 = arith.constant 0 : index
    %50 = vector.load %arg4[%c0_78, %c1_79, %c0_80] : memref<1x2x8xf32, #tpu.memory_space<vmem>>, vector<1x1x8xf32>
    tpu.vector_store %arg4[%c0_78, %c1_79, %c0_80], %49 {strides = array<i32>} : memref<1x2x8xf32, #tpu.memory_space<vmem>>, vector<1x1x8xf32>,
    %51 = vector.shape_cast %37 : vector<256x8xf32> to vector<1x16x16x8xf32>
    %c0_81 = arith.constant 0 : index
    %c0_82 = arith.constant 0 : index
    %c0_83 = arith.constant 0 : index
    %c0_84 = arith.constant 0 : index
    %52 = vector.load %arg3[%c0_81, %c0_82, %c0_83, %c0_84] : memref<1x16x16x8xf32, #tpu.memory_space<vmem>>, vector<1x16x16x8xf32>
    tpu.vector_store %arg3[%c0_81, %c0_82, %c0_83, %c0_84], %51 {strides = array<i32>} : memref<1x16x16x8xf32, #tpu.memory_space<vmem>>, vector<1x16x16x8xf32>,
    return
  }
  func.func @transform_0(%arg0: i32) -> (i32, i32, i32, i32) {
    %c0_i32 = arith.constant 0 : i32
    %c0_i32_0 = arith.constant 0 : i32
    %c0_i32_1 = arith.constant 0 : i32
    %c0_i32_2 = arith.constant 0 : i32
    return %arg0, %c0_i32, %c0_i32_0, %c0_i32_1 : i32, i32, i32, i32
  }
  func.func @transform_1(%arg0: i32) -> (i32, i32) {
    %c0_i32 = arith.constant 0 : i32
    %c0_i32_0 = arith.constant 0 : i32
    %c0_i32_1 = arith.constant 0 : i32
    return %c0_i32, %c0_i32_0 : i32, i32
  }
  func.func @transform_2(%arg0: i32) -> (i32, i32, i32, i32) {
    %c0_i32 = arith.constant 0 : i32
    %c0_i32_0 = arith.constant 0 : i32
    %c0_i32_1 = arith.constant 0 : i32
    %c0_i32_2 = arith.constant 0 : i32
    return %arg0, %c0_i32, %c0_i32_0, %c0_i32_1 : i32, i32, i32, i32
  }
  func.func @transform_3(%arg0: i32) -> (i32, i32, i32) {
    %c0_i32 = arith.constant 0 : i32
    %c0_i32_0 = arith.constant 0 : i32
    %c0_i32_1 = arith.constant 0 : i32
    return %arg0, %c0_i32, %c0_i32_0 : i32, i32, i32
  }
}

module attributes {stable_mosaic.version = 11 : i64} {
  func.func @_bn_relu_conv_stats_kernel(%arg0: i32, %arg1: memref<1x16x16x8xf32, #tpu.memory_space<vmem>>, %arg2: memref<1x8xf32, #tpu.memory_space<vmem>>, %arg3: memref<1x8xf32, #tpu.memory_space<vmem>>, %arg4: memref<72x8xf32, #tpu.memory_space<vmem>>, %arg5: memref<1x16x16x8xf32, #tpu.memory_space<vmem>>, %arg6: memref<1x2x8xf32, #tpu.memory_space<vmem>>, %arg7: memref<1x18x18x8xf32, #tpu.memory_space<vmem>>, %arg8: memref<256x72xf32, #tpu.memory_space<vmem>>) attributes {dimension_semantics = [#tpu.dimension_semantics<parallel>], iteration_bounds = array<i64: 2>, scalar_prefetch = 0 : i64, scratch_operands = 2 : i64, tpu.core_type = #tpu.core_type<tc>, window_params = [{transform_indices = @transform_0, window_bounds = array<i64: 1, 16, 16, 8>}, {pipeline_mode = #tpu.pipeline_mode<synchronous>, transform_indices = @transform_1, window_bounds = array<i64: 1, 8>}, {pipeline_mode = #tpu.pipeline_mode<synchronous>, transform_indices = @transform_2, window_bounds = array<i64: 1, 8>}, {pipeline_mode = #tpu.pipeline_mode<synchronous>, transform_indices = @transform_3, window_bounds = array<i64: 72, 8>}, {transform_indices = @transform_4, window_bounds = array<i64: 1, 16, 16, 8>}, {transform_indices = @transform_5, window_bounds = array<i64: 1, 2, 8>}]} {
    %c0 = arith.constant 0 : index
    %c0_0 = arith.constant 0 : index
    %c0_1 = arith.constant 0 : index
    %c0_2 = arith.constant 0 : index
    %0 = vector.load %arg1[%c0, %c0_0, %c0_1, %c0_2] : memref<1x16x16x8xf32, #tpu.memory_space<vmem>>, vector<1x16x16x8xf32>
    %c0_3 = arith.constant 0 : index
    %c0_4 = arith.constant 0 : index
    %1 = vector.load %arg2[%c0_3, %c0_4] : memref<1x8xf32, #tpu.memory_space<vmem>>, vector<1x8xf32>
    %2 = vector.shape_cast %1 : vector<1x8xf32> to vector<1x1x1x8xf32>
    %3 = vector.broadcast %2 : vector<1x1x1x8xf32> to vector<1x16x16x8xf32>
    %4 = arith.mulf %0, %3 : vector<1x16x16x8xf32>
    %c0_5 = arith.constant 0 : index
    %c0_6 = arith.constant 0 : index
    %5 = vector.load %arg3[%c0_5, %c0_6] : memref<1x8xf32, #tpu.memory_space<vmem>>, vector<1x8xf32>
    %6 = vector.shape_cast %5 : vector<1x8xf32> to vector<1x1x1x8xf32>
    %7 = vector.broadcast %6 : vector<1x1x1x8xf32> to vector<1x16x16x8xf32>
    %8 = arith.addf %4, %7 : vector<1x16x16x8xf32>
    %cst = arith.constant 0.000000e+00 : f32
    %9 = vector.broadcast %cst : f32 to vector<1x16x16x8xf32>
    %10 = arith.maximumf %8, %9 : vector<1x16x16x8xf32>
    %cst_7 = arith.constant 0.000000e+00 : f32
    %11 = vector.broadcast %cst_7 : f32 to vector<1x1x18x8xf32>
    %cst_8 = arith.constant 0.000000e+00 : f32
    %12 = vector.broadcast %cst_8 : f32 to vector<1x18x1x8xf32>
    %c0_9 = arith.constant 0 : index
    %c0_10 = arith.constant 0 : index
    %c0_11 = arith.constant 0 : index
    %c0_12 = arith.constant 0 : index
    %13 = vector.load %arg7[%c0_9, %c0_10, %c0_11, %c0_12] : memref<1x18x18x8xf32, #tpu.memory_space<vmem>>, vector<1x1x18x8xf32>
    tpu.vector_store %arg7[%c0_9, %c0_10, %c0_11, %c0_12], %11 {strides = array<i32>} : memref<1x18x18x8xf32, #tpu.memory_space<vmem>>, vector<1x1x18x8xf32>,
    %c0_13 = arith.constant 0 : index
    %c17 = arith.constant 17 : index
    %c0_14 = arith.constant 0 : index
    %c0_15 = arith.constant 0 : index
    %14 = vector.load %arg7[%c0_13, %c17, %c0_14, %c0_15] : memref<1x18x18x8xf32, #tpu.memory_space<vmem>>, vector<1x1x18x8xf32>
    tpu.vector_store %arg7[%c0_13, %c17, %c0_14, %c0_15], %11 {strides = array<i32>} : memref<1x18x18x8xf32, #tpu.memory_space<vmem>>, vector<1x1x18x8xf32>,
    %c0_16 = arith.constant 0 : index
    %c0_17 = arith.constant 0 : index
    %c0_18 = arith.constant 0 : index
    %c0_19 = arith.constant 0 : index
    %15 = vector.load %arg7[%c0_16, %c0_17, %c0_18, %c0_19] : memref<1x18x18x8xf32, #tpu.memory_space<vmem>>, vector<1x18x1x8xf32>
    tpu.vector_store %arg7[%c0_16, %c0_17, %c0_18, %c0_19], %12 {strides = array<i32>} : memref<1x18x18x8xf32, #tpu.memory_space<vmem>>, vector<1x18x1x8xf32>,
    %c0_20 = arith.constant 0 : index
    %c0_21 = arith.constant 0 : index
    %c17_22 = arith.constant 17 : index
    %c0_23 = arith.constant 0 : index
    %16 = vector.load %arg7[%c0_20, %c0_21, %c17_22, %c0_23] : memref<1x18x18x8xf32, #tpu.memory_space<vmem>>, vector<1x18x1x8xf32>
    tpu.vector_store %arg7[%c0_20, %c0_21, %c17_22, %c0_23], %12 {strides = array<i32>} : memref<1x18x18x8xf32, #tpu.memory_space<vmem>>, vector<1x18x1x8xf32>,
    %c0_24 = arith.constant 0 : index
    %c1 = arith.constant 1 : index
    %c1_25 = arith.constant 1 : index
    %c0_26 = arith.constant 0 : index
    %17 = vector.load %arg7[%c0_24, %c1, %c1_25, %c0_26] : memref<1x18x18x8xf32, #tpu.memory_space<vmem>>, vector<1x16x16x8xf32>
    tpu.vector_store %arg7[%c0_24, %c1, %c1_25, %c0_26], %10 {strides = array<i32>} : memref<1x18x18x8xf32, #tpu.memory_space<vmem>>, vector<1x16x16x8xf32>,
    %c0_27 = arith.constant 0 : index
    %c0_28 = arith.constant 0 : index
    %c0_29 = arith.constant 0 : index
    %c0_30 = arith.constant 0 : index
    %18 = vector.load %arg7[%c0_27, %c0_28, %c0_29, %c0_30] : memref<1x18x18x8xf32, #tpu.memory_space<vmem>>, vector<1x16x16x8xf32>
    %19 = vector.shape_cast %18 : vector<1x16x16x8xf32> to vector<256x8xf32>
    %c0_31 = arith.constant 0 : index
    %c0_32 = arith.constant 0 : index
    %20 = vector.load %arg8[%c0_31, %c0_32] : memref<256x72xf32, #tpu.memory_space<vmem>>, vector<256x8xf32>
    tpu.vector_store %arg8[%c0_31, %c0_32], %19 {strides = array<i32>} : memref<256x72xf32, #tpu.memory_space<vmem>>, vector<256x8xf32>,
    %c0_33 = arith.constant 0 : index
    %c0_34 = arith.constant 0 : index
    %c1_35 = arith.constant 1 : index
    %c0_36 = arith.constant 0 : index
    %21 = vector.load %arg7[%c0_33, %c0_34, %c1_35, %c0_36] : memref<1x18x18x8xf32, #tpu.memory_space<vmem>>, vector<1x16x16x8xf32>
    %22 = vector.shape_cast %21 : vector<1x16x16x8xf32> to vector<256x8xf32>
    %c0_37 = arith.constant 0 : index
    %c8 = arith.constant 8 : index
    %23 = vector.load %arg8[%c0_37, %c8] : memref<256x72xf32, #tpu.memory_space<vmem>>, vector<256x8xf32>
    tpu.vector_store %arg8[%c0_37, %c8], %22 {strides = array<i32>} : memref<256x72xf32, #tpu.memory_space<vmem>>, vector<256x8xf32>,
    %c0_38 = arith.constant 0 : index
    %c0_39 = arith.constant 0 : index
    %c2 = arith.constant 2 : index
    %c0_40 = arith.constant 0 : index
    %24 = vector.load %arg7[%c0_38, %c0_39, %c2, %c0_40] : memref<1x18x18x8xf32, #tpu.memory_space<vmem>>, vector<1x16x16x8xf32>
    %25 = vector.shape_cast %24 : vector<1x16x16x8xf32> to vector<256x8xf32>
    %c0_41 = arith.constant 0 : index
    %c16 = arith.constant 16 : index
    %26 = vector.load %arg8[%c0_41, %c16] : memref<256x72xf32, #tpu.memory_space<vmem>>, vector<256x8xf32>
    tpu.vector_store %arg8[%c0_41, %c16], %25 {strides = array<i32>} : memref<256x72xf32, #tpu.memory_space<vmem>>, vector<256x8xf32>,
    %c0_42 = arith.constant 0 : index
    %c1_43 = arith.constant 1 : index
    %c0_44 = arith.constant 0 : index
    %c0_45 = arith.constant 0 : index
    %27 = vector.load %arg7[%c0_42, %c1_43, %c0_44, %c0_45] : memref<1x18x18x8xf32, #tpu.memory_space<vmem>>, vector<1x16x16x8xf32>
    %28 = vector.shape_cast %27 : vector<1x16x16x8xf32> to vector<256x8xf32>
    %c0_46 = arith.constant 0 : index
    %c24 = arith.constant 24 : index
    %29 = vector.load %arg8[%c0_46, %c24] : memref<256x72xf32, #tpu.memory_space<vmem>>, vector<256x8xf32>
    tpu.vector_store %arg8[%c0_46, %c24], %28 {strides = array<i32>} : memref<256x72xf32, #tpu.memory_space<vmem>>, vector<256x8xf32>,
    %c0_47 = arith.constant 0 : index
    %c1_48 = arith.constant 1 : index
    %c1_49 = arith.constant 1 : index
    %c0_50 = arith.constant 0 : index
    %30 = vector.load %arg7[%c0_47, %c1_48, %c1_49, %c0_50] : memref<1x18x18x8xf32, #tpu.memory_space<vmem>>, vector<1x16x16x8xf32>
    %31 = vector.shape_cast %30 : vector<1x16x16x8xf32> to vector<256x8xf32>
    %c0_51 = arith.constant 0 : index
    %c32 = arith.constant 32 : index
    %32 = vector.load %arg8[%c0_51, %c32] : memref<256x72xf32, #tpu.memory_space<vmem>>, vector<256x8xf32>
    tpu.vector_store %arg8[%c0_51, %c32], %31 {strides = array<i32>} : memref<256x72xf32, #tpu.memory_space<vmem>>, vector<256x8xf32>,
    %c0_52 = arith.constant 0 : index
    %c1_53 = arith.constant 1 : index
    %c2_54 = arith.constant 2 : index
    %c0_55 = arith.constant 0 : index
    %33 = vector.load %arg7[%c0_52, %c1_53, %c2_54, %c0_55] : memref<1x18x18x8xf32, #tpu.memory_space<vmem>>, vector<1x16x16x8xf32>
    %34 = vector.shape_cast %33 : vector<1x16x16x8xf32> to vector<256x8xf32>
    %c0_56 = arith.constant 0 : index
    %c40 = arith.constant 40 : index
    %35 = vector.load %arg8[%c0_56, %c40] : memref<256x72xf32, #tpu.memory_space<vmem>>, vector<256x8xf32>
    tpu.vector_store %arg8[%c0_56, %c40], %34 {strides = array<i32>} : memref<256x72xf32, #tpu.memory_space<vmem>>, vector<256x8xf32>,
    %c0_57 = arith.constant 0 : index
    %c2_58 = arith.constant 2 : index
    %c0_59 = arith.constant 0 : index
    %c0_60 = arith.constant 0 : index
    %36 = vector.load %arg7[%c0_57, %c2_58, %c0_59, %c0_60] : memref<1x18x18x8xf32, #tpu.memory_space<vmem>>, vector<1x16x16x8xf32>
    %37 = vector.shape_cast %36 : vector<1x16x16x8xf32> to vector<256x8xf32>
    %c0_61 = arith.constant 0 : index
    %c48 = arith.constant 48 : index
    %38 = vector.load %arg8[%c0_61, %c48] : memref<256x72xf32, #tpu.memory_space<vmem>>, vector<256x8xf32>
    tpu.vector_store %arg8[%c0_61, %c48], %37 {strides = array<i32>} : memref<256x72xf32, #tpu.memory_space<vmem>>, vector<256x8xf32>,
    %c0_62 = arith.constant 0 : index
    %c2_63 = arith.constant 2 : index
    %c1_64 = arith.constant 1 : index
    %c0_65 = arith.constant 0 : index
    %39 = vector.load %arg7[%c0_62, %c2_63, %c1_64, %c0_65] : memref<1x18x18x8xf32, #tpu.memory_space<vmem>>, vector<1x16x16x8xf32>
    %40 = vector.shape_cast %39 : vector<1x16x16x8xf32> to vector<256x8xf32>
    %c0_66 = arith.constant 0 : index
    %c56 = arith.constant 56 : index
    %41 = vector.load %arg8[%c0_66, %c56] : memref<256x72xf32, #tpu.memory_space<vmem>>, vector<256x8xf32>
    tpu.vector_store %arg8[%c0_66, %c56], %40 {strides = array<i32>} : memref<256x72xf32, #tpu.memory_space<vmem>>, vector<256x8xf32>,
    %c0_67 = arith.constant 0 : index
    %c2_68 = arith.constant 2 : index
    %c2_69 = arith.constant 2 : index
    %c0_70 = arith.constant 0 : index
    %42 = vector.load %arg7[%c0_67, %c2_68, %c2_69, %c0_70] : memref<1x18x18x8xf32, #tpu.memory_space<vmem>>, vector<1x16x16x8xf32>
    %43 = vector.shape_cast %42 : vector<1x16x16x8xf32> to vector<256x8xf32>
    %c0_71 = arith.constant 0 : index
    %c64 = arith.constant 64 : index
    %44 = vector.load %arg8[%c0_71, %c64] : memref<256x72xf32, #tpu.memory_space<vmem>>, vector<256x8xf32>
    tpu.vector_store %arg8[%c0_71, %c64], %43 {strides = array<i32>} : memref<256x72xf32, #tpu.memory_space<vmem>>, vector<256x8xf32>,
    %c0_72 = arith.constant 0 : index
    %c0_73 = arith.constant 0 : index
    %45 = vector.load %arg8[%c0_72, %c0_73] : memref<256x72xf32, #tpu.memory_space<vmem>>, vector<256x72xf32>
    %c0_74 = arith.constant 0 : index
    %c0_75 = arith.constant 0 : index
    %46 = vector.load %arg4[%c0_74, %c0_75] : memref<72x8xf32, #tpu.memory_space<vmem>>, vector<72x8xf32>
    %cst_76 = arith.constant dense<0.000000e+00> : vector<256x8xf32>
    %47 = tpu.matmul %45, %46, %cst_76 {dimension_numbers = #tpu.dot_dimension_numbers<[1], [0], [0], [1], [0, 0, 1, 1], [], []>} : vector<256x72xf32>, vector<72x8xf32>, vector<256x8xf32> -> vector<256x8xf32>
    %cst_77 = arith.constant dense<0.000000e+00> : vector<8xf32>
    %48 = vector.multi_reduction <add>, %47, %cst_77 [0] : vector<256x8xf32> to vector<8xf32>
    %49 = vector.shape_cast %48 : vector<8xf32> to vector<1x8xf32>
    %cst_78 = arith.constant 3.906250e-03 : f32
    %50 = vector.broadcast %cst_78 : f32 to vector<1x8xf32>
    %51 = arith.mulf %49, %50 : vector<1x8xf32>
    %52 = vector.broadcast %51 : vector<1x8xf32> to vector<256x8xf32>
    %53 = arith.subf %47, %52 : vector<256x8xf32>
    %54 = arith.mulf %53, %53 : vector<256x8xf32>
    %cst_79 = arith.constant dense<0.000000e+00> : vector<8xf32>
    %55 = vector.multi_reduction <add>, %54, %cst_79 [0] : vector<256x8xf32> to vector<8xf32>
    %56 = vector.shape_cast %55 : vector<8xf32> to vector<1x8xf32>
    %57 = vector.shape_cast %49 : vector<1x8xf32> to vector<1x1x8xf32>
    %c0_80 = arith.constant 0 : index
    %c0_81 = arith.constant 0 : index
    %c0_82 = arith.constant 0 : index
    %58 = vector.load %arg6[%c0_80, %c0_81, %c0_82] : memref<1x2x8xf32, #tpu.memory_space<vmem>>, vector<1x1x8xf32>
    tpu.vector_store %arg6[%c0_80, %c0_81, %c0_82], %57 {strides = array<i32>} : memref<1x2x8xf32, #tpu.memory_space<vmem>>, vector<1x1x8xf32>,
    %59 = vector.shape_cast %56 : vector<1x8xf32> to vector<1x1x8xf32>
    %c0_83 = arith.constant 0 : index
    %c1_84 = arith.constant 1 : index
    %c0_85 = arith.constant 0 : index
    %60 = vector.load %arg6[%c0_83, %c1_84, %c0_85] : memref<1x2x8xf32, #tpu.memory_space<vmem>>, vector<1x1x8xf32>
    tpu.vector_store %arg6[%c0_83, %c1_84, %c0_85], %59 {strides = array<i32>} : memref<1x2x8xf32, #tpu.memory_space<vmem>>, vector<1x1x8xf32>,
    %61 = vector.shape_cast %47 : vector<256x8xf32> to vector<1x16x16x8xf32>
    %c0_86 = arith.constant 0 : index
    %c0_87 = arith.constant 0 : index
    %c0_88 = arith.constant 0 : index
    %c0_89 = arith.constant 0 : index
    %62 = vector.load %arg5[%c0_86, %c0_87, %c0_88, %c0_89] : memref<1x16x16x8xf32, #tpu.memory_space<vmem>>, vector<1x16x16x8xf32>
    tpu.vector_store %arg5[%c0_86, %c0_87, %c0_88, %c0_89], %61 {strides = array<i32>} : memref<1x16x16x8xf32, #tpu.memory_space<vmem>>, vector<1x16x16x8xf32>,
    return
  }
  func.func @transform_0(%arg0: i32) -> (i32, i32, i32, i32) {
    %c0_i32 = arith.constant 0 : i32
    %c0_i32_0 = arith.constant 0 : i32
    %c0_i32_1 = arith.constant 0 : i32
    %c0_i32_2 = arith.constant 0 : i32
    return %arg0, %c0_i32, %c0_i32_0, %c0_i32_1 : i32, i32, i32, i32
  }
  func.func @transform_1(%arg0: i32) -> (i32, i32) {
    %c0_i32 = arith.constant 0 : i32
    %c0_i32_0 = arith.constant 0 : i32
    %c0_i32_1 = arith.constant 0 : i32
    return %c0_i32, %c0_i32_0 : i32, i32
  }
  func.func @transform_2(%arg0: i32) -> (i32, i32) {
    %c0_i32 = arith.constant 0 : i32
    %c0_i32_0 = arith.constant 0 : i32
    %c0_i32_1 = arith.constant 0 : i32
    return %c0_i32, %c0_i32_0 : i32, i32
  }
  func.func @transform_3(%arg0: i32) -> (i32, i32) {
    %c0_i32 = arith.constant 0 : i32
    %c0_i32_0 = arith.constant 0 : i32
    %c0_i32_1 = arith.constant 0 : i32
    return %c0_i32, %c0_i32_0 : i32, i32
  }
  func.func @transform_4(%arg0: i32) -> (i32, i32, i32, i32) {
    %c0_i32 = arith.constant 0 : i32
    %c0_i32_0 = arith.constant 0 : i32
    %c0_i32_1 = arith.constant 0 : i32
    %c0_i32_2 = arith.constant 0 : i32
    return %arg0, %c0_i32, %c0_i32_0, %c0_i32_1 : i32, i32, i32, i32
  }
  func.func @transform_5(%arg0: i32) -> (i32, i32, i32) {
    %c0_i32 = arith.constant 0 : i32
    %c0_i32_0 = arith.constant 0 : i32
    %c0_i32_1 = arith.constant 0 : i32
    return %arg0, %c0_i32, %c0_i32_0 : i32, i32, i32
  }
}

module attributes {stable_mosaic.version = 11 : i64} {
  func.func @_bn_add_relu_kernel(%arg0: i32, %arg1: memref<1x16x128xf32, #tpu.memory_space<vmem>>, %arg2: memref<1x16x128xf32, #tpu.memory_space<vmem>>, %arg3: memref<1x128xf32, #tpu.memory_space<vmem>>, %arg4: memref<1x128xf32, #tpu.memory_space<vmem>>, %arg5: memref<1x16x128xf32, #tpu.memory_space<vmem>>) attributes {dimension_semantics = [#tpu.dimension_semantics<parallel>], iteration_bounds = array<i64: 2>, scalar_prefetch = 0 : i64, scratch_operands = 0 : i64, tpu.core_type = #tpu.core_type<tc>, window_params = [{transform_indices = @transform_0, window_bounds = array<i64: 1, 16, 128>}, {transform_indices = @transform_1, window_bounds = array<i64: 1, 16, 128>}, {pipeline_mode = #tpu.pipeline_mode<synchronous>, transform_indices = @transform_2, window_bounds = array<i64: 1, 128>}, {pipeline_mode = #tpu.pipeline_mode<synchronous>, transform_indices = @transform_3, window_bounds = array<i64: 1, 128>}, {transform_indices = @transform_4, window_bounds = array<i64: 1, 16, 128>}]} {
    %c0 = arith.constant 0 : index
    %c0_0 = arith.constant 0 : index
    %c0_1 = arith.constant 0 : index
    %0 = vector.load %arg1[%c0, %c0_0, %c0_1] : memref<1x16x128xf32, #tpu.memory_space<vmem>>, vector<1x16x128xf32>
    %c0_2 = arith.constant 0 : index
    %c0_3 = arith.constant 0 : index
    %1 = vector.load %arg3[%c0_2, %c0_3] : memref<1x128xf32, #tpu.memory_space<vmem>>, vector<1x128xf32>
    %2 = vector.shape_cast %1 : vector<1x128xf32> to vector<1x1x128xf32>
    %3 = vector.broadcast %2 : vector<1x1x128xf32> to vector<1x16x128xf32>
    %4 = arith.mulf %0, %3 : vector<1x16x128xf32>
    %c0_4 = arith.constant 0 : index
    %c0_5 = arith.constant 0 : index
    %5 = vector.load %arg4[%c0_4, %c0_5] : memref<1x128xf32, #tpu.memory_space<vmem>>, vector<1x128xf32>
    %6 = vector.shape_cast %5 : vector<1x128xf32> to vector<1x1x128xf32>
    %7 = vector.broadcast %6 : vector<1x1x128xf32> to vector<1x16x128xf32>
    %8 = arith.addf %4, %7 : vector<1x16x128xf32>
    %c0_6 = arith.constant 0 : index
    %c0_7 = arith.constant 0 : index
    %c0_8 = arith.constant 0 : index
    %9 = vector.load %arg2[%c0_6, %c0_7, %c0_8] : memref<1x16x128xf32, #tpu.memory_space<vmem>>, vector<1x16x128xf32>
    %10 = arith.addf %8, %9 : vector<1x16x128xf32>
    %cst = arith.constant 0.000000e+00 : f32
    %11 = vector.broadcast %cst : f32 to vector<1x16x128xf32>
    %12 = arith.maximumf %10, %11 : vector<1x16x128xf32>
    %c0_9 = arith.constant 0 : index
    %c0_10 = arith.constant 0 : index
    %c0_11 = arith.constant 0 : index
    %13 = vector.load %arg5[%c0_9, %c0_10, %c0_11] : memref<1x16x128xf32, #tpu.memory_space<vmem>>, vector<1x16x128xf32>
    tpu.vector_store %arg5[%c0_9, %c0_10, %c0_11], %12 {strides = array<i32>} : memref<1x16x128xf32, #tpu.memory_space<vmem>>, vector<1x16x128xf32>,
    return
  }
  func.func @transform_0(%arg0: i32) -> (i32, i32, i32) {
    %c0_i32 = arith.constant 0 : i32
    %c0_i32_0 = arith.constant 0 : i32
    %c0_i32_1 = arith.constant 0 : i32
    return %arg0, %c0_i32, %c0_i32_0 : i32, i32, i32
  }
  func.func @transform_1(%arg0: i32) -> (i32, i32, i32) {
    %c0_i32 = arith.constant 0 : i32
    %c0_i32_0 = arith.constant 0 : i32
    %c0_i32_1 = arith.constant 0 : i32
    return %arg0, %c0_i32, %c0_i32_0 : i32, i32, i32
  }
  func.func @transform_2(%arg0: i32) -> (i32, i32) {
    %c0_i32 = arith.constant 0 : i32
    %c0_i32_0 = arith.constant 0 : i32
    %c0_i32_1 = arith.constant 0 : i32
    return %c0_i32, %c0_i32_0 : i32, i32
  }
  func.func @transform_3(%arg0: i32) -> (i32, i32) {
    %c0_i32 = arith.constant 0 : i32
    %c0_i32_0 = arith.constant 0 : i32
    %c0_i32_1 = arith.constant 0 : i32
    return %c0_i32, %c0_i32_0 : i32, i32
  }
  func.func @transform_4(%arg0: i32) -> (i32, i32, i32) {
    %c0_i32 = arith.constant 0 : i32
    %c0_i32_0 = arith.constant 0 : i32
    %c0_i32_1 = arith.constant 0 : i32
    return %arg0, %c0_i32, %c0_i32_0 : i32, i32, i32
  }
}

</mosaic_0001>

<bundles_post_ra>
// kernel: tile.10
= control target key start
LH: loop header
LB: loop body
LE: loop exit
PB: predicated region body
PF: predicated region fallthrough
CT: control target
= control target key end

     0   :  { %s28_s0 = inlined_call_operand.vmem [shape: f32[8], index: 0, kind: input, shape index: {}]   ;;  %s29_s1 = inlined_call_operand.vmem [shape: f32[16,1,1,8], index: 1, kind: output, shape index: {}]  }
   0x1   :  { %v4_v0 = vld [vmem:[%s28_s0] ss:$0 sm:$0xff] }
   0x2   :  { %5 = vst [vmem:[%s29_s1] sm:$0xff] %v4_v0  ;;  %8 = vst [vmem:[%s29_s1 + $0x8] sm:$0xff] %v4_v0 }

// kernel: tile.11
= control target key start
LH: loop header
LB: loop body
LE: loop exit
PB: predicated region body
PF: predicated region fallthrough
CT: control target
= control target key end

     0   :  { %s131_s10 = smov 120   ;;  %s132_s11 = smov 104   ;;  %vm3_vm0 = vcmask 64512   ;;  %vm9_vm1 = vcmask 1048512   ;;  %vm15_vm2 = vcmask 982912   ;;  %vm21_vm3 = vcmask 917312   ;;  %s207_s0 = inlined_call_operand.vmem [shape: f32[16,1,1,8], index: 0, kind: input, shape index: {}]   ;;  %s208_s1 = inlined_call_operand.vmem [shape: f32[1,128], index: 1, kind: output, shape index: {}]  }
   0x1   :  { %v101_v0 = vld [vmem:[%s207_s0 + $0xf] sm:$0x1]   ;;  %v103_v1 = vld [vmem:[%s207_s0 + $0xd] sm:$0x1]   ;;  %v102_v2 = vld [vmem:[%s207_s0 + $0xe] sm:$0x1]  }
   0x2   :  { %7 = vrot.lane.b32.xlu0 %v101_v0, %s131_s10  ;;  %19 = vrot.lane.b32.xlu1 %v103_v1, %s132_s11  ;;  %v104_v3 = vld [vmem:[%s207_s0 + $0xc] sm:$0x1]   ;;  %s133_s16 = smov 112   ;;  %s134_s17 = smov 96   ;;  %v105_v4 = vld [vmem:[%s207_s0 + $0xb] sm:$0x1]  }
   0x3   :  { %v106_v5 = vld [vmem:[%s207_s0 + $0xa] sm:$0x1]   ;;  %v2_v6 = vld [vmem:[%s207_s0] sm:$0x1]   ;;  %s135_s24 = smov 88   ;;  %s136_s25 = smov 80  }
   0x4   :  { %4 = vst.msk [vmem:[#allocation0] sm:$0x1] %vm3_vm0, %v2_v6   ;;  %v107_v7 = vld [vmem:[%s207_s0 + $0x9] sm:$0x1]   ;;  %v108_v8 = vld [vmem:[%s207_s0 + $0x8] sm:$0x1]  }
   0x5   :  { %s137_s30 = smov 72   ;;  %s138_s2 = smov 64   ;;  %v109_v9 = vld [vmem:[%s207_s0 + $0x7] sm:$0x1]   ;;  %v110_v10 = vld [vmem:[%s207_s0 + $0x6] sm:$0x1]  }
   0x6   :  { %13 = vrot.lane.b32.xlu0 %v102_v2, %s133_s16  ;;  %25 = vrot.lane.b32.xlu1 %v104_v3, %s134_s17  ;;  %s139_s7 = smov 56   ;;  %s140_s8 = smov 48   ;;  %v111_v11 = vld [vmem:[%s207_s0 + $0x5] sm:$0x1]   ;;  %v112_v12 = vld [vmem:[%s207_s0 + $0x4] sm:$0x1]  }
   0x7   :  { %s141_s13 = smov 40   ;;  %s142_s14 = smov 32   ;;  %v113_v13 = vld [vmem:[%s207_s0 + $0x3] sm:$0x1]   ;;  %v114_v14 = vld [vmem:[%s207_s0 + $0x2] sm:$0x1]  }
   0x8   :  { %s143_s19 = smov 24   ;;  %s144_s20 = smov 16   ;;  %v115_v15 = vld [vmem:[%s207_s0 + $0x1] sm:$0x1]   ;;  %vm27_vm4 = vcmask 851712   ;;  %vm33_vm5 = vcmask 786112  }
   0x9   :  { %s145_s0 = smov 8   ;;  %vm39_vm6 = vcmask 720512   ;;  %vm45_vm7 = vcmask 654912   ;;  %vm51_vm8 = vcmask 589312   ;;  %vm57_vm9 = vcmask 523712  }
   0xa   :  { %31 = vrot.lane.b32.xlu0 %v105_v4, %s135_s24  ;;  %37 = vrot.lane.b32.xlu1 %v106_v5, %s136_s25  ;;  %vm63_vm10 = vcmask 458112   ;;  %vm69_vm11 = vcmask 392512   ;;  %vm75_vm12 = vcmask 326912   ;;  %vm81_vm13 = vcmask 261312  }
   0xb   :  { %vm87_vm14 = vcmask 195712   ;;  %vm93_vm15 = vcmask 130112  }
   0xe   :  { %43 = vrot.lane.b32.xlu0 %v107_v7, %s137_s30  ;;  %49 = vrot.lane.b32.xlu1 %v108_v8, %s138_s2 }
  0x12   :  { %55 = vrot.lane.b32.xlu0 %v109_v9, %s139_s7  ;;  %61 = vrot.lane.b32.xlu1 %v110_v10, %s140_s8 }
  0x16   :  { %67 = vrot.lane.b32.xlu0 %v111_v11, %s141_s13  ;;  %73 = vrot.lane.b32.xlu1 %v112_v12, %s142_s14 }
  0x1a   :  { %79 = vrot.lane.b32.xlu0 %v113_v13, %s143_s19  ;;  %85 = vrot.lane.b32.xlu1 %v114_v14, %s144_s20 }
  0x1e   :  { %91 = vrot.lane.b32.xlu0 %v115_v15, %s145_s0 }
  0x74   :  { %v8_v16 = vpop.permute.xlu0 %7   ;;  %v20_v17 = vpop.permute.xlu1 %19  }
  0x75   :  { %10 = vst.msk [vmem:[#allocation0] sm:$0x1] %vm9_vm1, %v8_v16  }
  0x78   :  { %v14_v18 = vpop.permute.xlu0 %13   ;;  %v26_v19 = vpop.permute.xlu1 %25  }
  0x79   :  { %16 = vst.msk [vmem:[#allocation0] sm:$0x1] %vm15_vm2, %v14_v18  }
  0x7a   :  { %22 = vst.msk [vmem:[#allocation0] sm:$0x1] %vm21_vm3, %v20_v17  }
  0x7b   :  { %28 = vst.msk [vmem:[#allocation0] sm:$0x1] %vm27_vm4, %v26_v19  }
  0x7c   :  { %v32_v20 = vpop.permute.xlu0 %31   ;;  %v38_v21 = vpop.permute.xlu1 %37  }
  0x7d   :  { %34 = vst.msk [vmem:[#allocation0] sm:$0x1] %vm33_vm5, %v32_v20  }
  0x7e   :  { %40 = vst.msk [vmem:[#allocation0] sm:$0x1] %vm39_vm6, %v38_v21  }
  0x80   :  { %v44_v22 = vpop.permute.xlu0 %43   ;;  %v50_v23 = vpop.permute.xlu1 %49  }
  0x81   :  { %46 = vst.msk [vmem:[#allocation0] sm:$0x1] %vm45_vm7, %v44_v22  }
  0x82   :  { %52 = vst.msk [vmem:[#allocation0] sm:$0x1] %vm51_vm8, %v50_v23  }
  0x84   :  { %v56_v24 = vpop.permute.xlu0 %55   ;;  %v62_v25 = vpop.permute.xlu1 %61  }
  0x85   :  { %58 = vst.msk [vmem:[#allocation0] sm:$0x1] %vm57_vm9, %v56_v24  }
  0x86   :  { %64 = vst.msk [vmem:[#allocation0] sm:$0x1] %vm63_vm10, %v62_v25  }
  0x88   :  { %v68_v26 = vpop.permute.xlu0 %67   ;;  %v74_v27 = vpop.permute.xlu1 %73  }
  0x89   :  { %70 = vst.msk [vmem:[#allocation0] sm:$0x1] %vm69_vm11, %v68_v26  }
  0x8a   :  { %76 = vst.msk [vmem:[#allocation0] sm:$0x1] %vm75_vm12, %v74_v27  }
  0x8c   :  { %v80_v28 = vpop.permute.xlu0 %79   ;;  %v86_v29 = vpop.permute.xlu1 %85  }
  0x8d   :  { %82 = vst.msk [vmem:[#allocation0] sm:$0x1] %vm81_vm13, %v80_v28  }
  0x8e   :  { %88 = vst.msk [vmem:[#allocation0] sm:$0x1] %vm87_vm14, %v86_v29  }
  0x90   :  { %v92_v30 = vpop.permute.xlu0 %91  }
  0x91   :  { %94 = vst.msk [vmem:[#allocation0] sm:$0x1] %vm93_vm15, %v92_v30  }
  0x98   :  { %v98_v31 = vld [vmem:[#allocation0] sm:$0x1] }
  0x99   :  { %100 = vst [vmem:[%s208_s1] sm:$0x1] %v98_v31 }

// kernel: basic_block.5
= control target key start
LH: loop header
LB: loop body
LE: loop exit
PB: predicated region body
PF: predicated region fallthrough
CT: control target
= control target key end

     0   :  { %s372_s15 = smov 0   ;;  %s398_s0 = inlined_call_operand.vmem [shape: f32[2,16,128], index: 0, kind: input, shape index: {}]   ;;  %s399_s1 = inlined_call_operand.vmem [shape: f32[2,16,128], index: 1, kind: input, shape index: {}]   ;;  %s400_s2 = inlined_call_operand.vmem [shape: f32[1,128], index: 2, kind: input, shape index: {}]   ;;  %s401_s3 = inlined_call_operand.vmem [shape: f32[1,128], index: 3, kind: input, shape index: {}]   ;;  %s402_s4 = inlined_call_operand.vmem [shape: f32[2,16,128], index: 4, kind: output, shape index: {}]  }
   0x1 LB: > { %s313_s16 = sadd.s32 4294967295, %s345_s15   ;;  %p317_p0 = scmp.ge.s32.totalorder %s345_s15, 1  ;;  %s345_s15 = sphi %s372_s15, %s14_s15  }
   0x2   : > { %p172_p1 = scmp.lt.s32.totalorder %s345_s15, 3 }
   0x4   : > { %p173_p2 = pnand %p317_p0, %p172_p1 }
   0x5   : > { %p203_p3 = scmp.lt.s32.totalorder (!%p173_p2), %s313_s16, 1  ;;  %v324_v0 = vld [vmem:[%s400_s2] ss:$0 sm:$0xff] (!%p173_p2) }
   0x6   : > { %176 = sbr.rel (%p173_p2) target bundleno = 26 (0x1a), region = 36  ;;  %v325_v3 = vld [vmem:[%s401_s3] ss:$0 sm:$0xff] (!%p173_p2) }
   0xd   : > { %s404_s16 = smov (!%p203_p3, %s313_s16), 1 }
   0xe   : > { %s328_s17 = sshll.u32 %s404_s16, 4 }
   0xf   : > { %s207_s22 = scalar_lea.vmem %s398_s0, %s328_s17  ;;  %s212_s25 = scalar_lea.vmem %s399_s1, %s328_s17 }
  0x10   : > { %v218_v1 = vld [vmem:[%s207_s22] sm:$0xff]  ;;  %v219_v2 = vld [vmem:[%s207_s22 + $0x8] sm:$0xff]  ;;  %s217_s30 = scalar_lea.vmem %s402_s4, %s328_s17 }
  0x11   : > { %v227_v4 = vmul.f32 %v324_v0, %v218_v1  ;;  %v228_v5 = vmul.f32 %v324_v0, %v219_v2  ;;  %v238_v6 = vld [vmem:[%s212_s25] sm:$0xff]  ;;  %v239_v7 = vld [vmem:[%s212_s25 + $0x8] sm:$0xff] }
  0x13   : > { %v236_v8 = vadd.f32 %v325_v3, %v227_v4  ;;  %v237_v9 = vadd.f32 %v325_v3, %v228_v5 }
  0x15   : > { %v240_v10 = vadd.f32 %v238_v6, %v236_v8  ;;  %v241_v11 = vadd.f32 %v239_v7, %v237_v9 }
  0x17   : > { %v242_v12 = vmax.f32 %v240_v10, 0.0  ;;  %v243_v13 = vmax.f32 %v241_v11, 0.0 }
  0x19   : > { %244 = vst [vmem:[%s217_s30] sm:$0xff] %v242_v12  ;;  %245 = vst [vmem:[%s217_s30 + $0x8] sm:$0xff] %v243_v13 }
  0x1a PF: > { %s14_s15 = sadd.s32 1, %s345_s15  }
  0x1b   : > { %p11_p4 = scmp.ge.s32.totalorder %s14_s15, 4  }
  0x1d   :  { %13 = sbr.rel (!%p11_p4) target bundleno = 1 (0x1), region = 69 }

// kernel: basic_block.4
= control target key start
LH: loop header
LB: loop body
LE: loop exit
PB: predicated region body
PF: predicated region fallthrough
CT: control target
= control target key end

     0   :  { %s2999_s18 = smov 0   ;;  %s4327_s0 = inlined_call_operand.vmem [shape: f32[2,16,16,8], index: 0, kind: input, shape index: {}]   ;;  %s4328_s1 = inlined_call_operand.vmem [shape: f32[1,8], index: 1, kind: input, shape index: {}]   ;;  %s4329_s2 = inlined_call_operand.vmem [shape: f32[1,8], index: 2, kind: input, shape index: {}]   ;;  %s4330_s3 = inlined_call_operand.vmem [shape: f32[72,8], index: 3, kind: input, shape index: {}]   ;;  %s4331_s4 = inlined_call_operand.vmem [shape: f32[2,16,16,8], index: 4, kind: output, shape index: {0}]   ;;  %s4332_s5 = inlined_call_operand.vmem [shape: f32[2,2,8], index: 5, kind: output, shape index: {1}]  }
   0x1 LB: > { %s2752_s19 = sadd.s32 4294967295, %s2958_s18   ;;  %p2756_p0 = scmp.ge.s32.totalorder %s2958_s18, 1  ;;  %s2958_s18 = sphi %s2999_s18, %s16_s18  }
   0x2   : > { %p190_p1 = scmp.lt.s32.totalorder %s2958_s18, 3 }
   0x4   : > { %p191_p2 = pnand %p2756_p0, %p190_p1 }
   0x5   : > { %vm378_vm0 = vcmask (!%p191_p2), 64512   ;;  %vm387_vm1 = vcmask (!%p191_p2), 57344   ;;  %vm381_vm2 = vcmask (!%p191_p2), 58368   ;;  %p3009_p3 = scmp.lt.s32.totalorder (!%p191_p2), %s2752_s19, 1  ;;  %v2960_v0 = vmov (!%p191_p2), 0.0   ;;  %s2961_s29 = smov (!%p191_p2), 8  }
   0x6   : > { %194 = sbr.rel (%p191_p2) target bundleno = 984 (0x3d8), region = 36  ;;  %379 = vst.msk [vmem:[#allocation2] sm:$0xff] (!%p191_p2), %vm378_vm0, %v2960_v0  ;;  %380 = vst.msk [vmem:[#allocation2 + $0x8] sm:$0xff] (!%p191_p2), %vm378_vm0, %v2960_v0  ;;  %v3065_v1 = vld [vmem:[%s4328_s1] ss:$0 sm:$0xff] (!%p191_p2)  ;;  %s2962_s30 = smov (!%p191_p2), 16  }
   0x7   : > { %384 = vst.msk [vmem:[#allocation2 + $0x198] sm:$0xff] (!%p191_p2), %vm378_vm0, %v2960_v0  ;;  %385 = vst.msk [vmem:[#allocation2 + $0x1a0] sm:$0xff] (!%p191_p2), %vm378_vm0, %v2960_v0  ;;  %v3077_v2 = vld [vmem:[%s4329_s2] ss:$0 sm:$0xff] (!%p191_p2)  ;;  %s2963_s6 = smov (!%p191_p2), 24   ;;  %s2964_s7 = smov (!%p191_p2), 32  }
   0x8   : > { %389 = vst.msk [vmem:[#allocation2 + $0x18] sm:$0x1] (!%p191_p2), %vm387_vm1, %v2960_v0  ;;  %390 = vst.msk [vmem:[#allocation2 + $0x30] sm:$0x1] (!%p191_p2), %vm387_vm1, %v2960_v0  ;;  %s2965_s8 = smov (!%p191_p2), 40   ;;  %s2966_s13 = smov (!%p191_p2), 48  }
   0x9   : > { %391 = vst.msk [vmem:[#allocation2 + $0x48] sm:$0x1] (!%p191_p2), %vm387_vm1, %v2960_v0  ;;  %392 = vst.msk [vmem:[#allocation2 + $0x60] sm:$0x1] (!%p191_p2), %vm387_vm1, %v2960_v0  ;;  %s2967_s25 = smov (!%p191_p2), 56   ;;  %s2968_s12 = smov (!%p191_p2), 64  }
   0xa   : > { %393 = vst.msk [vmem:[#allocation2 + $0x78] sm:$0x1] (!%p191_p2), %vm387_vm1, %v2960_v0  ;;  %394 = vst.msk [vmem:[#allocation2 + $0x90] sm:$0x1] (!%p191_p2), %vm387_vm1, %v2960_v0  ;;  %vm681_vm3 = vcmask (!%p191_p2), 130112   ;;  %vm874_vm4 = vcmask (!%p191_p2), 195712  }
   0xb   : > { %395 = vst.msk [vmem:[#allocation2 + $0xa8] sm:$0x1] (!%p191_p2), %vm387_vm1, %v2960_v0  ;;  %396 = vst.msk [vmem:[#allocation2 + $0xc0] sm:$0x1] (!%p191_p2), %vm387_vm1, %v2960_v0  ;;  %vm1067_vm5 = vcmask (!%p191_p2), 261312   ;;  %vm1260_vm6 = vcmask (!%p191_p2), 326912  }
   0xc   : > { %397 = vst.msk [vmem:[#allocation2 + $0xd8] sm:$0x1] (!%p191_p2), %vm387_vm1, %v2960_v0  ;;  %398 = vst.msk [vmem:[#allocation2 + $0xf0] sm:$0x1] (!%p191_p2), %vm387_vm1, %v2960_v0  ;;  %vm1453_vm7 = vcmask (!%p191_p2), 392512   ;;  %vm1647_vm8 = vcmask (!%p191_p2), 458112  }
   0xd   : > { %399 = vst.msk [vmem:[#allocation2 + $0x108] sm:$0x1] %vm387_vm1, %v2960_v0  ;;  %400 = vst.msk [vmem:[#allocation2 + $0x120] sm:$0x1] %vm387_vm1, %v2960_v0  ;;  %s4335_s19 = smov (!%p3009_p3, %s2752_s19), 1  ;;  %v521_v12 = vld [vmem:[#allocation2 + $0x1] sm:$0xff] }
   0xe   : > { %401 = vst.msk [vmem:[#allocation2 + $0x138] sm:$0x1] %vm387_vm1, %v2960_v0  ;;  %402 = vst.msk [vmem:[#allocation2 + $0x150] sm:$0x1] %vm387_vm1, %v2960_v0  ;;  %s2798_s21 = sshll.u32 %s4335_s19, 8  ;;  %585 = vrot.lane.b32.xlu0 %v521_v12, %s2961_s29  ;;  %vm1840_vm9 = vcmask 523712  }
   0xf   : > { %403 = vst.msk [vmem:[#allocation2 + $0x168] sm:$0x1] %vm387_vm1, %v2960_v0  ;;  %404 = vst.msk [vmem:[#allocation2 + $0x180] sm:$0x1] %vm387_vm1, %v2960_v0  ;;  %s3072_s26 = scalar_lea.vmem %s4327_s0, %s2798_s21  ;;  %vm2033_vm10 = vcmask 589312   ;;  %vm2107_vm11 = vcmask 588800   ;;  %s3848_s22 = scalar_lea.vmem %s4331_s4, %s2798_s21 }
  0x10   : > { %407 = vst.msk [vmem:[#allocation2 + $0x29] sm:$0x1] %vm387_vm1, %v2960_v0  ;;  %408 = vst.msk [vmem:[#allocation2 + $0x41] sm:$0x1] %vm387_vm1, %v2960_v0  ;;  %v236_v3 = vld [vmem:[%s3072_s26] sm:$0xff]  ;;  %v238_v4 = vld [vmem:[%s3072_s26 + $0x10] sm:$0xff] }
  0x11   : > { %409 = vst.msk [vmem:[#allocation2 + $0x59] sm:$0x1] %vm387_vm1, %v2960_v0  ;;  %410 = vst.msk [vmem:[#allocation2 + $0x71] sm:$0x1] %vm387_vm1, %v2960_v0  ;;  %v237_v5 = vld [vmem:[%s3072_s26 + $0x8] sm:$0xff]  ;;  %v275_v6 = vmul.f32 %v3065_v1, %v236_v3  ;;  %v277_v7 = vmul.f32 %v3065_v1, %v238_v4  ;;  %v240_v9 = vld [vmem:[%s3072_s26 + $0x20] sm:$0xff] }
  0x12   : > { %411 = vst.msk [vmem:[#allocation2 + $0x89] sm:$0x1] %vm387_vm1, %v2960_v0  ;;  %412 = vst.msk [vmem:[#allocation2 + $0xa1] sm:$0x1] %vm387_vm1, %v2960_v0  ;;  %v276_v8 = vmul.f32 %v3065_v1, %v237_v5  ;;  %v239_v10 = vld [vmem:[%s3072_s26 + $0x18] sm:$0xff]  ;;  %v242_v11 = vld [vmem:[%s3072_s26 + $0x30] sm:$0xff]  ;;  %v279_v13 = vmul.f32 %v3065_v1, %v240_v9 }
  0x13   : > { %413 = vst.msk [vmem:[#allocation2 + $0xb9] sm:$0x1] %vm387_vm1, %v2960_v0  ;;  %414 = vst.msk [vmem:[#allocation2 + $0xd1] sm:$0x1] %vm387_vm1, %v2960_v0  ;;  %v278_v14 = vmul.f32 %v3065_v1, %v239_v10  ;;  %v281_v15 = vmul.f32 %v3065_v1, %v242_v11  ;;  %v241_v16 = vld [vmem:[%s3072_s26 + $0x28] sm:$0xff]  ;;  %v314_v18 = vadd.f32 %v3077_v2, %v275_v6  ;;  %v244_v22 = vld [vmem:[%s3072_s26 + $0x40] sm:$0xff] }
  0x14   : > { %415 = vst.msk [vmem:[#allocation2 + $0xe9] sm:$0x1] %vm387_vm1, %v2960_v0  ;;  %416 = vst.msk [vmem:[#allocation2 + $0x101] sm:$0x1] %vm387_vm1, %v2960_v0  ;;  %v316_v19 = vadd.f32 %v3077_v2, %v277_v7  ;;  %v315_v20 = vadd.f32 %v3077_v2, %v276_v8  ;;  %v280_v21 = vmul.f32 %v3065_v1, %v241_v16  ;;  %v243_v27 = vld [vmem:[%s3072_s26 + $0x38] sm:$0xff]  ;;  %v246_v28 = vld [vmem:[%s3072_s26 + $0x50] sm:$0xff] }
  0x15   : > { %417 = vst.msk [vmem:[#allocation2 + $0x119] sm:$0x1] %vm387_vm1, %v2960_v0  ;;  %418 = vst.msk [vmem:[#allocation2 + $0x131] sm:$0x1] %vm387_vm1, %v2960_v0  ;;  %v318_v23 = vadd.f32 %v3077_v2, %v279_v13  ;;  %v317_v24 = vadd.f32 %v3077_v2, %v278_v14  ;;  %v320_v25 = vadd.f32 %v3077_v2, %v281_v15  ;;  %v245_v29 = vld [vmem:[%s3072_s26 + $0x48] sm:$0xff]  ;;  %v346_v30 = vmax.f32 %v314_v18, 0.0 }
  0x16   : > { %419 = vst.msk [vmem:[#allocation2 + $0x149] sm:$0x1] %vm387_vm1, %v2960_v0  ;;  %420 = vst.msk [vmem:[#allocation2 + $0x161] sm:$0x1] %vm387_vm1, %v2960_v0  ;;  %v283_v26 = vmul.f32 %v3065_v1, %v244_v22  ;;  %v348_v31 = vmax.f32 %v316_v19, 0.0  ;;  %v347_v32 = vmax.f32 %v315_v20, 0.0  ;;  %v319_v33 = vadd.f32 %v3077_v2, %v280_v21 }
  0x17   : > { %421 = vst.msk [vmem:[#allocation2 + $0x179] sm:$0x1] %vm387_vm1, %v2960_v0  ;;  %422 = vst.msk [vmem:[#allocation2 + $0x191] sm:$0x1] %vm387_vm1, %v2960_v0  ;;  %v248_v34 = vld [vmem:[%s3072_s26 + $0x60] sm:$0xff]  ;;  %v247_v35 = vld [vmem:[%s3072_s26 + $0x58] sm:$0xff]  ;;  %v282_v43 = vmul.f32 %v3065_v1, %v243_v27  ;;  %v285_v44 = vmul.f32 %v3065_v1, %v246_v28  ;;  %v284_v45 = vmul.f32 %v3065_v1, %v245_v29 }
  0x18   : > { %382 = vst.msk [vmem:[#allocation2 + $0x10] sm:$0x3] %vm381_vm2, %v2960_v0  ;;  %386 = vst.msk [vmem:[#allocation2 + $0x1a8] sm:$0x3] %vm381_vm2, %v2960_v0  ;;  %v250_v36 = vld [vmem:[%s3072_s26 + $0x70] sm:$0xff]  ;;  %v350_v37 = vmax.f32 %v318_v23, 0.0  ;;  %v322_v40 = vadd.f32 %v3077_v2, %v283_v26  ;;  %v287_v48 = vmul.f32 %v3065_v1, %v248_v34  ;;  %v286_v49 = vmul.f32 %v3065_v1, %v247_v35 }
  0x19   : > { %388 = vst.msk [vmem:[#allocation2] sm:$0x1] %vm387_vm1, %v2960_v0  ;;  %405 = vst.msk [vmem:[#allocation2 + $0x198] sm:$0x1] %vm387_vm1, %v2960_v0  ;;  %v349_v38 = vmax.f32 %v317_v24, 0.0  ;;  %v352_v39 = vmax.f32 %v320_v25, 0.0  ;;  %v289_v50 = vmul.f32 %v3065_v1, %v250_v36  ;;  %v321_v51 = vadd.f32 %v3077_v2, %v282_v43 }
  0x1a   : > { %406 = vst.msk [vmem:[#allocation2 + $0x11] sm:$0x1] %vm387_vm1, %v2960_v0  ;;  %423 = vst.msk [vmem:[#allocation2 + $0x1a9] sm:$0x1] %vm387_vm1, %v2960_v0  ;;  %v249_v41 = vld [vmem:[%s3072_s26 + $0x68] sm:$0xff]  ;;  %v351_v42 = vmax.f32 %v319_v33, 0.0  ;;  %v324_v52 = vadd.f32 %v3077_v2, %v285_v44  ;;  %v323_v53 = vadd.f32 %v3077_v2, %v284_v45  ;;  %v326_v57 = vadd.f32 %v3077_v2, %v287_v48 }
  0x1b   : > { %425 = vst.msk [vmem:[#allocation2 + $0x19] sm:$0xff] %vm378_vm0, %v346_v30  ;;  %427 = vst.msk [vmem:[#allocation2 + $0x31] sm:$0xff] %vm378_vm0, %v348_v31  ;;  %v252_v46 = vld [vmem:[%s3072_s26 + $0x80] sm:$0xff]  ;;  %v354_v47 = vmax.f32 %v322_v40, 0.0  ;;  %v288_v54 = vmul.f32 %v3065_v1, %v249_v41  ;;  %v251_v55 = vld [vmem:[%s3072_s26 + $0x78] sm:$0xff]  ;;  %v325_v58 = vadd.f32 %v3077_v2, %v286_v49  ;;  %v328_v59 = vadd.f32 %v3077_v2, %v289_v50  ;;  %s2761_s21 = sshll.u32 %s4335_s19, 1 }
  0x1c   : > { %426 = vst.msk [vmem:[#allocation2 + $0x21] sm:$0xff] %vm378_vm0, %v347_v32  ;;  %429 = vst.msk [vmem:[#allocation2 + $0x49] sm:$0xff] %vm378_vm0, %v350_v37  ;;  %v254_v56 = vld [vmem:[%s3072_s26 + $0x90] sm:$0xff]  ;;  %v291_v60 = vmul.f32 %v3065_v1, %v252_v46  ;;  %v253_v61 = vld [vmem:[%s3072_s26 + $0x88] sm:$0xff]  ;;  %v353_v0 = vmax.f32 %v321_v51, 0.0  ;;  %v356_v3 = vmax.f32 %v324_v52, 0.0  ;;  %v290_v14 = vmul.f32 %v3065_v1, %v251_v55 }
  0x1d   : > { %428 = vst.msk [vmem:[#allocation2 + $0x39] sm:$0xff] %vm378_vm0, %v349_v38  ;;  %431 = vst.msk [vmem:[#allocation2 + $0x61] sm:$0xff] %vm378_vm0, %v352_v39  ;;  %v256_v62 = vld [vmem:[%s3072_s26 + $0xa0] sm:$0xff]  ;;  %v255_v63 = vld [vmem:[%s3072_s26 + $0x98] sm:$0xff]  ;;  %v355_v4 = vmax.f32 %v323_v53, 0.0  ;;  %v327_v5 = vadd.f32 %v3077_v2, %v288_v54  ;;  %v358_v9 = vmax.f32 %v326_v57, 0.0  ;;  %v293_v15 = vmul.f32 %v3065_v1, %v254_v56 }
  0x1e   : > { %430 = vst.msk [vmem:[#allocation2 + $0x51] sm:$0xff] %vm378_vm0, %v351_v42  ;;  %433 = vst.msk [vmem:[#allocation2 + $0x79] sm:$0xff] %vm378_vm0, %v354_v47  ;;  %v258_v6 = vld [vmem:[%s3072_s26 + $0xb0] sm:$0xff]  ;;  %v458_v8 = vld [vmem:[#allocation2 + $0x8] sm:$0xff]  ;;  %v357_v10 = vmax.f32 %v325_v58, 0.0  ;;  %v360_v11 = vmax.f32 %v328_v59, 0.0  ;;  %v330_v12 = vadd.f32 %v3077_v2, %v291_v60  ;;  %v292_v16 = vmul.f32 %v3065_v1, %v253_v61 }
  0x1f   : > { %v522_v17 = vld [vmem:[#allocation2 + $0x9] sm:$0xff]  ;;  %490 = vst.msk [vmem:[#allocation3 + $0x8] sm:$0xff] %vm378_vm0, %v458_v8  ;;  %432 = vst.msk [vmem:[#allocation2 + $0x69] sm:$0xff] %vm378_vm0, %v353_v0  ;;  %v359_v13 = vmax.f32 %v327_v5, 0.0  ;;  %v260_v18 = vld [vmem:[%s3072_s26 + $0xc0] sm:$0xff]  ;;  %v295_v22 = vmul.f32 %v3065_v1, %v256_v62  ;;  %v294_v23 = vmul.f32 %v3065_v1, %v255_v63  ;;  %v297_v24 = vmul.f32 %v3065_v1, %v258_v6 }
  0x20   : > { %587 = vrot.lane.b32.xlu0 %v522_v17, %s2961_s29  ;;  %v457_v7 = vld [vmem:[#allocation2] sm:$0xff]  ;;  %435 = vst.msk [vmem:[#allocation2 + $0x91] sm:$0xff] %vm378_vm0, %v356_v3  ;;  %434 = vst.msk [vmem:[#allocation2 + $0x81] sm:$0xff] %vm378_vm0, %v355_v4  ;;  %v257_v17 = vld [vmem:[%s3072_s26 + $0xa8] sm:$0xff]  ;;  %v362_v21 = vmax.f32 %v330_v12, 0.0  ;;  %v329_v26 = vadd.f32 %v3077_v2, %v290_v14  ;;  %v332_v27 = vadd.f32 %v3077_v2, %v293_v15 }
  0x21   : > { %489 = vst.msk [vmem:[#allocation3] sm:$0xff] %vm378_vm0, %v457_v7  ;;  %437 = vst.msk [vmem:[#allocation2 + $0xa9] sm:$0xff] %vm378_vm0, %v358_v9  ;;  %v259_v25 = vld [vmem:[%s3072_s26 + $0xb8] sm:$0xff]  ;;  %v331_v28 = vadd.f32 %v3077_v2, %v292_v16  ;;  %v262_v29 = vld [vmem:[%s3072_s26 + $0xd0] sm:$0xff]  ;;  %v334_v33 = vadd.f32 %v3077_v2, %v295_v22  ;;  %v333_v34 = vadd.f32 %v3077_v2, %v294_v23 }
  0x22   : > { %v3153_v19 = vld [vmem:[#allocation2 + $0x19] sm:$0xff]  ;;  %v3155_v20 = vld [vmem:[#allocation2 + $0x31] sm:$0xff]  ;;  %436 = vst.msk [vmem:[#allocation2 + $0x99] sm:$0xff] %vm378_vm0, %v357_v10  ;;  %439 = vst.msk [vmem:[#allocation2 + $0xc1] sm:$0xff] %vm378_vm0, %v360_v11  ;;  %v336_v35 = vadd.f32 %v3077_v2, %v297_v24  ;;  %v296_v36 = vmul.f32 %v3065_v1, %v257_v17  ;;  %v361_v38 = vmax.f32 %v329_v26, 0.0  ;;  %v364_v39 = vmax.f32 %v332_v27, 0.0 }
  0x23   : > { %589 = vrot.lane.b32.xlu1 %v3153_v19, %s2961_s29  ;;  %438 = vst.msk [vmem:[#allocation2 + $0xb1] sm:$0xff] %vm378_vm0, %v359_v13  ;;  %v261_v30 = vld [vmem:[%s3072_s26 + $0xc8] sm:$0xff]  ;;  %441 = vst.msk [vmem:[#allocation2 + $0xd9] sm:$0xff] %vm378_vm0, %v362_v21  ;;  %v3183_v37 = vld [vmem:[#allocation2 + $0x20] sm:$0xff]  ;;  %v363_v40 = vmax.f32 %v331_v28, 0.0  ;;  %v299_v41 = vmul.f32 %v3065_v1, %v260_v18  ;;  %v366_v45 = vmax.f32 %v334_v33, 0.0  ;;  %v298_v53 = vmul.f32 %v3065_v1, %v259_v25 }
  0x24   : > { %593 = vrot.lane.b32.xlu0 %v3155_v20, %s2961_s29  ;;  %v3174_v31 = vld [vmem:[#allocation2 + $0x21] sm:$0xff]  ;;  %v3176_v32 = vld [vmem:[#allocation2 + $0x49] sm:$0xff]  ;;  %v263_v43 = vld [vmem:[%s3072_s26 + $0xd8] sm:$0xff]  ;;  %492 = vst.msk [vmem:[#allocation3 + $0x18] sm:$0xff] %vm378_vm0, %v3183_v37  ;;  %v365_v46 = vmax.f32 %v333_v34, 0.0  ;;  %v368_v47 = vmax.f32 %v336_v35, 0.0  ;;  %v335_v48 = vadd.f32 %v3077_v2, %v296_v36  ;;  %v301_v54 = vmul.f32 %v3065_v1, %v262_v29 }
  0x25   : > { %v264_v42 = vld [vmem:[%s3072_s26 + $0xe0] sm:$0xff]  ;;  %v3188_v44 = vld [vmem:[#allocation2 + $0x18] sm:$0xff]  ;;  %v265_v49 = vld [vmem:[%s3072_s26 + $0xe8] sm:$0xff]  ;;  %440 = vst.msk [vmem:[#allocation2 + $0xc9] sm:$0xff] %vm378_vm0, %v361_v38  ;;  %v338_v52 = vadd.f32 %v3077_v2, %v299_v41  ;;  %v300_v60 = vmul.f32 %v3065_v1, %v261_v30  ;;  %v302_v62 = vmul.f32 %v3065_v1, %v263_v43  ;;  %v337_v0 = vadd.f32 %v3077_v2, %v298_v53 }
  0x26   : > { %v3194_v50 = vld [vmem:[#allocation2 + $0x30] sm:$0xff]  ;;  %v3196_v51 = vld [vmem:[#allocation2 + $0x38] sm:$0xff]  ;;  %491 = vst.msk [vmem:[#allocation3 + $0x10] sm:$0xff] %vm378_vm0, %v3188_v44  ;;  %443 = vst.msk [vmem:[#allocation2 + $0xf1] sm:$0xff] %vm378_vm0, %v364_v39  ;;  %v367_v59 = vmax.f32 %v335_v48, 0.0  ;;  %v303_v61 = vmul.f32 %v3065_v1, %v264_v42  ;;  %v340_v3 = vadd.f32 %v3077_v2, %v301_v54  ;;  %v304_v4 = vmul.f32 %v3065_v1, %v265_v49 }
  0x27   : > { %591 = vrot.lane.b32.xlu1 %v3174_v31, %s2961_s29  ;;  %442 = vst.msk [vmem:[#allocation2 + $0xe1] sm:$0xff] %vm378_vm0, %v363_v40  ;;  %v3210_v55 = vld [vmem:[#allocation2 + $0x48] sm:$0xff]  ;;  %v3212_v56 = vld [vmem:[#allocation2 + $0x50] sm:$0xff]  ;;  %493 = vst.msk [vmem:[#allocation3 + $0x20] sm:$0xff] %vm378_vm0, %v3194_v50  ;;  %v370_v63 = vmax.f32 %v338_v52, 0.0  ;;  %v339_v5 = vadd.f32 %v3077_v2, %v300_v60  ;;  %v341_v7 = vadd.f32 %v3077_v2, %v302_v62  ;;  %v369_v1 = vmax.f32 %v337_v0, 0.0 }
  0x28   : > { %597 = vrot.lane.b32.xlu0 %v3176_v32, %s2961_s29  ;;  %494 = vst.msk [vmem:[#allocation3 + $0x28] sm:$0xff] %vm378_vm0, %v3196_v51  ;;  %v3218_v57 = vld [vmem:[#allocation2 + $0x39] sm:$0xff]  ;;  %v3220_v58 = vld [vmem:[#allocation2 + $0x61] sm:$0xff]  ;;  %445 = vst.msk [vmem:[#allocation2 + $0x109] sm:$0xff] %vm378_vm0, %v366_v45  ;;  %v342_v6 = vadd.f32 %v3077_v2, %v303_v61  ;;  %v372_v11 = vmax.f32 %v340_v3, 0.0  ;;  %v343_v12 = vadd.f32 %v3077_v2, %v304_v4 }
  0x29   : > { %444 = vst.msk [vmem:[#allocation2 + $0xf9] sm:$0xff] %vm378_vm0, %v365_v46  ;;  %447 = vst.msk [vmem:[#allocation2 + $0x121] sm:$0xff] %vm378_vm0, %v368_v47  ;;  %v3239_v8 = vld [vmem:[#allocation2 + $0x60] sm:$0xff]  ;;  %v3245_v9 = vld [vmem:[#allocation2 + $0x51] sm:$0xff]  ;;  %v371_v14 = vmax.f32 %v339_v5, 0.0  ;;  %v373_v16 = vmax.f32 %v341_v7, 0.0 }
  0x2a   : > { %495 = vst.msk [vmem:[#allocation3 + $0x30] sm:$0xff] %vm378_vm0, %v3210_v55  ;;  %496 = vst.msk [vmem:[#allocation3 + $0x38] sm:$0xff] %vm378_vm0, %v3212_v56  ;;  %v3247_v10 = vld [vmem:[#allocation2 + $0x79] sm:$0xff]  ;;  %v374_v15 = vmax.f32 %v342_v6, 0.0  ;;  %v3257_v17 = vld [vmem:[#allocation2 + $0x68] sm:$0xff]  ;;  %v375_v2 = vmax.f32 %v343_v12, 0.0 }
  0x2b   : > { %446 = vst.msk [vmem:[#allocation2 + $0x111] sm:$0xff] %vm378_vm0, %v367_v59  ;;  %595 = vrot.lane.b32.xlu1 %v3218_v57, %s2961_s29  ;;  %449 = vst.msk [vmem:[#allocation2 + $0x139] sm:$0xff] %vm378_vm0, %v370_v63  ;;  %v3253_v13 = vld [vmem:[#allocation2 + $0x78] sm:$0xff]  ;;  %v3259_v18 = vld [vmem:[#allocation2 + $0x90] sm:$0xff] }
  0x2c   : > { %601 = vrot.lane.b32.xlu0 %v3220_v58, %s2961_s29  ;;  %497 = vst.msk [vmem:[#allocation3 + $0x40] sm:$0xff] %vm378_vm0, %v3239_v8  ;;  %499 = vst.msk [vmem:[#allocation3 + $0x50] sm:$0xff] %vm378_vm0, %v3253_v13  ;;  %v3261_v21 = vld [vmem:[#allocation2 + $0x80] sm:$0xff]  ;;  %v3271_v22 = vld [vmem:[#allocation2 + $0xa8] sm:$0xff] }
  0x2d   : > { %448 = vst.msk [vmem:[#allocation2 + $0x129] sm:$0xff] %vm378_vm0, %v369_v1  ;;  %451 = vst.msk [vmem:[#allocation2 + $0x151] sm:$0xff] %vm378_vm0, %v372_v11  ;;  %v3273_v23 = vld [vmem:[#allocation2 + $0x98] sm:$0xff]  ;;  %v3286_v24 = vld [vmem:[#allocation2 + $0x69] sm:$0xff] }
  0x2e   : > { %498 = vst.msk [vmem:[#allocation3 + $0x48] sm:$0xff] %vm378_vm0, %v3257_v17  ;;  %501 = vst.msk [vmem:[#allocation3 + $0x60] sm:$0xff] %vm378_vm0, %v3259_v18  ;;  %v3289_v25 = vld [vmem:[#allocation2 + $0x91] sm:$0xff]  ;;  %v3291_v26 = vld [vmem:[#allocation2 + $0xc0] sm:$0xff] }
  0x2f   : > { %500 = vst.msk [vmem:[#allocation3 + $0x58] sm:$0xff] %vm378_vm0, %v3261_v21  ;;  %450 = vst.msk [vmem:[#allocation2 + $0x141] sm:$0xff] %vm378_vm0, %v371_v14  ;;  %599 = vrot.lane.b32.xlu1 %v3245_v9, %s2961_s29  ;;  %v3293_v27 = vld [vmem:[#allocation2 + $0xb0] sm:$0xff]  ;;  %v3299_v28 = vld [vmem:[#allocation2 + $0xd8] sm:$0xff] }
  0x30   : > { %453 = vst.msk [vmem:[#allocation2 + $0x169] sm:$0xff] %vm378_vm0, %v374_v15  ;;  %452 = vst.msk [vmem:[#allocation2 + $0x159] sm:$0xff] %vm378_vm0, %v373_v16  ;;  %605 = vrot.lane.b32.xlu0 %v3247_v10, %s2961_s29  ;;  %v3307_v29 = vld [vmem:[#allocation2 + $0xc8] sm:$0xff]  ;;  %v3313_v34 = vld [vmem:[#allocation2 + $0xf0] sm:$0xff] }
  0x31   : > { %503 = vst.msk [vmem:[#allocation3 + $0x70] sm:$0xff] %vm378_vm0, %v3271_v22  ;;  %502 = vst.msk [vmem:[#allocation3 + $0x68] sm:$0xff] %vm378_vm0, %v3273_v23  ;;  %v3309_v30 = vld [vmem:[#allocation2 + $0x81] sm:$0xff]  ;;  %v535_v33 = vld [vmem:[#allocation2 + $0xa9] sm:$0xff] }
  0x32   : > { %454 = vst.msk [vmem:[#allocation2 + $0x171] sm:$0xff] %vm378_vm0, %v375_v2  ;;  %505 = vst.msk [vmem:[#allocation3 + $0x80] sm:$0xff] %vm378_vm0, %v3291_v26  ;;  %v3320_v35 = vld [vmem:[#allocation2 + $0xe0] sm:$0xff]  ;;  %v3326_v39 = vld [vmem:[#allocation2 + $0x108] sm:$0xff] }
  0x33   : > { %504 = vst.msk [vmem:[#allocation3 + $0x78] sm:$0xff] %vm378_vm0, %v3293_v27  ;;  %603 = vrot.lane.b32.xlu1 %v3286_v24, %s2961_s29  ;;  %507 = vst.msk [vmem:[#allocation3 + $0x90] sm:$0xff] %vm378_vm0, %v3299_v28  ;;  %v3322_v36 = vld [vmem:[#allocation2 + $0x99] sm:$0xff]  ;;  %v537_v38 = vld [vmem:[#allocation2 + $0xc1] sm:$0xff] }
  0x34   : > { %609 = vrot.lane.b32.xlu0 %v3289_v25, %s2961_s29  ;;  %506 = vst.msk [vmem:[#allocation3 + $0x88] sm:$0xff] %vm378_vm0, %v3307_v29  ;;  %509 = vst.msk [vmem:[#allocation3 + $0xa0] sm:$0xff] %vm378_vm0, %v3313_v34  ;;  %v3333_v40 = vld [vmem:[#allocation2 + $0xf8] sm:$0xff]  ;;  %v3339_v43 = vld [vmem:[#allocation2 + $0x120] sm:$0xff] }
  0x35   : > { %508 = vst.msk [vmem:[#allocation3 + $0x98] sm:$0xff] %vm378_vm0, %v3320_v35  ;;  %511 = vst.msk [vmem:[#allocation3 + $0xb0] sm:$0xff] %vm378_vm0, %v3326_v39  ;;  %v3335_v41 = vld [vmem:[#allocation2 + $0xb1] sm:$0xff]  ;;  %v539_v42 = vld [vmem:[#allocation2 + $0xd9] sm:$0xff] }
  0x36   : > { %510 = vst.msk [vmem:[#allocation3 + $0xa8] sm:$0xff] %vm378_vm0, %v3333_v40  ;;  %513 = vst.msk [vmem:[#allocation3 + $0xc0] sm:$0xff] %vm378_vm0, %v3339_v43  ;;  %v3346_v45 = vld [vmem:[#allocation2 + $0x110] sm:$0xff]  ;;  %v483_v48 = vld [vmem:[#allocation2 + $0x138] sm:$0xff] }
  0x37   : > { %607 = vrot.lane.b32.xlu1 %v3309_v30, %s2961_s29  ;;  %v538_v46 = vld [vmem:[#allocation2 + $0xc9] sm:$0xff]  ;;  %v541_v47 = vld [vmem:[#allocation2 + $0xf1] sm:$0xff]  ;;  %512 = vst.msk [vmem:[#allocation3 + $0xb8] sm:$0xff] %vm378_vm0, %v3346_v45  ;;  %515 = vst.msk [vmem:[#allocation3 + $0xd0] sm:$0xff] %vm378_vm0, %v483_v48 }
  0x38   : > { %613 = vrot.lane.b32.xlu0 %v535_v33, %s2961_s29  ;;  %v3353_v49 = vld [vmem:[#allocation2 + $0x128] sm:$0xff]  ;;  %v485_v54 = vld [vmem:[#allocation2 + $0x150] sm:$0xff]  ;;  %v484_v59 = vld [vmem:[#allocation2 + $0x140] sm:$0xff] }
  0x39   : > { %v540_v52 = vld [vmem:[#allocation2 + $0xe1] sm:$0xff]  ;;  %v543_v53 = vld [vmem:[#allocation2 + $0x109] sm:$0xff]  ;;  %514 = vst.msk [vmem:[#allocation3 + $0xc8] sm:$0xff] %vm378_vm0, %v3353_v49  ;;  %517 = vst.msk [vmem:[#allocation3 + $0xe0] sm:$0xff] %vm378_vm0, %v485_v54 }
  0x3a   : > { %v542_v60 = vld [vmem:[#allocation2 + $0xf9] sm:$0xff]  ;;  %v545_v61 = vld [vmem:[#allocation2 + $0x121] sm:$0xff]  ;;  %516 = vst.msk [vmem:[#allocation3 + $0xd8] sm:$0xff] %vm378_vm0, %v484_v59  ;;  %v544_v0 = vld [vmem:[#allocation2 + $0x111] sm:$0xff] }
  0x3b   : > { %611 = vrot.lane.b32.xlu1 %v3322_v36, %s2961_s29  ;;  %v487_v62 = vld [vmem:[#allocation2 + $0x168] sm:$0xff]  ;;  %v486_v63 = vld [vmem:[#allocation2 + $0x158] sm:$0xff]  ;;  %v488_v4 = vld [vmem:[#allocation2 + $0x170] sm:$0xff] }
  0x3c   : > { %617 = vrot.lane.b32.xlu0 %v537_v38, %s2961_s29  ;;  %519 = vst.msk [vmem:[#allocation3 + $0xf0] sm:$0xff] %vm378_vm0, %v487_v62  ;;  %v547_v3 = vld [vmem:[#allocation2 + $0x139] sm:$0xff]  ;;  %518 = vst.msk [vmem:[#allocation3 + $0xe8] sm:$0xff] %vm378_vm0, %v486_v63  ;;  %v546_v5 = vld [vmem:[#allocation2 + $0x129] sm:$0xff] }
  0x3d   : > { %v549_v6 = vld [vmem:[#allocation2 + $0x151] sm:$0xff]  ;;  %520 = vst.msk [vmem:[#allocation3 + $0xf8] sm:$0xff] %vm378_vm0, %v488_v4  ;;  %v548_v7 = vld [vmem:[#allocation2 + $0x141] sm:$0xff]  ;;  %v551_v1 = vld [vmem:[#allocation2 + $0x169] sm:$0xff] }
  0x3e   : > { %v550_v11 = vld [vmem:[#allocation2 + $0x159] sm:$0xff]  ;;  %v714_v12 = vld [vmem:[#allocation2 + $0x2] sm:$0xff]  ;;  %v552_v14 = vld [vmem:[#allocation2 + $0x171] sm:$0xff] }
  0x3f   : > { %615 = vrot.lane.b32.xlu1 %v3335_v41, %s2961_s29  ;;  %v716_v15 = vld [vmem:[#allocation2 + $0x1a] sm:$0xff]  ;;  %v715_v16 = vld [vmem:[#allocation2 + $0xa] sm:$0xff]  ;;  %v1294_v2 = vld [vmem:[#allocation2 + $0x22] sm:$0xff] }
  0x40   : > { %621 = vrot.lane.b32.xlu0 %v539_v42, %s2961_s29  ;;  %v2101_v33 = vld [vmem:[%s4330_s3 + $0x18] sm:$0xff]  ;;  %v2102_v42 = vld [vmem:[%s4330_s3 + $0x20] sm:$0xff] }
  0x41   : > { %v2106_v54 = vld [vmem:[%s4330_s3 + $0x40] sm:$0xff] }
  0x43   : > { %619 = vrot.lane.b32.xlu1 %v538_v46, %s2961_s29  ;;  %v2103_v46 = vld [vmem:[%s4330_s3 + $0x28] sm:$0xff] }
  0x44   : > { %625 = vrot.lane.b32.xlu0 %v541_v47, %s2961_s29  ;;  %v2915_v47 = vpack.c.bf16 %v2103_v46, %v2102_v42 }
  0x47   : > { %623 = vrot.lane.b32.xlu1 %v540_v52, %s2961_s29  ;;  %v1873_v52 = vld [vmem:[#allocation2 + $0x32] sm:$0xff] }
  0x48   : > { %629 = vrot.lane.b32.xlu0 %v543_v53, %s2961_s29  ;;  %v1874_v53 = vld [vmem:[#allocation2 + $0x3a] sm:$0xff] }
  0x4b   : > { %627 = vrot.lane.b32.xlu1 %v542_v60, %s2961_s29 }
  0x4c   : > { %633 = vrot.lane.b32.xlu0 %v545_v61, %s2961_s29 }
  0x4f   : > { %631 = vrot.lane.b32.xlu1 %v544_v0, %s2961_s29 }
  0x50   : > { %637 = vrot.lane.b32.xlu0 %v547_v3, %s2961_s29 }
  0x53   : > { %635 = vrot.lane.b32.xlu1 %v546_v5, %s2961_s29 }
  0x54   : > { %641 = vrot.lane.b32.xlu0 %v549_v6, %s2961_s29 }
  0x57   : > { %639 = vrot.lane.b32.xlu1 %v548_v7, %s2961_s29 }
  0x58   : > { %645 = vrot.lane.b32.xlu0 %v551_v1, %s2961_s29 }
  0x5b   : > { %643 = vrot.lane.b32.xlu1 %v550_v11, %s2961_s29 }
  0x5c   : > { %778 = vrot.lane.b32.xlu0 %v714_v12, %s2962_s30 }
  0x5f   : > { %647 = vrot.lane.b32.xlu1 %v552_v14, %s2961_s29 }
  0x60   : > { %782 = vrot.lane.b32.xlu0 %v716_v15, %s2962_s30 }
  0x63   : > { %780 = vrot.lane.b32.xlu1 %v715_v16, %s2962_s30 }
  0x64   : > { %973 = vrot.lane.b32.xlu0 %v3183_v37, %s2963_s6  ;;  %v2098_v37 = vld [vmem:[%s4330_s3] sm:$0xff] }
  0x67   : > { %971 = vrot.lane.b32.xlu1 %v3188_v44, %s2963_s6  ;;  %v2099_v44 = vld [vmem:[%s4330_s3 + $0x8] sm:$0xff] }
  0x68   : > { %1166 = vrot.lane.b32.xlu0 %v3174_v31, %s2964_s7  ;;  %v2907_v31 = vpack.c.bf16 %v2099_v44, %v2098_v37 }
  0x6a   : > { %2908 = vmatprep.subr.bf16.mxu0 %v2907_v31  ;;  %2923 = vmatprep.subr.bf16.mxu1 %v2907_v31 }
  0x6b   : > { %1164 = vrot.lane.b32.xlu1 %v3153_v19, %s2964_s7  ;;  %v2100_v19 = vld [vmem:[%s4330_s3 + $0x10] sm:$0xff]  ;;  %2910 = vmatpush3.bf16.msra.mxu0 %v2907_v31 }
  0x6c   : > { %1359 = vrot.lane.b32.xlu0 %v1294_v2, %s2965_s8  ;;  %v2911_v38 = vpack.c.bf16 %v2101_v33, %v2100_v19  ;;  %2928 = vmatpush3.bf16.msra.mxu1 %v2907_v31 }
  0x6e   : > { %2912 = vmatprep.subr.bf16.mxu0 %v2911_v38  ;;  %2924 = vmatprep.subr.bf16.mxu1 %v2911_v38 }
  0x6f   : > { %1357 = vrot.lane.b32.xlu1 %v716_v15, %s2965_s8  ;;  %2914 = vmatpush3.bf16.msra.mxu0 %v2911_v38 }
  0x70   : > { %784 = vrot.lane.b32.xlu0 %v1294_v2, %s2962_s30  ;;  %2929 = vmatpush3.bf16.msra.mxu1 %v2911_v38 }
  0x71   : > { %2916 = vmatprep.subr.bf16.mxu0 %v2915_v47  ;;  %2925 = vmatprep.subr.bf16.mxu1 %v2915_v47 }
  0x73   : > { %1551 = vrot.lane.b32.xlu1 %v3194_v50, %s2966_s13  ;;  %2918 = vmatpush3.bf16.msra.mxu0 %v2915_v47 }
  0x74   : > { %1553 = vrot.lane.b32.xlu0 %v3196_v51, %s2966_s13  ;;  %2930 = vmatpush3.bf16.msra.mxu1 %v2915_v47 }
  0x77   : > { %975 = vrot.lane.b32.xlu1 %v3194_v50, %s2963_s6  ;;  %v2104_v50 = vld [vmem:[%s4330_s3 + $0x30] sm:$0xff] }
  0x78   : > { %977 = vrot.lane.b32.xlu0 %v3196_v51, %s2963_s6  ;;  %v2105_v51 = vld [vmem:[%s4330_s3 + $0x38] sm:$0xff] }
  0x79   : > { %v2919_v48 = vpack.c.bf16 %v2105_v51, %v2104_v50 }
  0x7b   : > { %1744 = vrot.lane.b32.xlu1 %v3155_v20, %s2967_s25  ;;  %2920 = vmatprep.subr.bf16.mxu0 %v2919_v48 }
  0x7c   : > { %1746 = vrot.lane.b32.xlu0 %v3218_v57, %s2967_s25  ;;  %2926 = vmatprep.subr.bf16.mxu1 %v2919_v48 }
  0x7d   : > { %2922 = vmatpush3.bf16.msra.mxu0 %v2919_v48  ;;  %2931 = vmatpush3.bf16.msra.mxu1 %v2919_v48 }
  0x7e   : > { %2857 = vmatprep.subr.mxu0 %v2106_v54  ;;  %2927 = vmatprep.subr.mxu1 %v2106_v54 }
  0x7f   : > { %1168 = vrot.lane.b32.xlu1 %v3155_v20, %s2964_s7 }
  0x80   : > { %1170 = vrot.lane.b32.xlu0 %v3218_v57, %s2964_s7  ;;  %v586_v20 = vpop.permute.xlu0 %585 }
  0x81   : > { %2858 = vmatpush3.msra.mxu0 %v2106_v54  ;;  %2932 = vmatpush3.msra.mxu1 %v2106_v54  ;;  %682 = vst.msk [vmem:[#allocation3] sm:$0xff] %vm681_vm3, %v586_v20 }
  0x83   : > { %1937 = vrot.lane.b32.xlu1 %v1873_v52, %s2968_s12 }
  0x84   : > { %1939 = vrot.lane.b32.xlu0 %v1874_v53, %s2968_s12 }
  0x87   : > { %1361 = vrot.lane.b32.xlu1 %v1873_v52, %s2965_s8 }
  0x88   : > { %1363 = vrot.lane.b32.xlu0 %v1874_v53, %s2965_s8 }
  0x8b   : > { %786 = vrot.lane.b32.xlu1 %v1873_v52, %s2962_s30 }
  0x8c   : > { %788 = vrot.lane.b32.xlu0 %v1874_v53, %s2962_s30 }
  0x8f   : > { %1555 = vrot.lane.b32.xlu1 %v3210_v55, %s2966_s13 }
  0x90   : > { %1557 = vrot.lane.b32.xlu0 %v3212_v56, %s2966_s13 }
  0x92   : > { %v588_v57 = vpop.permute.xlu0 %587 }
  0x93   : > { %683 = vst.msk [vmem:[#allocation3 + $0x8] sm:$0xff] %vm681_vm3, %v588_v57  ;;  %979 = vrot.lane.b32.xlu1 %v3210_v55, %s2963_s6  ;;  %v1875_v55 = vld [vmem:[#allocation2 + $0x4a] sm:$0xff] }
  0x94   : > { %981 = vrot.lane.b32.xlu0 %v3212_v56, %s2963_s6  ;;  %v1876_v56 = vld [vmem:[#allocation2 + $0x52] sm:$0xff] }
  0x95   : > { %v590_v59 = vpop.permute.xlu1 %589 }
  0x96   : > { %v594_v60 = vpop.permute.xlu0 %593  ;;  %684 = vst.msk [vmem:[#allocation3 + $0x10] sm:$0xff] %vm681_vm3, %v590_v59 }
  0x97   : > { %686 = vst.msk [vmem:[#allocation3 + $0x20] sm:$0xff] %vm681_vm3, %v594_v60  ;;  %1748 = vrot.lane.b32.xlu1 %v3176_v32, %s2967_s25 }
  0x98   : > { %1750 = vrot.lane.b32.xlu0 %v3245_v9, %s2967_s25 }
  0x99   : > { %v592_v61 = vpop.permute.xlu1 %591 }
  0x9a   : > { %v598_v62 = vpop.permute.xlu0 %597  ;;  %685 = vst.msk [vmem:[#allocation3 + $0x18] sm:$0xff] %vm681_vm3, %v592_v61 }
  0x9b   : > { %688 = vst.msk [vmem:[#allocation3 + $0x30] sm:$0xff] %vm681_vm3, %v598_v62  ;;  %1172 = vrot.lane.b32.xlu1 %v3176_v32, %s2964_s7 }
  0x9c   : > { %1174 = vrot.lane.b32.xlu0 %v3245_v9, %s2964_s7 }
  0x9d   : > { %v596_v63 = vpop.permute.xlu1 %595 }
  0x9e   : > { %v602_v0 = vpop.permute.xlu0 %601  ;;  %687 = vst.msk [vmem:[#allocation3 + $0x28] sm:$0xff] %vm681_vm3, %v596_v63 }
  0x9f   : > { %690 = vst.msk [vmem:[#allocation3 + $0x40] sm:$0xff] %vm681_vm3, %v602_v0  ;;  %1941 = vrot.lane.b32.xlu1 %v1875_v55, %s2968_s12 }
  0xa0   : > { %1943 = vrot.lane.b32.xlu0 %v1876_v56, %s2968_s12 }
  0xa1   : > { %v600_v3 = vpop.permute.xlu1 %599 }
  0xa2   : > { %v606_v4 = vpop.permute.xlu0 %605  ;;  %689 = vst.msk [vmem:[#allocation3 + $0x38] sm:$0xff] %vm681_vm3, %v600_v3 }
  0xa3   : > { %692 = vst.msk [vmem:[#allocation3 + $0x50] sm:$0xff] %vm681_vm3, %v606_v4  ;;  %1365 = vrot.lane.b32.xlu1 %v1875_v55, %s2965_s8 }
  0xa4   : > { %1367 = vrot.lane.b32.xlu0 %v1876_v56, %s2965_s8 }
  0xa5   : > { %v604_v32 = vpop.permute.xlu1 %603 }
  0xa6   : > { %v610_v9 = vpop.permute.xlu0 %609  ;;  %691 = vst.msk [vmem:[#allocation3 + $0x48] sm:$0xff] %vm681_vm3, %v604_v32 }
  0xa7   : > { %694 = vst.msk [vmem:[#allocation3 + $0x60] sm:$0xff] %vm681_vm3, %v610_v9  ;;  %790 = vrot.lane.b32.xlu1 %v1875_v55, %s2962_s30 }
  0xa8   : > { %792 = vrot.lane.b32.xlu0 %v1876_v56, %s2962_s30 }
  0xa9   : > { %v608_v5 = vpop.permute.xlu1 %607 }
  0xaa   : > { %v614_v6 = vpop.permute.xlu0 %613  ;;  %693 = vst.msk [vmem:[#allocation3 + $0x58] sm:$0xff] %vm681_vm3, %v608_v5 }
  0xab   : > { %696 = vst.msk [vmem:[#allocation3 + $0x70] sm:$0xff] %vm681_vm3, %v614_v6  ;;  %1559 = vrot.lane.b32.xlu1 %v3239_v8, %s2966_s13 }
  0xac   : > { %1561 = vrot.lane.b32.xlu0 %v3257_v17, %s2966_s13 }
  0xad   : > { %v612_v7 = vpop.permute.xlu1 %611 }
  0xae   : > { %v618_v1 = vpop.permute.xlu0 %617  ;;  %695 = vst.msk [vmem:[#allocation3 + $0x68] sm:$0xff] %vm681_vm3, %v612_v7 }
  0xaf   : > { %698 = vst.msk [vmem:[#allocation3 + $0x80] sm:$0xff] %vm681_vm3, %v618_v1  ;;  %983 = vrot.lane.b32.xlu1 %v3239_v8, %s2963_s6  ;;  %v1877_v8 = vld [vmem:[#allocation2 + $0x62] sm:$0xff] }
  0xb0   : > { %985 = vrot.lane.b32.xlu0 %v3257_v17, %s2963_s6  ;;  %v1878_v17 = vld [vmem:[#allocation2 + $0x6a] sm:$0xff] }
  0xb1   : > { %v616_v11 = vpop.permute.xlu1 %615  ;;  %v1690_v1 = vld [vmem:[#allocation2 + $0xa9] sm:$0xff] }
  0xb2   : > { %v622_v12 = vpop.permute.xlu0 %621  ;;  %697 = vst.msk [vmem:[#allocation3 + $0x78] sm:$0xff] %vm681_vm3, %v616_v11 }
  0xb3   : > { %700 = vst.msk [vmem:[#allocation3 + $0x90] sm:$0xff] %vm681_vm3, %v622_v12  ;;  %1752 = vrot.lane.b32.xlu1 %v3220_v58, %s2967_s25 }
  0xb4   : > { %1754 = vrot.lane.b32.xlu0 %v3286_v24, %s2967_s25 }
  0xb5   : > { %v620_v14 = vpop.permute.xlu1 %619 }
  0xb6   : > { %v626_v15 = vpop.permute.xlu0 %625  ;;  %699 = vst.msk [vmem:[#allocation3 + $0x88] sm:$0xff] %vm681_vm3, %v620_v14 }
  0xb7   : > { %702 = vst.msk [vmem:[#allocation3 + $0xa0] sm:$0xff] %vm681_vm3, %v626_v15  ;;  %1176 = vrot.lane.b32.xlu1 %v3220_v58, %s2964_s7 }
  0xb8   : > { %1178 = vrot.lane.b32.xlu0 %v3286_v24, %s2964_s7 }
  0xb9   : > { %v624_v16 = vpop.permute.xlu1 %623 }
  0xba   : > { %v630_v2 = vpop.permute.xlu0 %629  ;;  %701 = vst.msk [vmem:[#allocation3 + $0x98] sm:$0xff] %vm681_vm3, %v624_v16 }
  0xbb   : > { %704 = vst.msk [vmem:[#allocation3 + $0xb0] sm:$0xff] %vm681_vm3, %v630_v2  ;;  %1945 = vrot.lane.b32.xlu1 %v1877_v8, %s2968_s12 }
  0xbc   : > { %1947 = vrot.lane.b32.xlu0 %v1878_v17, %s2968_s12 }
  0xbd   : > { %v628_v37 = vpop.permute.xlu1 %627 }
  0xbe   : > { %v634_v44 = vpop.permute.xlu0 %633  ;;  %703 = vst.msk [vmem:[#allocation3 + $0xa8] sm:$0xff] %vm681_vm3, %v628_v37 }
  0xbf   : > { %706 = vst.msk [vmem:[#allocation3 + $0xc0] sm:$0xff] %vm681_vm3, %v634_v44  ;;  %1369 = vrot.lane.b32.xlu1 %v1877_v8, %s2965_s8 }
  0xc0   : > { %1371 = vrot.lane.b32.xlu0 %v1878_v17, %s2965_s8 }
  0xc1   : > { %v632_v58 = vpop.permute.xlu1 %631 }
  0xc2   : > { %v638_v24 = vpop.permute.xlu0 %637  ;;  %705 = vst.msk [vmem:[#allocation3 + $0xb8] sm:$0xff] %vm681_vm3, %v632_v58 }
  0xc3   : > { %708 = vst.msk [vmem:[#allocation3 + $0xd0] sm:$0xff] %vm681_vm3, %v638_v24  ;;  %794 = vrot.lane.b32.xlu1 %v1877_v8, %s2962_s30 }
  0xc4   : > { %796 = vrot.lane.b32.xlu0 %v1878_v17, %s2962_s30 }
  0xc5   : > { %v636_v31 = vpop.permute.xlu1 %635 }
  0xc6   : > { %v642_v19 = vpop.permute.xlu0 %641  ;;  %707 = vst.msk [vmem:[#allocation3 + $0xc8] sm:$0xff] %vm681_vm3, %v636_v31 }
  0xc7   : > { %710 = vst.msk [vmem:[#allocation3 + $0xe0] sm:$0xff] %vm681_vm3, %v642_v19  ;;  %1563 = vrot.lane.b32.xlu1 %v3253_v13, %s2966_s13 }
  0xc8   : > { %1565 = vrot.lane.b32.xlu0 %v3261_v21, %s2966_s13 }
  0xc9   : > { %v640_v33 = vpop.permute.xlu1 %639 }
  0xca   : > { %v646_v38 = vpop.permute.xlu0 %645  ;;  %709 = vst.msk [vmem:[#allocation3 + $0xd8] sm:$0xff] %vm681_vm3, %v640_v33 }
  0xcb   : > { %712 = vst.msk [vmem:[#allocation3 + $0xf0] sm:$0xff] %vm681_vm3, %v646_v38  ;;  %987 = vrot.lane.b32.xlu1 %v3253_v13, %s2963_s6  ;;  %v1879_v13 = vld [vmem:[#allocation2 + $0x7a] sm:$0xff] }
  0xcc   : > { %989 = vrot.lane.b32.xlu0 %v3261_v21, %s2963_s6  ;;  %v1880_v21 = vld [vmem:[#allocation2 + $0x82] sm:$0xff] }
  0xcd   : > { %v644_v42 = vpop.permute.xlu1 %643  ;;  %v1692_v38 = vld [vmem:[#allocation2 + $0xc1] sm:$0xff] }
  0xce   : > { %v779_v46 = vpop.permute.xlu0 %778  ;;  %711 = vst.msk [vmem:[#allocation3 + $0xe8] sm:$0xff] %vm681_vm3, %v644_v42 }
  0xcf   : > { %875 = vst.msk [vmem:[#allocation3] sm:$0xff] %vm874_vm4, %v779_v46  ;;  %1756 = vrot.lane.b32.xlu1 %v3247_v10, %s2967_s25 }
  0xd0   : > { %1758 = vrot.lane.b32.xlu0 %v3309_v30, %s2967_s25 }
  0xd1   : > { %v648_v47 = vpop.permute.xlu1 %647 }
  0xd2   : > { %v783_v50 = vpop.permute.xlu0 %782  ;;  %713 = vst.msk [vmem:[#allocation3 + $0xf8] sm:$0xff] %vm681_vm3, %v648_v47  ;;  %v1693_v47 = vld [vmem:[#allocation2 + $0xc9] sm:$0xff] }
  0xd3   : > { %877 = vst.msk [vmem:[#allocation3 + $0x10] sm:$0xff] %vm874_vm4, %v783_v50  ;;  %1180 = vrot.lane.b32.xlu1 %v3247_v10, %s2964_s7 }
  0xd4   : > { %1182 = vrot.lane.b32.xlu0 %v3309_v30, %s2964_s7 }
  0xd5   : > { %v781_v51 = vpop.permute.xlu1 %780 }
  0xd6   : > { %v974_v48 = vpop.permute.xlu0 %973  ;;  %876 = vst.msk [vmem:[#allocation3 + $0x8] sm:$0xff] %vm874_vm4, %v781_v51  ;;  %v1886_v51 = vld [vmem:[#allocation2 + $0xca] sm:$0xff] }
  0xd7   : > { %1069 = vst.msk [vmem:[#allocation3 + $0x8] sm:$0xff] %vm1067_vm5, %v974_v48  ;;  %1949 = vrot.lane.b32.xlu1 %v1879_v13, %s2968_s12 }
  0xd8   : > { %1951 = vrot.lane.b32.xlu0 %v1880_v21, %s2968_s12 }
  0xd9   : > { %v972_v52 = vpop.permute.xlu1 %971 }
  0xda   : > { %v1167_v53 = vpop.permute.xlu0 %1166  ;;  %1068 = vst.msk [vmem:[#allocation3] sm:$0xff] %vm1067_vm5, %v972_v52 }
  0xdb   : > { %1262 = vst.msk [vmem:[#allocation3 + $0x8] sm:$0xff] %vm1260_vm6, %v1167_v53  ;;  %1373 = vrot.lane.b32.xlu1 %v1879_v13, %s2965_s8 }
  0xdc   : > { %1375 = vrot.lane.b32.xlu0 %v1880_v21, %s2965_s8 }
  0xdd   : > { %v1165_v10 = vpop.permute.xlu1 %1164 }
  0xde   : > { %v1360_v30 = vpop.permute.xlu0 %1359  ;;  %1261 = vst.msk [vmem:[#allocation3] sm:$0xff] %vm1260_vm6, %v1165_v10 }
  0xdf   : > { %1455 = vst.msk [vmem:[#allocation3 + $0x8] sm:$0xff] %vm1453_vm7, %v1360_v30  ;;  %798 = vrot.lane.b32.xlu1 %v1879_v13, %s2962_s30 }
  0xe0   : > { %800 = vrot.lane.b32.xlu0 %v1880_v21, %s2962_s30 }
  0xe1   : > { %v1358_v54 = vpop.permute.xlu1 %1357 }
  0xe2   : > { %v785_v20 = vpop.permute.xlu0 %784  ;;  %1454 = vst.msk [vmem:[#allocation3] sm:$0xff] %vm1453_vm7, %v1358_v54 }
  0xe3   : > { %878 = vst.msk [vmem:[#allocation3 + $0x18] sm:$0xff] %vm874_vm4, %v785_v20  ;;  %1567 = vrot.lane.b32.xlu1 %v3259_v18, %s2966_s13 }
  0xe4   : > { %1569 = vrot.lane.b32.xlu0 %v3273_v23, %s2966_s13 }
  0xe5   : > { %v1552_v57 = vpop.permute.xlu1 %1551 }
  0xe6   : > { %v1554_v59 = vpop.permute.xlu0 %1553  ;;  %1648 = vst.msk [vmem:[#allocation3] sm:$0xff] %vm1647_vm8, %v1552_v57 }
  0xe7   : > { %1649 = vst.msk [vmem:[#allocation3 + $0x8] sm:$0xff] %vm1647_vm8, %v1554_v59  ;;  %991 = vrot.lane.b32.xlu1 %v3259_v18, %s2963_s6  ;;  %v1881_v18 = vld [vmem:[#allocation2 + $0x92] sm:$0xff] }
  0xe8   : > { %993 = vrot.lane.b32.xlu0 %v3273_v23, %s2963_s6  ;;  %v1882_v23 = vld [vmem:[#allocation2 + $0x9a] sm:$0xff] }
  0xe9   : > { %v976_v60 = vpop.permute.xlu1 %975 }
  0xea   : > { %v978_v61 = vpop.permute.xlu0 %977  ;;  %1070 = vst.msk [vmem:[#allocation3 + $0x10] sm:$0xff] %vm1067_vm5, %v976_v60 }
  0xeb   : > { %1071 = vst.msk [vmem:[#allocation3 + $0x18] sm:$0xff] %vm1067_vm5, %v978_v61  ;;  %1760 = vrot.lane.b32.xlu1 %v3289_v25, %s2967_s25  ;;  %v1694_v61 = vld [vmem:[#allocation2 + $0xd9] sm:$0xff] }
  0xec   : > { %1762 = vrot.lane.b32.xlu0 %v3322_v36, %s2967_s25 }
  0xed   : > { %v1745_v62 = vpop.permute.xlu1 %1744 }
  0xee   : > { %v1747_v55 = vpop.permute.xlu0 %1746  ;;  %1841 = vst.msk [vmem:[#allocation3] sm:$0xff] %vm1840_vm9, %v1745_v62 }
  0xef   : > { %1842 = vst.msk [vmem:[#allocation3 + $0x8] sm:$0xff] %vm1840_vm9, %v1747_v55  ;;  %1184 = vrot.lane.b32.xlu1 %v3289_v25, %s2964_s7 }
  0xf0   : > { %1186 = vrot.lane.b32.xlu0 %v3322_v36, %s2964_s7 }
  0xf1   : > { %v1169_v56 = vpop.permute.xlu1 %1168 }
  0xf2   : > { %v1171_v63 = vpop.permute.xlu0 %1170  ;;  %1263 = vst.msk [vmem:[#allocation3 + $0x10] sm:$0xff] %vm1260_vm6, %v1169_v56 }
  0xf3   : > { %1264 = vst.msk [vmem:[#allocation3 + $0x18] sm:$0xff] %vm1260_vm6, %v1171_v63  ;;  %1953 = vrot.lane.b32.xlu1 %v1881_v18, %s2968_s12 }
  0xf4   : > { %1955 = vrot.lane.b32.xlu0 %v1882_v23, %s2968_s12 }
  0xf5   : > { %v1938_v0 = vpop.permute.xlu1 %1937 }
  0xf6   : > { %v1940_v3 = vpop.permute.xlu0 %1939  ;;  %2034 = vst.msk [vmem:[#allocation3] sm:$0xff] %vm2033_vm10, %v1938_v0  ;;  %v1888_v0 = vld [vmem:[#allocation2 + $0xe2] sm:$0xff] }
  0xf7   : > { %2035 = vst.msk [vmem:[#allocation3 + $0x8] sm:$0xff] %vm2033_vm10, %v1940_v3  ;;  %1377 = vrot.lane.b32.xlu1 %v1881_v18, %s2965_s8 }
  0xf8   : > { %1379 = vrot.lane.b32.xlu0 %v1882_v23, %s2965_s8 }
  0xf9   : > { %v1362_v25 = vpop.permute.xlu1 %1361 }
  0xfa   : > { %v1364_v36 = vpop.permute.xlu0 %1363  ;;  %1456 = vst.msk [vmem:[#allocation3 + $0x10] sm:$0xff] %vm1453_vm7, %v1362_v25 }
  0xfb   : > { %1457 = vst.msk [vmem:[#allocation3 + $0x18] sm:$0xff] %vm1453_vm7, %v1364_v36  ;;  %802 = vrot.lane.b32.xlu1 %v1881_v18, %s2962_s30  ;;  %v1695_v18 = vld [vmem:[#allocation2 + $0xe1] sm:$0xff] }
  0xfc   : > { %804 = vrot.lane.b32.xlu0 %v1882_v23, %s2962_s30 }
  0xfd   : > { %v787_v4 = vpop.permute.xlu1 %786  ;;  %v2066_v9 = vld [vmem:[#allocation3] sm:$0xff] }
  0xfe   : > { %v789_v32 = vpop.permute.xlu0 %788  ;;  %v2067_v5 = vld [vmem:[#allocation3 + $0x8] sm:$0xff]  ;;  %879 = vst.msk [vmem:[#allocation3 + $0x20] sm:$0xff] %vm874_vm4, %v787_v4  ;;  %2859 = vmatprep.mubr.msk.f32.mxu0 %vm2107_vm11, %v2066_v9 }
  0xff   : > { %880 = vst.msk [vmem:[#allocation3 + $0x28] sm:$0xff] %vm874_vm4, %v789_v32  ;;  %1571 = vrot.lane.b32.xlu1 %v3271_v22, %s2966_s13  ;;  %2860 = vmatmul.mubr.msk.f32.vlgmr.msra.gmra.mrb[0].mxu0 %vm2107_vm11, %v2067_v5 }
 0x100   : > { %1573 = vrot.lane.b32.xlu0 %v3293_v27, %s2966_s13 }
 0x101   : > { %v1556_v6 = vpop.permute.xlu1 %1555 }
 0x102   : > { %v1558_v7 = vpop.permute.xlu0 %1557  ;;  %1650 = vst.msk [vmem:[#allocation3 + $0x10] sm:$0xff] %vm1647_vm8, %v1556_v6 }
 0x103   : > { %1651 = vst.msk [vmem:[#allocation3 + $0x18] sm:$0xff] %vm1647_vm8, %v1558_v7  ;;  %995 = vrot.lane.b32.xlu1 %v3271_v22, %s2963_s6  ;;  %v1883_v22 = vld [vmem:[#allocation2 + $0xaa] sm:$0xff] }
 0x104   : > { %997 = vrot.lane.b32.xlu0 %v3293_v27, %s2963_s6  ;;  %v1884_v27 = vld [vmem:[#allocation2 + $0xb2] sm:$0xff] }
 0x105   : > { %v980_v11 = vpop.permute.xlu1 %979 }
 0x106   : > { %v982_v12 = vpop.permute.xlu0 %981  ;;  %1072 = vst.msk [vmem:[#allocation3 + $0x20] sm:$0xff] %vm1067_vm5, %v980_v11  ;;  %v1696_v11 = vld [vmem:[#allocation2 + $0xf1] sm:$0xff] }
 0x107   : > { %1073 = vst.msk [vmem:[#allocation3 + $0x28] sm:$0xff] %vm1067_vm5, %v982_v12  ;;  %1764 = vrot.lane.b32.xlu1 %v1690_v1, %s2967_s25 }
 0x108   : > { %1766 = vrot.lane.b32.xlu0 %v3335_v41, %s2967_s25 }
 0x109   : > { %v1749_v14 = vpop.permute.xlu1 %1748 }
 0x10a   : > { %v1751_v15 = vpop.permute.xlu0 %1750  ;;  %1843 = vst.msk [vmem:[#allocation3 + $0x10] sm:$0xff] %vm1840_vm9, %v1749_v14 }
 0x10b   : > { %1844 = vst.msk [vmem:[#allocation3 + $0x18] sm:$0xff] %vm1840_vm9, %v1751_v15  ;;  %1188 = vrot.lane.b32.xlu1 %v1690_v1, %s2964_s7  ;;  %v1697_v15 = vld [vmem:[#allocation2 + $0xf9] sm:$0xff] }
 0x10c   : > { %1190 = vrot.lane.b32.xlu0 %v3335_v41, %s2964_s7 }
 0x10d   : > { %v1173_v8 = vpop.permute.xlu1 %1172 }
 0x10e   : > { %v1175_v17 = vpop.permute.xlu0 %1174  ;;  %1265 = vst.msk [vmem:[#allocation3 + $0x20] sm:$0xff] %vm1260_vm6, %v1173_v8 }
 0x10f   : > { %1266 = vst.msk [vmem:[#allocation3 + $0x28] sm:$0xff] %vm1260_vm6, %v1175_v17  ;;  %1957 = vrot.lane.b32.xlu1 %v1883_v22, %s2968_s12  ;;  %v1890_v17 = vld [vmem:[#allocation2 + $0xfa] sm:$0xff] }
 0x110   : > { %1959 = vrot.lane.b32.xlu0 %v1884_v27, %s2968_s12 }
 0x111   : > { %v1942_v16 = vpop.permute.xlu1 %1941 }
 0x112   : > { %v1944_v2 = vpop.permute.xlu0 %1943  ;;  %2036 = vst.msk [vmem:[#allocation3 + $0x10] sm:$0xff] %vm2033_vm10, %v1942_v16 }
 0x113   : > { %2037 = vst.msk [vmem:[#allocation3 + $0x18] sm:$0xff] %vm2033_vm10, %v1944_v2  ;;  %1381 = vrot.lane.b32.xlu1 %v1883_v22, %s2965_s8 }
 0x114   : > { %1383 = vrot.lane.b32.xlu0 %v1884_v27, %s2965_s8 }
 0x115   : > { %v1366_v41 = vpop.permute.xlu1 %1365 }
 0x116   : > { %v1368_v37 = vpop.permute.xlu0 %1367  ;;  %1458 = vst.msk [vmem:[#allocation3 + $0x20] sm:$0xff] %vm1453_vm7, %v1366_v41 }
 0x117   : > { %1459 = vst.msk [vmem:[#allocation3 + $0x28] sm:$0xff] %vm1453_vm7, %v1368_v37  ;;  %806 = vrot.lane.b32.xlu1 %v1883_v22, %s2962_s30 }
 0x118   : > { %808 = vrot.lane.b32.xlu0 %v1884_v27, %s2962_s30 }
 0x119   : > { %v791_v44 = vpop.permute.xlu1 %790  ;;  %v2068_v24 = vld [vmem:[#allocation3 + $0x10] sm:$0xff] }
 0x11a   : > { %v793_v58 = vpop.permute.xlu0 %792  ;;  %v2069_v31 = vld [vmem:[#allocation3 + $0x18] sm:$0xff]  ;;  %881 = vst.msk [vmem:[#allocation3 + $0x30] sm:$0xff] %vm874_vm4, %v791_v44  ;;  %2862 = vmatprep.mubr.msk.f32.mxu0 %vm2107_vm11, %v2068_v24  ;;  %v266_v44 = vld [vmem:[%s3072_s26 + $0xf0] sm:$0xff] }
 0x11b   : > { %882 = vst.msk [vmem:[#allocation3 + $0x38] sm:$0xff] %vm874_vm4, %v793_v58  ;;  %1575 = vrot.lane.b32.xlu1 %v3291_v26, %s2966_s13  ;;  %2863 = vmatmul.mubr.msk.f32.gmra.mrb[2].mxu0 %vm2107_vm11, %v2069_v31 }
 0x11c   : > { %1577 = vrot.lane.b32.xlu0 %v3307_v29, %s2966_s13 }
 0x11d   : > { %v1560_v19 = vpop.permute.xlu1 %1559 }
 0x11e   : > { %v1562_v33 = vpop.permute.xlu0 %1561  ;;  %1652 = vst.msk [vmem:[#allocation3 + $0x20] sm:$0xff] %vm1647_vm8, %v1560_v19 }
 0x11f   : > { %1653 = vst.msk [vmem:[#allocation3 + $0x28] sm:$0xff] %vm1647_vm8, %v1562_v33  ;;  %999 = vrot.lane.b32.xlu1 %v3291_v26, %s2963_s6  ;;  %v1885_v26 = vld [vmem:[#allocation2 + $0xc2] sm:$0xff]  ;;  %v2950_v33 = vld [vmem:[%s4328_s1] ss:$0 sm:$0xff] }
 0x120   : > { %1001 = vrot.lane.b32.xlu0 %v3307_v29, %s2963_s6 }
 0x121   : > { %v984_v42 = vpop.permute.xlu1 %983 }
 0x122   : > { %v986_v46 = vpop.permute.xlu0 %985  ;;  %1074 = vst.msk [vmem:[#allocation3 + $0x30] sm:$0xff] %vm1067_vm5, %v984_v42  ;;  %v267_v42 = vld [vmem:[%s3072_s26 + $0xf8] sm:$0xff] }
 0x123   : > { %1075 = vst.msk [vmem:[#allocation3 + $0x38] sm:$0xff] %vm1067_vm5, %v986_v46  ;;  %1768 = vrot.lane.b32.xlu1 %v1692_v38, %s2967_s25  ;;  %v306_v46 = vmul.f32 %v2950_v33, %v267_v42 }
 0x124   : > { %1770 = vrot.lane.b32.xlu0 %v1693_v47, %s2967_s25 }
 0x125   : > { %v1753_v50 = vpop.permute.xlu1 %1752 }
 0x126   : > { %v1755_v13 = vpop.permute.xlu0 %1754  ;;  %1845 = vst.msk [vmem:[#allocation3 + $0x20] sm:$0xff] %vm1840_vm9, %v1753_v50 }
 0x127   : > { %1846 = vst.msk [vmem:[#allocation3 + $0x28] sm:$0xff] %vm1840_vm9, %v1755_v13  ;;  %1192 = vrot.lane.b32.xlu1 %v1692_v38, %s2964_s7  ;;  %v305_v38 = vmul.f32 %v2950_v33, %v266_v44  ;;  %v1895_v44 = vld [vmem:[#allocation2 + $0x13a] sm:$0xff] }
 0x128   : > { %1194 = vrot.lane.b32.xlu0 %v1693_v47, %s2964_s7  ;;  %v2951_v47 = vld [vmem:[%s4329_s2] ss:$0 sm:$0xff] }
 0x129   : > { %v1177_v29 = vpop.permute.xlu1 %1176  ;;  %v344_v50 = vadd.f32 %v2951_v47, %v305_v38  ;;  %v345_v13 = vadd.f32 %v2951_v47, %v306_v46  ;;  %v1511_v46 = vld [vmem:[#allocation2 + $0x150] sm:$0xff] }
 0x12a   : > { %v1179_v21 = vpop.permute.xlu0 %1178  ;;  %1267 = vst.msk [vmem:[#allocation3 + $0x30] sm:$0xff] %vm1260_vm6, %v1177_v29 }
 0x12b   : > { %1268 = vst.msk [vmem:[#allocation3 + $0x38] sm:$0xff] %vm1260_vm6, %v1179_v21  ;;  %1961 = vrot.lane.b32.xlu1 %v1885_v26, %s2968_s12  ;;  %v376_v21 = vmax.f32 %v344_v50, 0.0 }
 0x12c   : > { %1963 = vrot.lane.b32.xlu0 %v1886_v51, %s2968_s12 }
 0x12d   : > { %v1946_v48 = vpop.permute.xlu1 %1945  ;;  %455 = vst.msk [vmem:[#allocation2 + $0x181] sm:$0xff] %vm378_vm0, %v376_v21 }
 0x12e   : > { %v1948_v52 = vpop.permute.xlu0 %1947  ;;  %2038 = vst.msk [vmem:[#allocation3 + $0x20] sm:$0xff] %vm2033_vm10, %v1946_v48  ;;  %v1698_v48 = vld [vmem:[#allocation2 + $0x109] sm:$0xff] }
 0x12f   : > { %2039 = vst.msk [vmem:[#allocation3 + $0x28] sm:$0xff] %vm2033_vm10, %v1948_v52  ;;  %1385 = vrot.lane.b32.xlu1 %v1885_v26, %s2965_s8 }
 0x130   : > { %1387 = vrot.lane.b32.xlu0 %v1886_v51, %s2965_s8 }
 0x131   : > { %v1370_v53 = vpop.permute.xlu1 %1369 }
 0x132   : > { %v1372_v10 = vpop.permute.xlu0 %1371  ;;  %1460 = vst.msk [vmem:[#allocation3 + $0x30] sm:$0xff] %vm1453_vm7, %v1370_v53 }
 0x133   : > { %1461 = vst.msk [vmem:[#allocation3 + $0x38] sm:$0xff] %vm1453_vm7, %v1372_v10  ;;  %810 = vrot.lane.b32.xlu1 %v1885_v26, %s2962_s30  ;;  %v1699_v10 = vld [vmem:[#allocation2 + $0x111] sm:$0xff] }
 0x134   : > { %812 = vrot.lane.b32.xlu0 %v1886_v51, %s2962_s30  ;;  %v377_v51 = vmax.f32 %v345_v13, 0.0  ;;  %v1512_v13 = vld [vmem:[#allocation2 + $0x158] sm:$0xff] }
 0x135   : > { %v795_v30 = vpop.permute.xlu1 %794  ;;  %v2070_v20 = vld [vmem:[#allocation3 + $0x20] sm:$0xff] }
 0x136   : > { %v797_v54 = vpop.permute.xlu0 %796  ;;  %v2071_v57 = vld [vmem:[#allocation3 + $0x28] sm:$0xff]  ;;  %883 = vst.msk [vmem:[#allocation3 + $0x40] sm:$0xff] %vm874_vm4, %v795_v30  ;;  %2865 = vmatprep.mubr.msk.f32.mxu0 %vm2107_vm11, %v2070_v20 }
 0x137   : > { %884 = vst.msk [vmem:[#allocation3 + $0x48] sm:$0xff] %vm874_vm4, %v797_v54  ;;  %1579 = vrot.lane.b32.xlu1 %v3299_v28, %s2966_s13  ;;  %2866 = vmatmul.mubr.msk.f32.gmra.mrb[4].mxu0 %vm2107_vm11, %v2071_v57  ;;  %v1892_v57 = vld [vmem:[#allocation2 + $0x112] sm:$0xff] }
 0x138   : > { %1581 = vrot.lane.b32.xlu0 %v3320_v35, %s2966_s13  ;;  %456 = vst.msk [vmem:[#allocation2 + $0x189] sm:$0xff] %vm378_vm0, %v377_v51 }
 0x139   : > { %v1564_v59 = vpop.permute.xlu1 %1563 }
 0x13a   : > { %v1566_v60 = vpop.permute.xlu0 %1565  ;;  %1654 = vst.msk [vmem:[#allocation3 + $0x30] sm:$0xff] %vm1647_vm8, %v1564_v59 }
 0x13b   : > { %1655 = vst.msk [vmem:[#allocation3 + $0x38] sm:$0xff] %vm1647_vm8, %v1566_v60  ;;  %1003 = vrot.lane.b32.xlu1 %v3299_v28, %s2963_s6  ;;  %v1887_v28 = vld [vmem:[#allocation2 + $0xda] sm:$0xff] }
 0x13c   : > { %1005 = vrot.lane.b32.xlu0 %v3320_v35, %s2963_s6 }
 0x13d   : > { %v988_v62 = vpop.permute.xlu1 %987 }
 0x13e   : > { %v990_v55 = vpop.permute.xlu0 %989  ;;  %1076 = vst.msk [vmem:[#allocation3 + $0x40] sm:$0xff] %vm1067_vm5, %v988_v62 }
 0x13f   : > { %1077 = vst.msk [vmem:[#allocation3 + $0x48] sm:$0xff] %vm1067_vm5, %v990_v55  ;;  %1772 = vrot.lane.b32.xlu1 %v1694_v61, %s2967_s25 }
 0x140   : > { %1774 = vrot.lane.b32.xlu0 %v1695_v18, %s2967_s25 }
 0x141   : > { %v1757_v23 = vpop.permute.xlu1 %1756 }
 0x142   : > { %v1759_v56 = vpop.permute.xlu0 %1758  ;;  %1847 = vst.msk [vmem:[#allocation3 + $0x30] sm:$0xff] %vm1840_vm9, %v1757_v23 }
 0x143   : > { %1848 = vst.msk [vmem:[#allocation3 + $0x38] sm:$0xff] %vm1840_vm9, %v1759_v56  ;;  %1196 = vrot.lane.b32.xlu1 %v1694_v61, %s2964_s7 }
 0x144   : > { %1198 = vrot.lane.b32.xlu0 %v1695_v18, %s2964_s7 }
 0x145   : > { %v1181_v35 = vpop.permute.xlu1 %1180 }
 0x146   : > { %v1183_v63 = vpop.permute.xlu0 %1182  ;;  %1269 = vst.msk [vmem:[#allocation3 + $0x40] sm:$0xff] %vm1260_vm6, %v1181_v35 }
 0x147   : > { %1270 = vst.msk [vmem:[#allocation3 + $0x48] sm:$0xff] %vm1260_vm6, %v1183_v63  ;;  %1965 = vrot.lane.b32.xlu1 %v1887_v28, %s2968_s12  ;;  %v1700_v63 = vld [vmem:[#allocation2 + $0x121] sm:$0xff] }
 0x148   : > { %1967 = vrot.lane.b32.xlu0 %v1888_v0, %s2968_s12 }
 0x149   : > { %v1950_v3 = vpop.permute.xlu1 %1949 }
 0x14a   : > { %v1952_v25 = vpop.permute.xlu0 %1951  ;;  %2040 = vst.msk [vmem:[#allocation3 + $0x30] sm:$0xff] %vm2033_vm10, %v1950_v3  ;;  %v1701_v3 = vld [vmem:[#allocation2 + $0x129] sm:$0xff] }
 0x14b   : > { %2041 = vst.msk [vmem:[#allocation3 + $0x38] sm:$0xff] %vm2033_vm10, %v1952_v25  ;;  %1389 = vrot.lane.b32.xlu1 %v1887_v28, %s2965_s8 }
 0x14c   : > { %1391 = vrot.lane.b32.xlu0 %v1888_v0, %s2965_s8 }
 0x14d   : > { %v1374_v36 = vpop.permute.xlu1 %1373 }
 0x14e   : > { %v1376_v4 = vpop.permute.xlu0 %1375  ;;  %1462 = vst.msk [vmem:[#allocation3 + $0x40] sm:$0xff] %vm1453_vm7, %v1374_v36 }
 0x14f   : > { %1463 = vst.msk [vmem:[#allocation3 + $0x48] sm:$0xff] %vm1453_vm7, %v1376_v4  ;;  %814 = vrot.lane.b32.xlu1 %v1887_v28, %s2962_s30 }
 0x150   : > { %816 = vrot.lane.b32.xlu0 %v1888_v0, %s2962_s30 }
 0x151   : > { %v799_v32 = vpop.permute.xlu1 %798  ;;  %v2072_v5 = vld [vmem:[#allocation3 + $0x30] sm:$0xff] }
 0x152   : > { %v801_v9 = vpop.permute.xlu0 %800  ;;  %v2073_v6 = vld [vmem:[#allocation3 + $0x38] sm:$0xff]  ;;  %885 = vst.msk [vmem:[#allocation3 + $0x50] sm:$0xff] %vm874_vm4, %v799_v32  ;;  %2868 = vmatprep.mubr.msk.f32.mxu0 %vm2107_vm11, %v2072_v5 }
 0x153   : > { %886 = vst.msk [vmem:[#allocation3 + $0x58] sm:$0xff] %vm874_vm4, %v801_v9  ;;  %1583 = vrot.lane.b32.xlu1 %v3313_v34, %s2966_s13  ;;  %2869 = vmatmul.mubr.msk.f32.gmra.mrb[6].mxu0 %vm2107_vm11, %v2073_v6  ;;  %v1894_v32 = vld [vmem:[#allocation2 + $0x12a] sm:$0xff] }
 0x154   : > { %1585 = vrot.lane.b32.xlu0 %v3333_v40, %s2966_s13 }
 0x155   : > { %v1568_v7 = vpop.permute.xlu1 %1567 }
 0x156   : > { %v1570_v1 = vpop.permute.xlu0 %1569  ;;  %1656 = vst.msk [vmem:[#allocation3 + $0x40] sm:$0xff] %vm1647_vm8, %v1568_v7 }
 0x157   : > { %1657 = vst.msk [vmem:[#allocation3 + $0x48] sm:$0xff] %vm1647_vm8, %v1570_v1  ;;  %1007 = vrot.lane.b32.xlu1 %v3313_v34, %s2963_s6  ;;  %v1889_v34 = vld [vmem:[#allocation2 + $0xf2] sm:$0xff] }
 0x158   : > { %1009 = vrot.lane.b32.xlu0 %v3333_v40, %s2963_s6 }
 0x159   : > { %v992_v12 = vpop.permute.xlu1 %991 }
 0x15a   : > { %v994_v14 = vpop.permute.xlu0 %993  ;;  %1078 = vst.msk [vmem:[#allocation3 + $0x50] sm:$0xff] %vm1067_vm5, %v992_v12 }
 0x15b   : > { %1079 = vst.msk [vmem:[#allocation3 + $0x58] sm:$0xff] %vm1067_vm5, %v994_v14  ;;  %1776 = vrot.lane.b32.xlu1 %v1696_v11, %s2967_s25 }
 0x15c   : > { %1778 = vrot.lane.b32.xlu0 %v1697_v15, %s2967_s25 }
 0x15d   : > { %v1761_v22 = vpop.permute.xlu1 %1760 }
 0x15e   : > { %v1763_v27 = vpop.permute.xlu0 %1762  ;;  %1849 = vst.msk [vmem:[#allocation3 + $0x40] sm:$0xff] %vm1840_vm9, %v1761_v22 }
 0x15f   : > { %1850 = vst.msk [vmem:[#allocation3 + $0x48] sm:$0xff] %vm1840_vm9, %v1763_v27  ;;  %1200 = vrot.lane.b32.xlu1 %v1696_v11, %s2964_s7  ;;  %v1509_v11 = vld [vmem:[#allocation2 + $0x138] sm:$0xff] }
 0x160   : > { %1202 = vrot.lane.b32.xlu0 %v1697_v15, %s2964_s7  ;;  %v1510_v15 = vld [vmem:[#allocation2 + $0x140] sm:$0xff] }
 0x161   : > { %v1185_v40 = vpop.permute.xlu1 %1184 }
 0x162   : > { %v1187_v8 = vpop.permute.xlu0 %1186  ;;  %1271 = vst.msk [vmem:[#allocation3 + $0x50] sm:$0xff] %vm1260_vm6, %v1185_v40 }
 0x163   : > { %1272 = vst.msk [vmem:[#allocation3 + $0x58] sm:$0xff] %vm1260_vm6, %v1187_v8  ;;  %1969 = vrot.lane.b32.xlu1 %v1889_v34, %s2968_s12  ;;  %v1702_v8 = vld [vmem:[#allocation2 + $0x139] sm:$0xff] }
 0x164   : > { %1971 = vrot.lane.b32.xlu0 %v1890_v17, %s2968_s12 }
 0x165   : > { %v1954_v16 = vpop.permute.xlu1 %1953 }
 0x166   : > { %v1956_v2 = vpop.permute.xlu0 %1955  ;;  %2042 = vst.msk [vmem:[#allocation3 + $0x40] sm:$0xff] %vm2033_vm10, %v1954_v16  ;;  %v1703_v16 = vld [vmem:[#allocation2 + $0x141] sm:$0xff] }
 0x167   : > { %2043 = vst.msk [vmem:[#allocation3 + $0x48] sm:$0xff] %vm2033_vm10, %v1956_v2  ;;  %1393 = vrot.lane.b32.xlu1 %v1889_v34, %s2965_s8 }
 0x168   : > { %1395 = vrot.lane.b32.xlu0 %v1890_v17, %s2965_s8 }
 0x169   : > { %v1378_v41 = vpop.permute.xlu1 %1377 }
 0x16a   : > { %v1380_v37 = vpop.permute.xlu0 %1379  ;;  %1464 = vst.msk [vmem:[#allocation3 + $0x50] sm:$0xff] %vm1453_vm7, %v1378_v41 }
 0x16b   : > { %1465 = vst.msk [vmem:[#allocation3 + $0x58] sm:$0xff] %vm1453_vm7, %v1380_v37  ;;  %818 = vrot.lane.b32.xlu1 %v1889_v34, %s2962_s30 }
 0x16c   : > { %820 = vrot.lane.b32.xlu0 %v1890_v17, %s2962_s30 }
 0x16d   : > { %v803_v58 = vpop.permute.xlu1 %802  ;;  %v2074_v31 = vld [vmem:[#allocation3 + $0x40] sm:$0xff] }
 0x16e   : > { %v805_v24 = vpop.permute.xlu0 %804  ;;  %v2075_v19 = vld [vmem:[#allocation3 + $0x48] sm:$0xff]  ;;  %887 = vst.msk [vmem:[#allocation3 + $0x60] sm:$0xff] %vm874_vm4, %v803_v58  ;;  %2871 = vmatprep.mubr.msk.f32.mxu0 %vm2107_vm11, %v2074_v31 }
 0x16f   : > { %888 = vst.msk [vmem:[#allocation3 + $0x68] sm:$0xff] %vm874_vm4, %v805_v24  ;;  %1587 = vrot.lane.b32.xlu1 %v3326_v39, %s2966_s13  ;;  %2872 = vmatmul.mubr.msk.f32.gmra.mrb[8].mxu0 %vm2107_vm11, %v2075_v19  ;;  %v1896_v24 = vld [vmem:[#allocation2 + $0x142] sm:$0xff] }
 0x170   : > { %1589 = vrot.lane.b32.xlu0 %v3346_v45, %s2966_s13 }
 0x171   : > { %v1572_v26 = vpop.permute.xlu1 %1571 }
 0x172   : > { %v1574_v29 = vpop.permute.xlu0 %1573  ;;  %1658 = vst.msk [vmem:[#allocation3 + $0x50] sm:$0xff] %vm1647_vm8, %v1572_v26 }
 0x173   : > { %1659 = vst.msk [vmem:[#allocation3 + $0x58] sm:$0xff] %vm1647_vm8, %v1574_v29  ;;  %1011 = vrot.lane.b32.xlu1 %v3326_v39, %s2963_s6 }
 0x174   : > { %1013 = vrot.lane.b32.xlu0 %v3346_v45, %s2963_s6  ;;  %v1891_v45 = vld [vmem:[#allocation2 + $0x10a] sm:$0xff] }
 0x175   : > { %v996_v52 = vpop.permute.xlu1 %995 }
 0x176   : > { %v998_v53 = vpop.permute.xlu0 %997  ;;  %1080 = vst.msk [vmem:[#allocation3 + $0x60] sm:$0xff] %vm1067_vm5, %v996_v52 }
 0x177   : > { %1081 = vst.msk [vmem:[#allocation3 + $0x68] sm:$0xff] %vm1067_vm5, %v998_v53  ;;  %1780 = vrot.lane.b32.xlu1 %v1698_v48, %s2967_s25  ;;  %v1705_v53 = vld [vmem:[#allocation2 + $0x159] sm:$0xff] }
 0x178   : > { %1782 = vrot.lane.b32.xlu0 %v1699_v10, %s2967_s25 }
 0x179   : > { %v1765_v39 = vpop.permute.xlu1 %1764 }
 0x17a   : > { %v1767_v30 = vpop.permute.xlu0 %1766  ;;  %1851 = vst.msk [vmem:[#allocation3 + $0x50] sm:$0xff] %vm1840_vm9, %v1765_v39 }
 0x17b   : > { %1852 = vst.msk [vmem:[#allocation3 + $0x58] sm:$0xff] %vm1840_vm9, %v1767_v30  ;;  %1204 = vrot.lane.b32.xlu1 %v1698_v48, %s2964_s7  ;;  %v1704_v48 = vld [vmem:[#allocation2 + $0x151] sm:$0xff] }
 0x17c   : > { %1206 = vrot.lane.b32.xlu0 %v1699_v10, %s2964_s7 }
 0x17d   : > { %v1189_v54 = vpop.permute.xlu1 %1188 }
 0x17e   : > { %v1191_v20 = vpop.permute.xlu0 %1190  ;;  %1273 = vst.msk [vmem:[#allocation3 + $0x60] sm:$0xff] %vm1260_vm6, %v1189_v54 }
 0x17f   : > { %1274 = vst.msk [vmem:[#allocation3 + $0x68] sm:$0xff] %vm1260_vm6, %v1191_v20  ;;  %1973 = vrot.lane.b32.xlu1 %v1891_v45, %s2968_s12  ;;  %v1898_v20 = vld [vmem:[#allocation2 + $0x15a] sm:$0xff] }
 0x180   : > { %1975 = vrot.lane.b32.xlu0 %v1892_v57, %s2968_s12 }
 0x181   : > { %v1958_v59 = vpop.permute.xlu1 %1957 }
 0x182   : > { %v1960_v60 = vpop.permute.xlu0 %1959  ;;  %2044 = vst.msk [vmem:[#allocation3 + $0x50] sm:$0xff] %vm2033_vm10, %v1958_v59 }
 0x183   : > { %2045 = vst.msk [vmem:[#allocation3 + $0x58] sm:$0xff] %vm2033_vm10, %v1960_v60  ;;  %1397 = vrot.lane.b32.xlu1 %v1891_v45, %s2965_s8 }
 0x184   : > { %1399 = vrot.lane.b32.xlu0 %v1892_v57, %s2965_s8 }
 0x185   : > { %v1382_v61 = vpop.permute.xlu1 %1381 }
 0x186   : > { %v1384_v62 = vpop.permute.xlu0 %1383  ;;  %1466 = vst.msk [vmem:[#allocation3 + $0x60] sm:$0xff] %vm1453_vm7, %v1382_v61 }
 0x187   : > { %1467 = vst.msk [vmem:[#allocation3 + $0x68] sm:$0xff] %vm1453_vm7, %v1384_v62  ;;  %822 = vrot.lane.b32.xlu1 %v1891_v45, %s2962_s30  ;;  %v1897_v45 = vld [vmem:[#allocation2 + $0x152] sm:$0xff] }
 0x188   : > { %824 = vrot.lane.b32.xlu0 %v1892_v57, %s2962_s30 }
 0x189   : > { %v807_v55 = vpop.permute.xlu1 %806  ;;  %v2076_v23 = vld [vmem:[#allocation3 + $0x50] sm:$0xff] }
 0x18a   : > { %v809_v18 = vpop.permute.xlu0 %808  ;;  %v2077_v56 = vld [vmem:[#allocation3 + $0x58] sm:$0xff]  ;;  %889 = vst.msk [vmem:[#allocation3 + $0x70] sm:$0xff] %vm874_vm4, %v807_v55  ;;  %2874 = vmatprep.mubr.msk.f32.mxu0 %vm2107_vm11, %v2076_v23 }
 0x18b   : > { %890 = vst.msk [vmem:[#allocation3 + $0x78] sm:$0xff] %vm874_vm4, %v809_v18  ;;  %1591 = vrot.lane.b32.xlu1 %v3339_v43, %s2966_s13  ;;  %2875 = vmatmul.mubr.msk.f32.gmra.mrb[10].mxu0 %vm2107_vm11, %v2077_v56 }
 0x18c   : > { %1593 = vrot.lane.b32.xlu0 %v3353_v49, %s2966_s13 }
 0x18d   : > { %v1576_v28 = vpop.permute.xlu1 %1575 }
 0x18e   : > { %1660 = vst.msk [vmem:[#allocation3 + $0x60] sm:$0xff] %vm1647_vm8, %v1576_v28  ;;  %v1578_v35 = vpop.permute.xlu0 %1577 }
 0x18f   : > { %1661 = vst.msk [vmem:[#allocation3 + $0x68] sm:$0xff] %vm1647_vm8, %v1578_v35  ;;  %1015 = vrot.lane.b32.xlu1 %v3339_v43, %s2963_s6  ;;  %v1893_v43 = vld [vmem:[#allocation2 + $0x122] sm:$0xff] }
 0x190   : > { %1017 = vrot.lane.b32.xlu0 %v3353_v49, %s2963_s6  ;;  %v1513_v35 = vld [vmem:[#allocation2 + $0x168] sm:$0xff] }
 0x191   : > { %v1000_v0 = vpop.permute.xlu1 %999 }
 0x192   : > { %1082 = vst.msk [vmem:[#allocation3 + $0x70] sm:$0xff] %vm1067_vm5, %v1000_v0  ;;  %v1002_v25 = vpop.permute.xlu0 %1001 }
 0x193   : > { %1083 = vst.msk [vmem:[#allocation3 + $0x78] sm:$0xff] %vm1067_vm5, %v1002_v25  ;;  %1784 = vrot.lane.b32.xlu1 %v1700_v63, %s2967_s25 }
 0x194   : > { %1786 = vrot.lane.b32.xlu0 %v1701_v3, %s2967_s25 }
 0x195   : > { %v1769_v36 = vpop.permute.xlu1 %1768 }
 0x196   : > { %1853 = vst.msk [vmem:[#allocation3 + $0x60] sm:$0xff] %vm1840_vm9, %v1769_v36  ;;  %v1771_v4 = vpop.permute.xlu0 %1770 }
 0x197   : > { %1854 = vst.msk [vmem:[#allocation3 + $0x68] sm:$0xff] %vm1840_vm9, %v1771_v4  ;;  %1208 = vrot.lane.b32.xlu1 %v1700_v63, %s2964_s7 }
 0x198   : > { %1210 = vrot.lane.b32.xlu0 %v1701_v3, %s2964_s7  ;;  %v1514_v3 = vld [vmem:[#allocation2 + $0x170] sm:$0xff] }
 0x199   : > { %v1193_v49 = vpop.permute.xlu1 %1192 }
 0x19a   : > { %1275 = vst.msk [vmem:[#allocation3 + $0x70] sm:$0xff] %vm1260_vm6, %v1193_v49  ;;  %v1195_v9 = vpop.permute.xlu0 %1194  ;;  %v1706_v49 = vld [vmem:[#allocation2 + $0x169] sm:$0xff] }
 0x19b   : > { %1276 = vst.msk [vmem:[#allocation3 + $0x78] sm:$0xff] %vm1260_vm6, %v1195_v9  ;;  %1977 = vrot.lane.b32.xlu1 %v1893_v43, %s2968_s12  ;;  %v1707_v9 = vld [vmem:[#allocation2 + $0x171] sm:$0xff] }
 0x19c   : > { %1979 = vrot.lane.b32.xlu0 %v1894_v32, %s2968_s12 }
 0x19d   : > { %v1962_v5 = vpop.permute.xlu1 %1961 }
 0x19e   : > { %2046 = vst.msk [vmem:[#allocation3 + $0x60] sm:$0xff] %vm2033_vm10, %v1962_v5  ;;  %v1964_v6 = vpop.permute.xlu0 %1963 }
 0x19f   : > { %2047 = vst.msk [vmem:[#allocation3 + $0x68] sm:$0xff] %vm2033_vm10, %v1964_v6  ;;  %1401 = vrot.lane.b32.xlu1 %v1893_v43, %s2965_s8 }
 0x1a0   : > { %1403 = vrot.lane.b32.xlu0 %v1894_v32, %s2965_s8 }
 0x1a1   : > { %v1386_v7 = vpop.permute.xlu1 %1385 }
 0x1a2   : > { %1468 = vst.msk [vmem:[#allocation3 + $0x70] sm:$0xff] %vm1453_vm7, %v1386_v7  ;;  %v1388_v1 = vpop.permute.xlu0 %1387 }
 0x1a3   : > { %1469 = vst.msk [vmem:[#allocation3 + $0x78] sm:$0xff] %vm1453_vm7, %v1388_v1  ;;  %826 = vrot.lane.b32.xlu1 %v1893_v43, %s2962_s30  ;;  %v1899_v1 = vld [vmem:[#allocation2 + $0x16a] sm:$0xff] }
 0x1a4   : > { %828 = vrot.lane.b32.xlu0 %v1894_v32, %s2962_s30 }
 0x1a5   : > { %v811_v12 = vpop.permute.xlu1 %810  ;;  %v2078_v14 = vld [vmem:[#allocation3 + $0x60] sm:$0xff] }
 0x1a6   : > { %891 = vst.msk [vmem:[#allocation3 + $0x80] sm:$0xff] %vm874_vm4, %v811_v12  ;;  %v813_v22 = vpop.permute.xlu0 %812  ;;  %2877 = vmatprep.mubr.msk.f32.mxu0 %vm2107_vm11, %v2078_v14  ;;  %v2079_v27 = vld [vmem:[#allocation3 + $0x68] sm:$0xff] }
 0x1a7   : > { %892 = vst.msk [vmem:[#allocation3 + $0x88] sm:$0xff] %vm874_vm4, %v813_v22  ;;  %1595 = vrot.lane.b32.xlu1 %v1509_v11, %s2966_s13  ;;  %2878 = vmatmul.mubr.msk.f32.gmra.mrb[12].mxu0 %vm2107_vm11, %v2079_v27  ;;  %v1900_v12 = vld [vmem:[#allocation2 + $0x172] sm:$0xff] }
 0x1a8   : > { %1597 = vrot.lane.b32.xlu0 %v1510_v15, %s2966_s13 }
 0x1a9   : > { %v1580_v34 = vpop.permute.xlu1 %1579 }
 0x1aa   : > { %1662 = vst.msk [vmem:[#allocation3 + $0x70] sm:$0xff] %vm1647_vm8, %v1580_v34  ;;  %v1582_v40 = vpop.permute.xlu0 %1581 }
 0x1ab   : > { %1663 = vst.msk [vmem:[#allocation3 + $0x78] sm:$0xff] %vm1647_vm8, %v1582_v40  ;;  %1019 = vrot.lane.b32.xlu1 %v1509_v11, %s2963_s6 }
 0x1ac   : > { %1021 = vrot.lane.b32.xlu0 %v1510_v15, %s2963_s6 }
 0x1ad   : > { %v1004_v17 = vpop.permute.xlu1 %1003 }
 0x1ae   : > { %1084 = vst.msk [vmem:[#allocation3 + $0x80] sm:$0xff] %vm1067_vm5, %v1004_v17  ;;  %v1006_v2 = vpop.permute.xlu0 %1005 }
 0x1af   : > { %1085 = vst.msk [vmem:[#allocation3 + $0x88] sm:$0xff] %vm1067_vm5, %v1006_v2  ;;  %1788 = vrot.lane.b32.xlu1 %v1702_v8, %s2967_s25 }
 0x1b0   : > { %1790 = vrot.lane.b32.xlu0 %v1703_v16, %s2967_s25 }
 0x1b1   : > { %v1773_v41 = vpop.permute.xlu1 %1772 }
 0x1b2   : > { %1855 = vst.msk [vmem:[#allocation3 + $0x70] sm:$0xff] %vm1840_vm9, %v1773_v41  ;;  %v1775_v37 = vpop.permute.xlu0 %1774 }
 0x1b3   : > { %1856 = vst.msk [vmem:[#allocation3 + $0x78] sm:$0xff] %vm1840_vm9, %v1775_v37  ;;  %1212 = vrot.lane.b32.xlu1 %v1702_v8, %s2964_s7  ;;  %v1515_v37 = vld [vmem:[#allocation2 + $0x180] sm:$0xff] }
 0x1b4   : > { %1214 = vrot.lane.b32.xlu0 %v1703_v16, %s2964_s7 }
 0x1b5   : > { %v1197_v58 = vpop.permute.xlu1 %1196 }
 0x1b6   : > { %1277 = vst.msk [vmem:[#allocation3 + $0x80] sm:$0xff] %vm1260_vm6, %v1197_v58  ;;  %v1199_v31 = vpop.permute.xlu0 %1198 }
 0x1b7   : > { %1278 = vst.msk [vmem:[#allocation3 + $0x88] sm:$0xff] %vm1260_vm6, %v1199_v31  ;;  %1981 = vrot.lane.b32.xlu1 %v1895_v44, %s2968_s12 }
 0x1b8   : > { %1983 = vrot.lane.b32.xlu0 %v1896_v24, %s2968_s12 }
 0x1b9   : > { %v1966_v19 = vpop.permute.xlu1 %1965 }
 0x1ba   : > { %2048 = vst.msk [vmem:[#allocation3 + $0x70] sm:$0xff] %vm2033_vm10, %v1966_v19  ;;  %v1968_v33 = vpop.permute.xlu0 %1967 }
 0x1bb   : > { %2049 = vst.msk [vmem:[#allocation3 + $0x78] sm:$0xff] %vm2033_vm10, %v1968_v33  ;;  %1405 = vrot.lane.b32.xlu1 %v1895_v44, %s2965_s8 }
 0x1bc   : > { %1407 = vrot.lane.b32.xlu0 %v1896_v24, %s2965_s8 }
 0x1bd   : > { %v1390_v38 = vpop.permute.xlu1 %1389 }
 0x1be   : > { %1470 = vst.msk [vmem:[#allocation3 + $0x80] sm:$0xff] %vm1453_vm7, %v1390_v38  ;;  %v1392_v42 = vpop.permute.xlu0 %1391 }
 0x1bf   : > { %1471 = vst.msk [vmem:[#allocation3 + $0x88] sm:$0xff] %vm1453_vm7, %v1392_v42  ;;  %830 = vrot.lane.b32.xlu1 %v1895_v44, %s2962_s30  ;;  %v1708_v42 = vld [vmem:[#allocation2 + $0x181] sm:$0xff] }
 0x1c0   : > { %832 = vrot.lane.b32.xlu0 %v1896_v24, %s2962_s30  ;;  %v1516_v24 = vld [vmem:[#allocation2 + $0x188] sm:$0xff] }
 0x1c1   : > { %v815_v47 = vpop.permute.xlu1 %814  ;;  %v2080_v50 = vld [vmem:[#allocation3 + $0x70] sm:$0xff] }
 0x1c2   : > { %893 = vst.msk [vmem:[#allocation3 + $0x90] sm:$0xff] %vm874_vm4, %v815_v47  ;;  %v817_v26 = vpop.permute.xlu0 %816  ;;  %2880 = vmatprep.mubr.msk.f32.mxu0 %vm2107_vm11, %v2080_v50  ;;  %v2081_v29 = vld [vmem:[#allocation3 + $0x78] sm:$0xff] }
 0x1c3   : > { %894 = vst.msk [vmem:[#allocation3 + $0x98] sm:$0xff] %vm874_vm4, %v817_v26  ;;  %1599 = vrot.lane.b32.xlu1 %v1511_v46, %s2966_s13  ;;  %2881 = vmatmul.mubr.msk.f32.gmra.mrb[14].mxu0 %vm2107_vm11, %v2081_v29  ;;  %v1709_v47 = vld [vmem:[#allocation2 + $0x189] sm:$0xff] }
 0x1c4   : > { %1601 = vrot.lane.b32.xlu0 %v1512_v13, %s2966_s13  ;;  %v1901_v29 = vld [vmem:[#allocation2 + $0x182] sm:$0xff] }
 0x1c5   : > { %v1584_v21 = vpop.permute.xlu1 %1583 }
 0x1c6   : > { %1664 = vst.msk [vmem:[#allocation3 + $0x80] sm:$0xff] %vm1647_vm8, %v1584_v21  ;;  %v1586_v51 = vpop.permute.xlu0 %1585 }
 0x1c7   : > { %1665 = vst.msk [vmem:[#allocation3 + $0x88] sm:$0xff] %vm1647_vm8, %v1586_v51  ;;  %1023 = vrot.lane.b32.xlu1 %v1511_v46, %s2963_s6  ;;  %v1902_v51 = vld [vmem:[#allocation2 + $0x18a] sm:$0xff] }
 0x1c8   : > { %1025 = vrot.lane.b32.xlu0 %v1512_v13, %s2963_s6 }
 0x1c9   : > { %v1008_v52 = vpop.permute.xlu1 %1007 }
 0x1ca   : > { %1086 = vst.msk [vmem:[#allocation3 + $0x90] sm:$0xff] %vm1067_vm5, %v1008_v52  ;;  %v1010_v10 = vpop.permute.xlu0 %1009 }
 0x1cb   : > { %1087 = vst.msk [vmem:[#allocation3 + $0x98] sm:$0xff] %vm1067_vm5, %v1010_v10  ;;  %1792 = vrot.lane.b32.xlu1 %v1704_v48, %s2967_s25 }
 0x1cc   : > { %1794 = vrot.lane.b32.xlu0 %v1705_v53, %s2967_s25 }
 0x1cd   : > { %v1777_v39 = vpop.permute.xlu1 %1776 }
 0x1ce   : > { %1857 = vst.msk [vmem:[#allocation3 + $0x80] sm:$0xff] %vm1840_vm9, %v1777_v39  ;;  %v1779_v30 = vpop.permute.xlu0 %1778 }
 0x1cf   : > { %1858 = vst.msk [vmem:[#allocation3 + $0x88] sm:$0xff] %vm1840_vm9, %v1779_v30  ;;  %1216 = vrot.lane.b32.xlu1 %v1704_v48, %s2964_s7 }
 0x1d0   : > { %1218 = vrot.lane.b32.xlu0 %v1705_v53, %s2964_s7 }
 0x1d1   : > { %v1201_v54 = vpop.permute.xlu1 %1200 }
 0x1d2   : > { %1279 = vst.msk [vmem:[#allocation3 + $0x90] sm:$0xff] %vm1260_vm6, %v1201_v54  ;;  %v1203_v57 = vpop.permute.xlu0 %1202  ;;  %v3853_v59 = vpop.f32.mrb[0].mxu0  ;;  %v1517_v54 = vld [vmem:[#allocation2 + $0x198] sm:$0xff] }
 0x1d3   : > { %1280 = vst.msk [vmem:[#allocation3 + $0x98] sm:$0xff] %vm1260_vm6, %v1203_v57  ;;  %1985 = vrot.lane.b32.xlu1 %v1897_v45, %s2968_s12  ;;  %v2430_v60 = vsel %vm378_vm0, %v3853_v59, 0.0  ;;  %v3861_v61 = vpop.f32.mrb[1].mxu0 }
 0x1d4   : > { %1987 = vrot.lane.b32.xlu0 %v1898_v20, %s2968_s12  ;;  %2635 = vst.msk [vmem:[%s3848_s22 + $0x8] sm:$0xff] %vm378_vm0, %v3853_v59  ;;  %v2429_v55 = vsel %vm378_vm0, %v3861_v61, 0.0  ;;  %2634 = vst.msk [vmem:[%s3848_s22] sm:$0xff] %vm378_vm0, %v3861_v61 }
 0x1d5   : > { %v1970_v62 = vpop.permute.xlu1 %1969  ;;  %v2431_v23 = vadd.f32 %v2430_v60, %v2429_v55 }
 0x1d6   : > { %2050 = vst.msk [vmem:[#allocation3 + $0x80] sm:$0xff] %vm2033_vm10, %v1970_v62  ;;  %v1972_v18 = vpop.permute.xlu0 %1971  ;;  %v1710_v62 = vld [vmem:[#allocation2 + $0x199] sm:$0xff] }
 0x1d7   : > { %2051 = vst.msk [vmem:[#allocation3 + $0x88] sm:$0xff] %vm2033_vm10, %v1972_v18  ;;  %1409 = vrot.lane.b32.xlu1 %v1897_v45, %s2965_s8  ;;  %v1518_v18 = vld [vmem:[#allocation2 + $0x1a0] sm:$0xff] }
 0x1d8   : > { %1411 = vrot.lane.b32.xlu0 %v1898_v20, %s2965_s8 }
 0x1d9   : > { %v1394_v56 = vpop.permute.xlu1 %1393 }
 0x1da   : > { %1472 = vst.msk [vmem:[#allocation3 + $0x90] sm:$0xff] %vm1453_vm7, %v1394_v56  ;;  %v1396_v28 = vpop.permute.xlu0 %1395 }
 0x1db   : > { %1473 = vst.msk [vmem:[#allocation3 + $0x98] sm:$0xff] %vm1453_vm7, %v1396_v28  ;;  %834 = vrot.lane.b32.xlu1 %v1897_v45, %s2962_s30  ;;  %v1903_v28 = vld [vmem:[#allocation2 + $0x19a] sm:$0xff] }
 0x1dc   : > { %836 = vrot.lane.b32.xlu0 %v1898_v20, %s2962_s30 }
 0x1dd   : > { %v819_v63 = vpop.permute.xlu1 %818  ;;  %v2082_v0 = vld [vmem:[#allocation3 + $0x80] sm:$0xff] }
 0x1de   : > { %895 = vst.msk [vmem:[#allocation3 + $0xa0] sm:$0xff] %vm874_vm4, %v819_v63  ;;  %v821_v25 = vpop.permute.xlu0 %820  ;;  %2883 = vmatprep.mubr.msk.f32.mxu1 %vm2107_vm11, %v2082_v0  ;;  %v2083_v36 = vld [vmem:[#allocation3 + $0x88] sm:$0xff]  ;;  %v1711_v0 = vld [vmem:[#allocation2 + $0x1a1] sm:$0xff] }
 0x1df   : > { %896 = vst.msk [vmem:[#allocation3 + $0xa8] sm:$0xff] %vm874_vm4, %v821_v25  ;;  %1603 = vrot.lane.b32.xlu1 %v1513_v35, %s2966_s13  ;;  %2884 = vmatmul.mubr.msk.f32.vlgmr.msra.gmra.mrb[0].mxu1 %vm2107_vm11, %v2083_v36  ;;  %v1904_v36 = vld [vmem:[#allocation2 + $0x1a2] sm:$0xff] }
 0x1e0   : > { %1605 = vrot.lane.b32.xlu0 %v1514_v3, %s2966_s13 }
 0x1e1   : > { %v1588_v4 = vpop.permute.xlu1 %1587 }
 0x1e2   : > { %1666 = vst.msk [vmem:[#allocation3 + $0x90] sm:$0xff] %vm1647_vm8, %v1588_v4  ;;  %v1590_v43 = vpop.permute.xlu0 %1589 }
 0x1e3   : > { %1667 = vst.msk [vmem:[#allocation3 + $0x98] sm:$0xff] %vm1647_vm8, %v1590_v43  ;;  %1027 = vrot.lane.b32.xlu1 %v1513_v35, %s2963_s6 }
 0x1e4   : > { %1029 = vrot.lane.b32.xlu0 %v1514_v3, %s2963_s6 }
 0x1e5   : > { %v1012_v32 = vpop.permute.xlu1 %1011 }
 0x1e6   : > { %1088 = vst.msk [vmem:[#allocation3 + $0xa0] sm:$0xff] %vm1067_vm5, %v1012_v32  ;;  %v1014_v5 = vpop.permute.xlu0 %1013 }
 0x1e7   : > { %1089 = vst.msk [vmem:[#allocation3 + $0xa8] sm:$0xff] %vm1067_vm5, %v1014_v5  ;;  %1796 = vrot.lane.b32.xlu1 %v1706_v49, %s2967_s25 }
 0x1e8   : > { %1798 = vrot.lane.b32.xlu0 %v1707_v9, %s2967_s25 }
 0x1e9   : > { %v1781_v6 = vpop.permute.xlu1 %1780 }
 0x1ea   : > { %1859 = vst.msk [vmem:[#allocation3 + $0x90] sm:$0xff] %vm1840_vm9, %v1781_v6  ;;  %v1783_v7 = vpop.permute.xlu0 %1782 }
 0x1eb   : > { %1860 = vst.msk [vmem:[#allocation3 + $0x98] sm:$0xff] %vm1840_vm9, %v1783_v7  ;;  %1220 = vrot.lane.b32.xlu1 %v1706_v49, %s2964_s7 }
 0x1ec   : > { %1222 = vrot.lane.b32.xlu0 %v1707_v9, %s2964_s7 }
 0x1ed   : > { %v1205_v11 = vpop.permute.xlu1 %1204 }
 0x1ee   : > { %1281 = vst.msk [vmem:[#allocation3 + $0xa0] sm:$0xff] %vm1260_vm6, %v1205_v11  ;;  %v1207_v14 = vpop.permute.xlu0 %1206  ;;  %v3895_v15 = vpop.f32.mrb[2].mxu0 }
 0x1ef   : > { %1282 = vst.msk [vmem:[#allocation3 + $0xa8] sm:$0xff] %vm1260_vm6, %v1207_v14  ;;  %1989 = vrot.lane.b32.xlu1 %v1899_v1, %s2968_s12  ;;  %v3902_v22 = vpop.f32.mrb[3].mxu0  ;;  %v2434_v27 = vsel %vm378_vm0, %v3895_v15, 0.0 }
 0x1f0   : > { %2637 = vst.msk [vmem:[%s3848_s22 + $0x18] sm:$0xff] %vm378_vm0, %v3895_v15  ;;  %v2432_v34 = vsel %vm378_vm0, %v3902_v22, 0.0  ;;  %2636 = vst.msk [vmem:[%s3848_s22 + $0x10] sm:$0xff] %vm378_vm0, %v3902_v22  ;;  %1991 = vrot.lane.b32.xlu0 %v1900_v12, %s2968_s12 }
 0x1f1   : > { %v2433_v40 = vadd.f32 %v2432_v34, %v2431_v23  ;;  %v1974_v8 = vpop.permute.xlu1 %1973 }
 0x1f2   : > { %2052 = vst.msk [vmem:[#allocation3 + $0x90] sm:$0xff] %vm2033_vm10, %v1974_v8  ;;  %v1976_v17 = vpop.permute.xlu0 %1975 }
 0x1f3   : > { %2053 = vst.msk [vmem:[#allocation3 + $0x98] sm:$0xff] %vm2033_vm10, %v1976_v17  ;;  %1413 = vrot.lane.b32.xlu1 %v1899_v1, %s2965_s8  ;;  %v2435_v16 = vadd.f32 %v2434_v27, %v2433_v40 }
 0x1f4   : > { %1415 = vrot.lane.b32.xlu0 %v1900_v12, %s2965_s8 }
 0x1f5   : > { %v1398_v2 = vpop.permute.xlu1 %1397 }
 0x1f6   : > { %1474 = vst.msk [vmem:[#allocation3 + $0xa0] sm:$0xff] %vm1453_vm7, %v1398_v2  ;;  %v1400_v41 = vpop.permute.xlu0 %1399 }
 0x1f7   : > { %1475 = vst.msk [vmem:[#allocation3 + $0xa8] sm:$0xff] %vm1453_vm7, %v1400_v41  ;;  %838 = vrot.lane.b32.xlu1 %v1899_v1, %s2962_s30 }
 0x1f8   : > { %840 = vrot.lane.b32.xlu0 %v1900_v12, %s2962_s30 }
 0x1f9   : > { %v823_v44 = vpop.permute.xlu1 %822  ;;  %v2084_v58 = vld [vmem:[#allocation3 + $0x90] sm:$0xff] }
 0x1fa   : > { %897 = vst.msk [vmem:[#allocation3 + $0xb0] sm:$0xff] %vm874_vm4, %v823_v44  ;;  %v825_v31 = vpop.permute.xlu0 %824  ;;  %2886 = vmatprep.mubr.msk.f32.mxu1 %vm2107_vm11, %v2084_v58  ;;  %v2085_v19 = vld [vmem:[#allocation3 + $0x98] sm:$0xff] }
 0x1fb   : > { %898 = vst.msk [vmem:[#allocation3 + $0xb8] sm:$0xff] %vm874_vm4, %v825_v31  ;;  %1607 = vrot.lane.b32.xlu1 %v1515_v37, %s2966_s13  ;;  %2887 = vmatmul.mubr.msk.f32.gmra.mrb[2].mxu1 %vm2107_vm11, %v2085_v19 }
 0x1fc   : > { %1609 = vrot.lane.b32.xlu0 %v1516_v24, %s2966_s13 }
 0x1fd   : > { %v1592_v33 = vpop.permute.xlu1 %1591 }
 0x1fe   : > { %1668 = vst.msk [vmem:[#allocation3 + $0xa0] sm:$0xff] %vm1647_vm8, %v1592_v33  ;;  %v1594_v38 = vpop.permute.xlu0 %1593 }
 0x1ff   : > { %1669 = vst.msk [vmem:[#allocation3 + $0xa8] sm:$0xff] %vm1647_vm8, %v1594_v38  ;;  %1031 = vrot.lane.b32.xlu1 %v1515_v37, %s2963_s6 }
 0x200   : > { %1033 = vrot.lane.b32.xlu0 %v1516_v24, %s2963_s6 }
 0x201   : > { %v1016_v46 = vpop.permute.xlu1 %1015 }
 0x202   : > { %1090 = vst.msk [vmem:[#allocation3 + $0xb0] sm:$0xff] %vm1067_vm5, %v1016_v46  ;;  %v1018_v50 = vpop.permute.xlu0 %1017 }
 0x203   : > { %1091 = vst.msk [vmem:[#allocation3 + $0xb8] sm:$0xff] %vm1067_vm5, %v1018_v50  ;;  %1800 = vrot.lane.b32.xlu1 %v1708_v42, %s2967_s25 }
 0x204   : > { %1802 = vrot.lane.b32.xlu0 %v1709_v47, %s2967_s25 }
 0x205   : > { %v1785_v13 = vpop.permute.xlu1 %1784 }
 0x206   : > { %1861 = vst.msk [vmem:[#allocation3 + $0xa0] sm:$0xff] %vm1840_vm9, %v1785_v13  ;;  %v1787_v26 = vpop.permute.xlu0 %1786 }
 0x207   : > { %1862 = vst.msk [vmem:[#allocation3 + $0xa8] sm:$0xff] %vm1840_vm9, %v1787_v26  ;;  %1224 = vrot.lane.b32.xlu1 %v1708_v42, %s2964_s7 }
 0x208   : > { %1226 = vrot.lane.b32.xlu0 %v1709_v47, %s2964_s7  ;;  %s4204_s7 = scalar_lea.vmem %s4332_s5, %s2761_s21 }
 0x209   : > { %v1209_v21 = vpop.permute.xlu1 %1208 }
 0x20a   : > { %1283 = vst.msk [vmem:[#allocation3 + $0xb0] sm:$0xff] %vm1260_vm6, %v1209_v21  ;;  %v1211_v48 = vpop.permute.xlu0 %1210  ;;  %v3939_v52 = vpop.f32.mrb[4].mxu0 }
 0x20b   : > { %1284 = vst.msk [vmem:[#allocation3 + $0xb8] sm:$0xff] %vm1260_vm6, %v1211_v48  ;;  %1993 = vrot.lane.b32.xlu1 %v1901_v29, %s2968_s12  ;;  %v3946_v53 = vpop.f32.mrb[5].mxu0  ;;  %v2438_v10 = vsel %vm378_vm0, %v3939_v52, 0.0 }
 0x20c   : > { %2639 = vst.msk [vmem:[%s3848_s22 + $0x28] sm:$0xff] %vm378_vm0, %v3939_v52  ;;  %v2436_v39 = vsel %vm378_vm0, %v3946_v53, 0.0  ;;  %2638 = vst.msk [vmem:[%s3848_s22 + $0x20] sm:$0xff] %vm378_vm0, %v3946_v53  ;;  %1995 = vrot.lane.b32.xlu0 %v1902_v51, %s2968_s12 }
 0x20d   : > { %v2437_v30 = vadd.f32 %v2436_v39, %v2435_v16  ;;  %v1978_v45 = vpop.permute.xlu1 %1977 }
 0x20e   : > { %2054 = vst.msk [vmem:[#allocation3 + $0xa0] sm:$0xff] %vm2033_vm10, %v1978_v45  ;;  %v1980_v20 = vpop.permute.xlu0 %1979 }
 0x20f   : > { %2055 = vst.msk [vmem:[#allocation3 + $0xa8] sm:$0xff] %vm2033_vm10, %v1980_v20  ;;  %1417 = vrot.lane.b32.xlu1 %v1901_v29, %s2965_s8  ;;  %v2439_v57 = vadd.f32 %v2438_v10, %v2437_v30 }
 0x210   : > { %1611 = vrot.lane.b32.xlu0 %v1517_v54, %s2966_s13 }
 0x211   : > { %v1402_v60 = vpop.permute.xlu1 %1401 }
 0x212   : > { %1476 = vst.msk [vmem:[#allocation3 + $0xb0] sm:$0xff] %vm1453_vm7, %v1402_v60  ;;  %v1404_v55 = vpop.permute.xlu0 %1403 }
 0x213   : > { %1477 = vst.msk [vmem:[#allocation3 + $0xb8] sm:$0xff] %vm1453_vm7, %v1404_v55  ;;  %1419 = vrot.lane.b32.xlu1 %v1902_v51, %s2965_s8 }
 0x214   : > { %1804 = vrot.lane.b32.xlu0 %v1710_v62, %s2967_s25 }
 0x215   : > { %v827_v23 = vpop.permute.xlu1 %826  ;;  %v2086_v56 = vld [vmem:[#allocation3 + $0xa0] sm:$0xff] }
 0x216   : > { %899 = vst.msk [vmem:[#allocation3 + $0xc0] sm:$0xff] %vm874_vm4, %v827_v23  ;;  %v829_v35 = vpop.permute.xlu0 %828  ;;  %2889 = vmatprep.mubr.msk.f32.mxu1 %vm2107_vm11, %v2086_v56  ;;  %v2087_v63 = vld [vmem:[#allocation3 + $0xa8] sm:$0xff] }
 0x217   : > { %900 = vst.msk [vmem:[#allocation3 + $0xc8] sm:$0xff] %vm874_vm4, %v829_v35  ;;  %1613 = vrot.lane.b32.xlu1 %v1518_v18, %s2966_s13  ;;  %2890 = vmatmul.mubr.msk.f32.gmra.mrb[4].mxu1 %vm2107_vm11, %v2087_v63 }
 0x218   : > { %1997 = vrot.lane.b32.xlu0 %v1903_v28, %s2968_s12 }
 0x219   : > { %v1596_v3 = vpop.permute.xlu1 %1595 }
 0x21a   : > { %1670 = vst.msk [vmem:[#allocation3 + $0xb0] sm:$0xff] %vm1647_vm8, %v1596_v3  ;;  %v1598_v25 = vpop.permute.xlu0 %1597 }
 0x21b   : > { %1671 = vst.msk [vmem:[#allocation3 + $0xb8] sm:$0xff] %vm1647_vm8, %v1598_v25  ;;  %1806 = vrot.lane.b32.xlu1 %v1711_v0, %s2967_s25 }
 0x21d   : > { %v1020_v4 = vpop.permute.xlu1 %1019 }
 0x21e   : > { %1092 = vst.msk [vmem:[#allocation3 + $0xc0] sm:$0xff] %vm1067_vm5, %v1020_v4  ;;  %v1022_v43 = vpop.permute.xlu0 %1021 }
 0x21f   : > { %1093 = vst.msk [vmem:[#allocation3 + $0xc8] sm:$0xff] %vm1067_vm5, %v1022_v43  ;;  %1999 = vrot.lane.b32.xlu1 %v1904_v36, %s2968_s12 }
 0x221   : > { %v1789_v49 = vpop.permute.xlu1 %1788 }
 0x222   : > { %1863 = vst.msk [vmem:[#allocation3 + $0xb0] sm:$0xff] %vm1840_vm9, %v1789_v49  ;;  %v1791_v32 = vpop.permute.xlu0 %1790 }
 0x223   : > { %1864 = vst.msk [vmem:[#allocation3 + $0xb8] sm:$0xff] %vm1840_vm9, %v1791_v32 }
 0x225   : > { %v1213_v9 = vpop.permute.xlu1 %1212 }
 0x226   : > { %1285 = vst.msk [vmem:[#allocation3 + $0xc0] sm:$0xff] %vm1260_vm6, %v1213_v9  ;;  %v1215_v5 = vpop.permute.xlu0 %1214  ;;  %v3979_v6 = vpop.f32.mrb[6].mxu0 }
 0x227   : > { %1286 = vst.msk [vmem:[#allocation3 + $0xc8] sm:$0xff] %vm1260_vm6, %v1215_v5  ;;  %v3985_v7 = vpop.f32.mrb[7].mxu0  ;;  %v2442_v1 = vsel %vm378_vm0, %v3979_v6, 0.0 }
 0x228   : > { %2641 = vst.msk [vmem:[%s3848_s22 + $0x38] sm:$0xff] %vm378_vm0, %v3979_v6  ;;  %v2440_v11 = vsel %vm378_vm0, %v3985_v7, 0.0  ;;  %2640 = vst.msk [vmem:[%s3848_s22 + $0x30] sm:$0xff] %vm378_vm0, %v3985_v7 }
 0x229   : > { %v2441_v12 = vadd.f32 %v2440_v11, %v2439_v57  ;;  %v1982_v14 = vpop.permute.xlu1 %1981 }
 0x22a   : > { %2056 = vst.msk [vmem:[#allocation3 + $0xb0] sm:$0xff] %vm2033_vm10, %v1982_v14  ;;  %v1984_v27 = vpop.permute.xlu0 %1983 }
 0x22b   : > { %2057 = vst.msk [vmem:[#allocation3 + $0xb8] sm:$0xff] %vm2033_vm10, %v1984_v27  ;;  %v2443_v34 = vadd.f32 %v2442_v1, %v2441_v12 }
 0x22d   : > { %v1406_v40 = vpop.permute.xlu1 %1405 }
 0x22e   : > { %1478 = vst.msk [vmem:[#allocation3 + $0xc0] sm:$0xff] %vm1453_vm7, %v1406_v40  ;;  %v1408_v8 = vpop.permute.xlu0 %1407 }
 0x22f   : > { %1479 = vst.msk [vmem:[#allocation3 + $0xc8] sm:$0xff] %vm1453_vm7, %v1408_v8 }
 0x231   : > { %v831_v17 = vpop.permute.xlu1 %830  ;;  %v2088_v16 = vld [vmem:[#allocation3 + $0xb0] sm:$0xff] }
 0x232   : > { %901 = vst.msk [vmem:[#allocation3 + $0xd0] sm:$0xff] %vm874_vm4, %v831_v17  ;;  %v833_v2 = vpop.permute.xlu0 %832  ;;  %2892 = vmatprep.mubr.msk.f32.mxu1 %vm2107_vm11, %v2088_v16  ;;  %v2089_v41 = vld [vmem:[#allocation3 + $0xb8] sm:$0xff] }
 0x233   : > { %902 = vst.msk [vmem:[#allocation3 + $0xd8] sm:$0xff] %vm874_vm4, %v833_v2  ;;  %2893 = vmatmul.mubr.msk.f32.gmra.mrb[6].mxu1 %vm2107_vm11, %v2089_v41 }
 0x235   : > { %v1600_v37 = vpop.permute.xlu1 %1599 }
 0x236   : > { %1672 = vst.msk [vmem:[#allocation3 + $0xc0] sm:$0xff] %vm1647_vm8, %v1600_v37  ;;  %v1602_v44 = vpop.permute.xlu0 %1601 }
 0x237   : > { %1673 = vst.msk [vmem:[#allocation3 + $0xc8] sm:$0xff] %vm1647_vm8, %v1602_v44 }
 0x239   : > { %v1024_v58 = vpop.permute.xlu1 %1023 }
 0x23a   : > { %1094 = vst.msk [vmem:[#allocation3 + $0xd0] sm:$0xff] %vm1067_vm5, %v1024_v58  ;;  %v1026_v24 = vpop.permute.xlu0 %1025 }
 0x23b   : > { %1095 = vst.msk [vmem:[#allocation3 + $0xd8] sm:$0xff] %vm1067_vm5, %v1026_v24 }
 0x23d   : > { %v1793_v31 = vpop.permute.xlu1 %1792 }
 0x23e   : > { %1865 = vst.msk [vmem:[#allocation3 + $0xc0] sm:$0xff] %vm1840_vm9, %v1793_v31  ;;  %v1795_v19 = vpop.permute.xlu0 %1794 }
 0x23f   : > { %1866 = vst.msk [vmem:[#allocation3 + $0xc8] sm:$0xff] %vm1840_vm9, %v1795_v19 }
 0x241   : > { %v1217_v33 = vpop.permute.xlu1 %1216 }
 0x242   : > { %1287 = vst.msk [vmem:[#allocation3 + $0xd0] sm:$0xff] %vm1260_vm6, %v1217_v33  ;;  %v1219_v38 = vpop.permute.xlu0 %1218  ;;  %v4009_v42 = vpop.f32.mrb[8].mxu0 }
 0x243   : > { %1288 = vst.msk [vmem:[#allocation3 + $0xd8] sm:$0xff] %vm1260_vm6, %v1219_v38  ;;  %v4015_v46 = vpop.f32.mrb[9].mxu0  ;;  %v2446_v47 = vsel %vm378_vm0, %v4009_v42, 0.0 }
 0x244   : > { %2643 = vst.msk [vmem:[%s3848_s22 + $0x48] sm:$0xff] %vm378_vm0, %v4009_v42  ;;  %v2444_v50 = vsel %vm378_vm0, %v4015_v46, 0.0  ;;  %2642 = vst.msk [vmem:[%s3848_s22 + $0x40] sm:$0xff] %vm378_vm0, %v4015_v46 }
 0x245   : > { %v2445_v13 = vadd.f32 %v2444_v50, %v2443_v34  ;;  %v1986_v26 = vpop.permute.xlu1 %1985 }
 0x246   : > { %2058 = vst.msk [vmem:[#allocation3 + $0xc0] sm:$0xff] %vm2033_vm10, %v1986_v26  ;;  %v1988_v29 = vpop.permute.xlu0 %1987 }
 0x247   : > { %2059 = vst.msk [vmem:[#allocation3 + $0xc8] sm:$0xff] %vm2033_vm10, %v1988_v29  ;;  %v2447_v21 = vadd.f32 %v2446_v47, %v2445_v13 }
 0x249   : > { %v1410_v51 = vpop.permute.xlu1 %1409 }
 0x24a   : > { %1480 = vst.msk [vmem:[#allocation3 + $0xd0] sm:$0xff] %vm1453_vm7, %v1410_v51  ;;  %v1412_v48 = vpop.permute.xlu0 %1411 }
 0x24b   : > { %1481 = vst.msk [vmem:[#allocation3 + $0xd8] sm:$0xff] %vm1453_vm7, %v1412_v48 }
 0x24d   : > { %v835_v10 = vpop.permute.xlu1 %834  ;;  %v2090_v39 = vld [vmem:[#allocation3 + $0xc0] sm:$0xff] }
 0x24e   : > { %903 = vst.msk [vmem:[#allocation3 + $0xe0] sm:$0xff] %vm874_vm4, %v835_v10  ;;  %v837_v30 = vpop.permute.xlu0 %836  ;;  %2895 = vmatprep.mubr.msk.f32.mxu1 %vm2107_vm11, %v2090_v39  ;;  %v2091_v45 = vld [vmem:[#allocation3 + $0xc8] sm:$0xff] }
 0x24f   : > { %904 = vst.msk [vmem:[#allocation3 + $0xe8] sm:$0xff] %vm874_vm4, %v837_v30  ;;  %2896 = vmatmul.mubr.msk.f32.gmra.mrb[8].mxu1 %vm2107_vm11, %v2091_v45 }
 0x251   : > { %v1604_v54 = vpop.permute.xlu1 %1603 }
 0x252   : > { %1674 = vst.msk [vmem:[#allocation3 + $0xd0] sm:$0xff] %vm1647_vm8, %v1604_v54  ;;  %v1606_v20 = vpop.permute.xlu0 %1605 }
 0x253   : > { %1675 = vst.msk [vmem:[#allocation3 + $0xd8] sm:$0xff] %vm1647_vm8, %v1606_v20 }
 0x255   : > { %v1028_v57 = vpop.permute.xlu1 %1027 }
 0x256   : > { %1096 = vst.msk [vmem:[#allocation3 + $0xe0] sm:$0xff] %vm1067_vm5, %v1028_v57  ;;  %v1030_v60 = vpop.permute.xlu0 %1029 }
 0x257   : > { %1097 = vst.msk [vmem:[#allocation3 + $0xe8] sm:$0xff] %vm1067_vm5, %v1030_v60 }
 0x259   : > { %v1797_v62 = vpop.permute.xlu1 %1796 }
 0x25a   : > { %1867 = vst.msk [vmem:[#allocation3 + $0xd0] sm:$0xff] %vm1840_vm9, %v1797_v62  ;;  %v1799_v55 = vpop.permute.xlu0 %1798 }
 0x25b   : > { %1868 = vst.msk [vmem:[#allocation3 + $0xd8] sm:$0xff] %vm1840_vm9, %v1799_v55 }
 0x25d   : > { %v1221_v18 = vpop.permute.xlu1 %1220 }
 0x25e   : > { %1289 = vst.msk [vmem:[#allocation3 + $0xe0] sm:$0xff] %vm1260_vm6, %v1221_v18  ;;  %v1223_v23 = vpop.permute.xlu0 %1222  ;;  %v4039_v56 = vpop.f32.mrb[10].mxu0 }
 0x25f   : > { %1290 = vst.msk [vmem:[#allocation3 + $0xe8] sm:$0xff] %vm1260_vm6, %v1223_v23  ;;  %v4045_v28 = vpop.f32.mrb[11].mxu0  ;;  %v2450_v35 = vsel %vm378_vm0, %v4039_v56, 0.0 }
 0x260   : > { %2645 = vst.msk [vmem:[%s3848_s22 + $0x58] sm:$0xff] %vm378_vm0, %v4039_v56  ;;  %v2448_v63 = vsel %vm378_vm0, %v4045_v28, 0.0  ;;  %2644 = vst.msk [vmem:[%s3848_s22 + $0x50] sm:$0xff] %vm378_vm0, %v4045_v28 }
 0x261   : > { %v2449_v0 = vadd.f32 %v2448_v63, %v2447_v21  ;;  %v1990_v3 = vpop.permute.xlu1 %1989 }
 0x262   : > { %2060 = vst.msk [vmem:[#allocation3 + $0xd0] sm:$0xff] %vm2033_vm10, %v1990_v3  ;;  %v1992_v25 = vpop.permute.xlu0 %1991 }
 0x263   : > { %2061 = vst.msk [vmem:[#allocation3 + $0xd8] sm:$0xff] %vm2033_vm10, %v1992_v25  ;;  %v2451_v36 = vadd.f32 %v2450_v35, %v2449_v0 }
 0x265   : > { %v1414_v4 = vpop.permute.xlu1 %1413 }
 0x266   : > { %1482 = vst.msk [vmem:[#allocation3 + $0xe0] sm:$0xff] %vm1453_vm7, %v1414_v4  ;;  %v1416_v43 = vpop.permute.xlu0 %1415 }
 0x267   : > { %1483 = vst.msk [vmem:[#allocation3 + $0xe8] sm:$0xff] %vm1453_vm7, %v1416_v43 }
 0x269   : > { %v839_v49 = vpop.permute.xlu1 %838  ;;  %v2092_v32 = vld [vmem:[#allocation3 + $0xd0] sm:$0xff] }
 0x26a   : > { %905 = vst.msk [vmem:[#allocation3 + $0xf0] sm:$0xff] %vm874_vm4, %v839_v49  ;;  %v841_v9 = vpop.permute.xlu0 %840  ;;  %2898 = vmatprep.mubr.msk.f32.mxu1 %vm2107_vm11, %v2092_v32  ;;  %v2093_v5 = vld [vmem:[#allocation3 + $0xd8] sm:$0xff] }
 0x26b   : > { %906 = vst.msk [vmem:[#allocation3 + $0xf8] sm:$0xff] %vm874_vm4, %v841_v9  ;;  %2899 = vmatmul.mubr.msk.f32.gmra.mrb[10].mxu1 %vm2107_vm11, %v2093_v5 }
 0x26d   : > { %v1608_v1 = vpop.permute.xlu1 %1607 }
 0x26e   : > { %1676 = vst.msk [vmem:[#allocation3 + $0xe0] sm:$0xff] %vm1647_vm8, %v1608_v1  ;;  %v1610_v11 = vpop.permute.xlu0 %1609 }
 0x26f   : > { %1677 = vst.msk [vmem:[#allocation3 + $0xe8] sm:$0xff] %vm1647_vm8, %v1610_v11 }
 0x271   : > { %v1032_v12 = vpop.permute.xlu1 %1031 }
 0x272   : > { %1098 = vst.msk [vmem:[#allocation3 + $0xf0] sm:$0xff] %vm1067_vm5, %v1032_v12  ;;  %v1034_v14 = vpop.permute.xlu0 %1033 }
 0x273   : > { %1099 = vst.msk [vmem:[#allocation3 + $0xf8] sm:$0xff] %vm1067_vm5, %v1034_v14 }
 0x275   : > { %v1801_v27 = vpop.permute.xlu1 %1800 }
 0x276   : > { %1869 = vst.msk [vmem:[#allocation3 + $0xe0] sm:$0xff] %vm1840_vm9, %v1801_v27  ;;  %v1803_v34 = vpop.permute.xlu0 %1802 }
 0x277   : > { %1870 = vst.msk [vmem:[#allocation3 + $0xe8] sm:$0xff] %vm1840_vm9, %v1803_v34 }
 0x279   : > { %v1225_v40 = vpop.permute.xlu1 %1224 }
 0x27a   : > { %1291 = vst.msk [vmem:[#allocation3 + $0xf0] sm:$0xff] %vm1260_vm6, %v1225_v40  ;;  %v1227_v8 = vpop.permute.xlu0 %1226  ;;  %v4069_v17 = vpop.f32.mrb[12].mxu0 }
 0x27b   : > { %1292 = vst.msk [vmem:[#allocation3 + $0xf8] sm:$0xff] %vm1260_vm6, %v1227_v8  ;;  %v4075_v16 = vpop.f32.mrb[13].mxu0  ;;  %v2454_v2 = vsel %vm378_vm0, %v4069_v17, 0.0 }
 0x27c   : > { %2647 = vst.msk [vmem:[%s3848_s22 + $0x68] sm:$0xff] %vm378_vm0, %v4069_v17  ;;  %v2452_v41 = vsel %vm378_vm0, %v4075_v16, 0.0  ;;  %2646 = vst.msk [vmem:[%s3848_s22 + $0x60] sm:$0xff] %vm378_vm0, %v4075_v16 }
 0x27d   : > { %v2453_v37 = vadd.f32 %v2452_v41, %v2451_v36  ;;  %v1994_v44 = vpop.permute.xlu1 %1993 }
 0x27e   : > { %2062 = vst.msk [vmem:[#allocation3 + $0xe0] sm:$0xff] %vm2033_vm10, %v1994_v44  ;;  %v1996_v58 = vpop.permute.xlu0 %1995 }
 0x27f   : > { %2063 = vst.msk [vmem:[#allocation3 + $0xe8] sm:$0xff] %vm2033_vm10, %v1996_v58  ;;  %v2455_v24 = vadd.f32 %v2454_v2, %v2453_v37 }
 0x281   : > { %v1418_v31 = vpop.permute.xlu1 %1417 }
 0x282   : > { %1484 = vst.msk [vmem:[#allocation3 + $0xf0] sm:$0xff] %vm1453_vm7, %v1418_v31  ;;  %v1612_v19 = vpop.permute.xlu0 %1611 }
 0x283   : > { %1678 = vst.msk [vmem:[#allocation3 + $0xf0] sm:$0xff] %vm1647_vm8, %v1612_v19 }
 0x285   : > { %v1420_v33 = vpop.permute.xlu1 %1419  ;;  %v2094_v38 = vld [vmem:[#allocation3 + $0xe0] sm:$0xff] }
 0x286   : > { %1485 = vst.msk [vmem:[#allocation3 + $0xf8] sm:$0xff] %vm1453_vm7, %v1420_v33  ;;  %2901 = vmatprep.mubr.msk.f32.mxu1 %vm2107_vm11, %v2094_v38  ;;  %v2095_v47 = vld [vmem:[#allocation3 + $0xe8] sm:$0xff]  ;;  %v1805_v50 = vpop.permute.xlu0 %1804 }
 0x287   : > { %2902 = vmatmul.mubr.msk.f32.gmra.mrb[12].mxu1 %vm2107_vm11, %v2095_v47  ;;  %1871 = vst.msk [vmem:[#allocation3 + $0xf0] sm:$0xff] %vm1840_vm9, %v1805_v50 }
 0x289   : > { %v1614_v13 = vpop.permute.xlu1 %1613 }
 0x28a   : > { %1679 = vst.msk [vmem:[#allocation3 + $0xf8] sm:$0xff] %vm1647_vm8, %v1614_v13  ;;  %v1998_v26 = vpop.permute.xlu0 %1997 }
 0x28b   : > { %2064 = vst.msk [vmem:[#allocation3 + $0xf0] sm:$0xff] %vm2033_vm10, %v1998_v26 }
 0x28d   : > { %v1807_v29 = vpop.permute.xlu1 %1806 }
 0x28e   : > { %1872 = vst.msk [vmem:[#allocation3 + $0xf8] sm:$0xff] %vm1840_vm9, %v1807_v29 }
 0x291   : > { %v2000_v21 = vpop.permute.xlu1 %1999 }
 0x292   : > { %2065 = vst.msk [vmem:[#allocation3 + $0xf8] sm:$0xff] %vm2033_vm10, %v2000_v21  ;;  %v2096_v51 = vld [vmem:[#allocation3 + $0xf0] sm:$0xff] }
 0x293   : > { %2904 = vmatprep.mubr.msk.f32.mxu1 %vm2107_vm11, %v2096_v51 }
 0x296   : > { %v4097_v48 = vpop.f32.mrb[14].mxu0 }
 0x297   : > { %2649 = vst.msk [vmem:[%s3848_s22 + $0x78] sm:$0xff] %vm378_vm0, %v4097_v48  ;;  %v4102_v10 = vpop.f32.mrb[15].mxu0  ;;  %v2458_v39 = vsel %vm378_vm0, %v4097_v48, 0.0 }
 0x298   : > { %v2456_v30 = vsel %vm378_vm0, %v4102_v10, 0.0  ;;  %2648 = vst.msk [vmem:[%s3848_s22 + $0x70] sm:$0xff] %vm378_vm0, %v4102_v10 }
 0x299   : > { %v2457_v45 = vadd.f32 %v2456_v30, %v2455_v24  ;;  %v2097_v54 = vld [vmem:[#allocation3 + $0xf8] sm:$0xff] }
 0x29a   : > { %2905 = vmatmul.mubr.msk.f32.gmra.mrb[14].mxu1 %vm2107_vm11, %v2097_v54 }
 0x29b   : > { %v2459_v20 = vadd.f32 %v2458_v39, %v2457_v45 }
 0x2b2   : > { %v4112_v57 = vpop.f32.mrb[0].mxu1 }
 0x2b3   : > { %2651 = vst.msk [vmem:[%s3848_s22 + $0x88] sm:$0xff] %vm378_vm0, %v4112_v57  ;;  %v4117_v60 = vpop.f32.mrb[1].mxu1  ;;  %v2462_v62 = vsel %vm378_vm0, %v4112_v57, 0.0 }
 0x2b4   : > { %v2460_v55 = vsel %vm378_vm0, %v4117_v60, 0.0  ;;  %2650 = vst.msk [vmem:[%s3848_s22 + $0x80] sm:$0xff] %vm378_vm0, %v4117_v60 }
 0x2b5   : > { %v2461_v18 = vadd.f32 %v2460_v55, %v2459_v20 }
 0x2b7   : > { %v2463_v23 = vadd.f32 %v2462_v62, %v2461_v18 }
 0x2ce   : > { %v4126_v35 = vpop.f32.mrb[2].mxu1 }
 0x2cf   : > { %2653 = vst.msk [vmem:[%s3848_s22 + $0x98] sm:$0xff] %vm378_vm0, %v4126_v35  ;;  %v4131_v63 = vpop.f32.mrb[3].mxu1  ;;  %v2466_v0 = vsel %vm378_vm0, %v4126_v35, 0.0 }
 0x2d0   : > { %v2464_v3 = vsel %vm378_vm0, %v4131_v63, 0.0  ;;  %2652 = vst.msk [vmem:[%s3848_s22 + $0x90] sm:$0xff] %vm378_vm0, %v4131_v63 }
 0x2d1   : > { %v2465_v25 = vadd.f32 %v2464_v3, %v2463_v23 }
 0x2d3   : > { %v2467_v36 = vadd.f32 %v2466_v0, %v2465_v25 }
 0x2ea   : > { %v4140_v4 = vpop.f32.mrb[4].mxu1 }
 0x2eb   : > { %2655 = vst.msk [vmem:[%s3848_s22 + $0xa8] sm:$0xff] %vm378_vm0, %v4140_v4  ;;  %v4145_v43 = vpop.f32.mrb[5].mxu1  ;;  %v2470_v49 = vsel %vm378_vm0, %v4140_v4, 0.0 }
 0x2ec   : > { %v2468_v32 = vsel %vm378_vm0, %v4145_v43, 0.0  ;;  %2654 = vst.msk [vmem:[%s3848_s22 + $0xa0] sm:$0xff] %vm378_vm0, %v4145_v43 }
 0x2ed   : > { %v2469_v9 = vadd.f32 %v2468_v32, %v2467_v36 }
 0x2ef   : > { %v2471_v5 = vadd.f32 %v2470_v49, %v2469_v9 }
 0x306   : > { %v4154_v1 = vpop.f32.mrb[6].mxu1 }
 0x307   : > { %2657 = vst.msk [vmem:[%s3848_s22 + $0xb8] sm:$0xff] %vm378_vm0, %v4154_v1  ;;  %v4159_v11 = vpop.f32.mrb[7].mxu1  ;;  %v2474_v12 = vsel %vm378_vm0, %v4154_v1, 0.0 }
 0x308   : > { %v2472_v14 = vsel %vm378_vm0, %v4159_v11, 0.0  ;;  %2656 = vst.msk [vmem:[%s3848_s22 + $0xb0] sm:$0xff] %vm378_vm0, %v4159_v11 }
 0x309   : > { %v2473_v27 = vadd.f32 %v2472_v14, %v2471_v5 }
 0x30b   : > { %v2475_v34 = vadd.f32 %v2474_v12, %v2473_v27 }
 0x322   : > { %v4168_v40 = vpop.f32.mrb[8].mxu1 }
 0x323   : > { %2659 = vst.msk [vmem:[%s3848_s22 + $0xc8] sm:$0xff] %vm378_vm0, %v4168_v40  ;;  %v4173_v8 = vpop.f32.mrb[9].mxu1  ;;  %v2478_v2 = vsel %vm378_vm0, %v4168_v40, 0.0 }
 0x324   : > { %v2476_v41 = vsel %vm378_vm0, %v4173_v8, 0.0  ;;  %2658 = vst.msk [vmem:[%s3848_s22 + $0xc0] sm:$0xff] %vm378_vm0, %v4173_v8 }
 0x325   : > { %v2477_v37 = vadd.f32 %v2476_v41, %v2475_v34 }
 0x327   : > { %v2479_v44 = vadd.f32 %v2478_v2, %v2477_v37 }
 0x33e   : > { %v2900_v58 = vpop.f32.mrb[10].mxu1 }
 0x33f   : > { %2661 = vst.msk [vmem:[%s3848_s22 + $0xd8] sm:$0xff] %vm378_vm0, %v2900_v58  ;;  %v2400_v24 = vpop.f32.mrb[11].mxu1  ;;  %v2482_v31 = vsel %vm378_vm0, %v2900_v58, 0.0 }
 0x340   : > { %v2480_v19 = vsel %vm378_vm0, %v2400_v24, 0.0  ;;  %2660 = vst.msk [vmem:[%s3848_s22 + $0xd0] sm:$0xff] %vm378_vm0, %v2400_v24 }
 0x341   : > { %v2481_v33 = vadd.f32 %v2480_v19, %v2479_v44 }
 0x343   : > { %v2483_v38 = vadd.f32 %v2482_v31, %v2481_v33 }
 0x35a   : > { %v2903_v47 = vpop.f32.mrb[12].mxu1 }
 0x35b   : > { %2663 = vst.msk [vmem:[%s3848_s22 + $0xe8] sm:$0xff] %vm378_vm0, %v2903_v47  ;;  %v2410_v50 = vpop.f32.mrb[13].mxu1  ;;  %v2486_v13 = vsel %vm378_vm0, %v2903_v47, 0.0 }
 0x35c   : > { %v2484_v26 = vsel %vm378_vm0, %v2410_v50, 0.0  ;;  %2662 = vst.msk [vmem:[%s3848_s22 + $0xe0] sm:$0xff] %vm378_vm0, %v2410_v50 }
 0x35d   : > { %v2485_v29 = vadd.f32 %v2484_v26, %v2483_v38 }
 0x35f   : > { %v2487_v21 = vadd.f32 %v2486_v13, %v2485_v29 }
 0x36d   : > { %v2906_v51 = vpop.f32.mrb[14].mxu1 }
 0x36e   : > { %2665 = vst.msk [vmem:[%s3848_s22 + $0xf8] sm:$0xff] %vm378_vm0, %v2906_v51  ;;  %v2420_v39 = vpop.f32.mrb[15].mxu1  ;;  %v2490_v54 = vsel %vm378_vm0, %v2906_v51, 0.0 }
 0x36f   : > { %v2488_v30 = vsel %vm378_vm0, %v2420_v39, 0.0  ;;  %2664 = vst.msk [vmem:[%s3848_s22 + $0xf0] sm:$0xff] %vm378_vm0, %v2420_v39 }
 0x370   : > { %v2489_v45 = vadd.f32 %v2488_v30, %v2487_v21 }
 0x372   : > { %v2491_v20 = vadd.f32 %v2490_v54, %v2489_v45 }
 0x374   : > { %v2492_v62 = vrot.slane %v2491_v20, 4 }
 0x376   : > { %v2493_v55 = vadd.f32 %v2492_v62, %v2491_v20 }
 0x378   : > { %v2494_v18 = vrot.slane %v2493_v55, 2 }
 0x37a   : > { %v2495_v23 = vadd.f32 %v2494_v18, %v2493_v55 }
 0x37c   : > { %v2496_v0 = vrot.slane %v2495_v23, 1 }
 0x37e   : > { %v2497_v3 = vadd.f32 %v2496_v0, %v2495_v23 }
 0x380   : > { %v2498_v25 = vmul.f32 0.00390625, %v2497_v3  ;;  %2632 = vst.msk [vmem:[%s4204_s7] sm:$0x1] %vm387_vm1, %v2497_v3 }
 0x382   : > { %v2499_v36 = vsub.f32 %v3861_v61, %v2498_v25  ;;  %v2500_v49 = vsub.f32 %v3853_v59, %v2498_v25  ;;  %v2501_v32 = vsub.f32 %v3902_v22, %v2498_v25  ;;  %v2502_v9 = vsub.f32 %v3895_v15, %v2498_v25 }
 0x383   : > { %v2503_v5 = vsub.f32 %v3946_v53, %v2498_v25  ;;  %v2504_v12 = vsub.f32 %v3939_v52, %v2498_v25  ;;  %v2505_v14 = vsub.f32 %v3985_v7, %v2498_v25  ;;  %v2506_v27 = vsub.f32 %v3979_v6, %v2498_v25 }
 0x384   : > { %v2507_v34 = vsub.f32 %v4015_v46, %v2498_v25  ;;  %v2508_v2 = vsub.f32 %v4009_v42, %v2498_v25  ;;  %v2509_v61 = vsub.f32 %v4045_v28, %v2498_v25  ;;  %v2510_v59 = vsub.f32 %v4039_v56, %v2498_v25 }
 0x385   : > { %v2511_v22 = vsub.f32 %v4075_v16, %v2498_v25  ;;  %v2512_v15 = vsub.f32 %v4069_v17, %v2498_v25  ;;  %v2513_v53 = vsub.f32 %v4102_v10, %v2498_v25  ;;  %v2514_v52 = vsub.f32 %v4097_v48, %v2498_v25 }
 0x386   : > { %v2515_v7 = vsub.f32 %v4117_v60, %v2498_v25  ;;  %v2516_v6 = vsub.f32 %v4112_v57, %v2498_v25  ;;  %v4227_v46 = vsub.f32 %v4131_v63, %v2498_v25  ;;  %v4230_v42 = vsub.f32 %v4126_v35, %v2498_v25 }
 0x387   : > { %v4233_v56 = vsub.f32 %v4145_v43, %v2498_v25  ;;  %v4236_v28 = vsub.f32 %v4140_v4, %v2498_v25  ;;  %v4239_v17 = vsub.f32 %v4159_v11, %v2498_v25  ;;  %v4242_v16 = vsub.f32 %v4154_v1, %v2498_v25 }
 0x388   : > { %v4245_v48 = vsub.f32 %v4173_v8, %v2498_v25  ;;  %v4248_v10 = vsub.f32 %v4168_v40, %v2498_v25  ;;  %v4250_v57 = vsub.f32 %v2400_v24, %v2498_v25  ;;  %v4252_v60 = vsub.f32 %v2900_v58, %v2498_v25 }
 0x389   : > { %v4254_v35 = vsub.f32 %v2410_v50, %v2498_v25  ;;  %v4256_v63 = vsub.f32 %v2903_v47, %v2498_v25  ;;  %v4258_v4 = vsub.f32 %v2420_v39, %v2498_v25  ;;  %v4260_v43 = vsub.f32 %v2906_v51, %v2498_v25 }
 0x38a   : > { %v2531_v1 = vmul.f32 %v2499_v36, %v2499_v36  ;;  %v2532_v11 = vmul.f32 %v2500_v49, %v2500_v49  ;;  %v2533_v41 = vmul.f32 %v2501_v32, %v2501_v32  ;;  %v2534_v8 = vmul.f32 %v2502_v9, %v2502_v9 }
 0x38b   : > { %v2535_v24 = vmul.f32 %v2503_v5, %v2503_v5  ;;  %v2536_v19 = vmul.f32 %v2504_v12, %v2504_v12  ;;  %v2537_v47 = vmul.f32 %v2505_v14, %v2505_v14  ;;  %v2538_v26 = vmul.f32 %v2506_v27, %v2506_v27 }
 0x38c   : > { %v2563_v37 = vsel %vm378_vm0, %v2531_v1, 0.0  ;;  %v2564_v40 = vsel %vm378_vm0, %v2532_v11, 0.0  ;;  %v2566_v58 = vsel %vm378_vm0, %v2533_v41, 0.0  ;;  %v2568_v33 = vsel %vm378_vm0, %v2534_v8, 0.0 }
 0x38d   : > { %v2565_v44 = vadd.f32 %v2564_v40, %v2563_v37  ;;  %v2570_v50 = vsel %vm378_vm0, %v2535_v24, 0.0  ;;  %v2572_v29 = vsel %vm378_vm0, %v2536_v19, 0.0  ;;  %v2539_v51 = vmul.f32 %v2507_v34, %v2507_v34 }
 0x38e   : > { %v2574_v39 = vsel %vm378_vm0, %v2537_v47, 0.0  ;;  %v2540_v45 = vmul.f32 %v2508_v2, %v2508_v2  ;;  %v2576_v54 = vsel %vm378_vm0, %v2538_v26, 0.0  ;;  %v2541_v62 = vmul.f32 %v2509_v61, %v2509_v61 }
 0x38f   : > { %v2567_v31 = vadd.f32 %v2566_v58, %v2565_v44  ;;  %v2578_v55 = vsel %vm378_vm0, %v2539_v51, 0.0  ;;  %v2542_v23 = vmul.f32 %v2510_v59, %v2510_v59  ;;  %v2543_v25 = vmul.f32 %v2511_v22, %v2511_v22 }
 0x390   : > { %v2580_v0 = vsel %vm378_vm0, %v2540_v45, 0.0  ;;  %v2582_v36 = vsel %vm378_vm0, %v2541_v62, 0.0  ;;  %v2544_v32 = vmul.f32 %v2512_v15, %v2512_v15  ;;  %v2545_v12 = vmul.f32 %v2513_v53, %v2513_v53 }
 0x391   : > { %v2569_v38 = vadd.f32 %v2568_v33, %v2567_v31  ;;  %v2584_v9 = vsel %vm378_vm0, %v2542_v23, 0.0  ;;  %v2586_v14 = vsel %vm378_vm0, %v2543_v25, 0.0  ;;  %v2546_v34 = vmul.f32 %v2514_v52, %v2514_v52 }
 0x392   : > { %v2588_v2 = vsel %vm378_vm0, %v2544_v32, 0.0  ;;  %v2547_v59 = vmul.f32 %v2515_v7, %v2515_v7  ;;  %v2590_v1 = vsel %vm378_vm0, %v2545_v12, 0.0  ;;  %v2548_v22 = vmul.f32 %v2516_v6, %v2516_v6 }
 0x393   : > { %v2571_v13 = vadd.f32 %v2570_v50, %v2569_v38  ;;  %v2592_v41 = vsel %vm378_vm0, %v2546_v34, 0.0  ;;  %v2549_v15 = vmul.f32 %v4227_v46, %v4227_v46  ;;  %v2550_v52 = vmul.f32 %v4230_v42, %v4230_v42 }
 0x394   : > { %v2594_v53 = vsel %vm378_vm0, %v2547_v59, 0.0  ;;  %v2596_v40 = vsel %vm378_vm0, %v2548_v22, 0.0  ;;  %v2551_v7 = vmul.f32 %v4233_v56, %v4233_v56  ;;  %v2552_v58 = vmul.f32 %v4236_v28, %v4236_v28 }
 0x395   : > { %v2573_v21 = vadd.f32 %v2572_v29, %v2571_v13  ;;  %v2598_v6 = vsel %vm378_vm0, %v2549_v15, 0.0  ;;  %v2600_v46 = vsel %vm378_vm0, %v2550_v52, 0.0  ;;  %v2553_v19 = vmul.f32 %v4239_v17, %v4239_v17 }
 0x396   : > { %v2602_v42 = vsel %vm378_vm0, %v2551_v7, 0.0  ;;  %v2554_v38 = vmul.f32 %v4242_v16, %v4242_v16  ;;  %v2604_v56 = vsel %vm378_vm0, %v2552_v58, 0.0  ;;  %v2555_v50 = vmul.f32 %v4245_v48, %v4245_v48 }
 0x397   : > { %v2575_v30 = vadd.f32 %v2574_v39, %v2573_v21  ;;  %v2606_v28 = vsel %vm378_vm0, %v2553_v19, 0.0  ;;  %v2556_v26 = vmul.f32 %v4248_v10, %v4248_v10  ;;  %v2557_v21 = vmul.f32 %v4250_v57, %v4250_v57 }
 0x398   : > { %v2608_v17 = vsel %vm378_vm0, %v2554_v38, 0.0  ;;  %v2610_v16 = vsel %vm378_vm0, %v2555_v50, 0.0  ;;  %v2558_v39 = vmul.f32 %v4252_v60, %v4252_v60  ;;  %v2559_v45 = vmul.f32 %v4254_v35, %v4254_v35 }
 0x399   : > { %v2577_v20 = vadd.f32 %v2576_v54, %v2575_v30  ;;  %v2612_v48 = vsel %vm378_vm0, %v2556_v26, 0.0  ;;  %v2614_v10 = vsel %vm378_vm0, %v2557_v21, 0.0  ;;  %v2562_v23 = vmul.f32 %v4260_v43, %v4260_v43 }
 0x39a   : > { %v2616_v57 = vsel %vm378_vm0, %v2558_v39, 0.0  ;;  %v2618_v60 = vsel %vm378_vm0, %v2559_v45, 0.0 }
 0x39b   : > { %v2579_v18 = vadd.f32 %v2578_v55, %v2577_v20  ;;  %v2560_v20 = vmul.f32 %v4256_v63, %v4256_v63  ;;  %v2561_v55 = vmul.f32 %v4258_v4, %v4258_v4  ;;  %v2624_v63 = vsel %vm378_vm0, %v2562_v23, 0.0 }
 0x39d   : > { %v2581_v3 = vadd.f32 %v2580_v0, %v2579_v18  ;;  %v2620_v35 = vsel %vm378_vm0, %v2560_v20, 0.0 }
 0x39f   : > { %v2583_v49 = vadd.f32 %v2582_v36, %v2581_v3  ;;  %v2622_v3 = vsel %vm378_vm0, %v2561_v55, 0.0 }
 0x3a1   : > { %v2585_v5 = vadd.f32 %v2584_v9, %v2583_v49 }
 0x3a3   : > { %v2587_v27 = vadd.f32 %v2586_v14, %v2585_v5 }
 0x3a5   : > { %v2589_v61 = vadd.f32 %v2588_v2, %v2587_v27 }
 0x3a7   : > { %v2591_v11 = vadd.f32 %v2590_v1, %v2589_v61 }
 0x3a9   : > { %v2593_v8 = vadd.f32 %v2592_v41, %v2591_v11 }
 0x3ab   : > { %v2595_v37 = vadd.f32 %v2594_v53, %v2593_v8 }
 0x3ad   : > { %v2597_v44 = vadd.f32 %v2596_v40, %v2595_v37 }
 0x3af   : > { %v2599_v24 = vadd.f32 %v2598_v6, %v2597_v44 }
 0x3b1   : > { %v2601_v31 = vadd.f32 %v2600_v46, %v2599_v24 }
 0x3b3   : > { %v2603_v33 = vadd.f32 %v2602_v42, %v2601_v31 }
 0x3b5   : > { %v2605_v47 = vadd.f32 %v2604_v56, %v2603_v33 }
 0x3b7   : > { %v2607_v13 = vadd.f32 %v2606_v28, %v2605_v47 }
 0x3b9   : > { %v2609_v29 = vadd.f32 %v2608_v17, %v2607_v13 }
 0x3bb   : > { %v2611_v51 = vadd.f32 %v2610_v16, %v2609_v29 }
 0x3bd   : > { %v2613_v30 = vadd.f32 %v2612_v48, %v2611_v51 }
 0x3bf   : > { %v2615_v54 = vadd.f32 %v2614_v10, %v2613_v30 }
 0x3c1   : > { %v2617_v62 = vadd.f32 %v2616_v57, %v2615_v54 }
 0x3c3   : > { %v2619_v18 = vadd.f32 %v2618_v60, %v2617_v62 }
 0x3c5   : > { %v2621_v0 = vadd.f32 %v2620_v35, %v2619_v18 }
 0x3c7   : > { %v2623_v25 = vadd.f32 %v2622_v3, %v2621_v0 }
 0x3c9   : > { %v2625_v36 = vadd.f32 %v2624_v63, %v2623_v25 }
 0x3cb   : > { %v2626_v49 = vrot.slane %v2625_v36, 4 }
 0x3cd   : > { %v2627_v32 = vadd.f32 %v2626_v49, %v2625_v36 }
 0x3cf   : > { %v2628_v9 = vrot.slane %v2627_v32, 2 }
 0x3d1   : > { %v2629_v4 = vadd.f32 %v2628_v9, %v2627_v32 }
 0x3d3   : > { %v2630_v5 = vrot.slane %v2629_v4, 1 }
 0x3d5   : > { %v2631_v12 = vadd.f32 %v2630_v5, %v2629_v4 }
 0x3d7   : > { %2633 = vst.msk [vmem:[%s4204_s7 + $0x1] sm:$0x1] %vm387_vm1, %v2631_v12 }
 0x3d8 PF: > { %s16_s18 = sadd.s32 1, %s2958_s18  }
 0x3d9   : > { %p13_p4 = scmp.ge.s32.totalorder %s16_s18, 4  }
 0x3db   :  { %15 = sbr.rel (!%p13_p4) target bundleno = 1 (0x1), region = 81 }

// kernel: basic_block.3
= control target key start
LH: loop header
LB: loop body
LE: loop exit
PB: predicated region body
PF: predicated region fallthrough
CT: control target
= control target key end

     0   :  { %s2821_s12 = smov 0   ;;  %s4082_s0 = inlined_call_operand.vmem [shape: f32[2,16,16,8], index: 0, kind: input, shape index: {}]   ;;  %s4083_s1 = inlined_call_operand.vmem [shape: f32[72,8], index: 1, kind: input, shape index: {}]   ;;  %s4084_s2 = inlined_call_operand.vmem [shape: f32[2,16,16,8], index: 2, kind: output, shape index: {0}]   ;;  %s4085_s3 = inlined_call_operand.vmem [shape: f32[2,2,8], index: 3, kind: output, shape index: {1}]  }
   0x1 LB: > { %s2588_s13 = sadd.s32 4294967295, %s2790_s12   ;;  %p2592_p0 = scmp.ge.s32.totalorder %s2790_s12, 1  ;;  %s2790_s12 = sphi %s2821_s12, %s14_s12  }
   0x2   : > { %p140_p1 = scmp.lt.s32.totalorder %s2790_s12, 3 }
   0x4   : > { %p141_p2 = pnand %p2592_p0, %p140_p1 }
   0x5   : > { %vm182_vm0 = vcmask (!%p141_p2), 64512   ;;  %vm191_vm1 = vcmask (!%p141_p2), 57344   ;;  %vm185_vm2 = vcmask (!%p141_p2), 58368   ;;  %p2831_p3 = scmp.lt.s32.totalorder (!%p141_p2), %s2588_s13, 1  ;;  %v2792_v0 = vmov (!%p141_p2), 0.0   ;;  %s2793_s19 = smov (!%p141_p2), 8  }
   0x6   : > { %144 = sbr.rel (%p141_p2) target bundleno = 984 (0x3d8), region = 28  ;;  %183 = vst.msk [vmem:[#allocation2] sm:$0xff] (!%p141_p2), %vm182_vm0, %v2792_v0  ;;  %184 = vst.msk [vmem:[#allocation2 + $0x8] sm:$0xff] (!%p141_p2), %vm182_vm0, %v2792_v0  ;;  %s2794_s20 = smov (!%p141_p2), 16   ;;  %vm517_vm3 = vcmask (!%p141_p2), 130112   ;;  %vm710_vm4 = vcmask (!%p141_p2), 195712  }
   0x7   : > { %188 = vst.msk [vmem:[#allocation2 + $0x198] sm:$0xff] (!%p141_p2), %vm182_vm0, %v2792_v0  ;;  %189 = vst.msk [vmem:[#allocation2 + $0x1a0] sm:$0xff] (!%p141_p2), %vm182_vm0, %v2792_v0  ;;  %s2795_s21 = smov (!%p141_p2), 24   ;;  %s2796_s22 = smov (!%p141_p2), 32   ;;  %vm903_vm5 = vcmask (!%p141_p2), 261312   ;;  %vm1096_vm6 = vcmask (!%p141_p2), 326912  }
   0x8   : > { %193 = vst.msk [vmem:[#allocation2 + $0x18] sm:$0x1] (!%p141_p2), %vm191_vm1, %v2792_v0  ;;  %194 = vst.msk [vmem:[#allocation2 + $0x30] sm:$0x1] (!%p141_p2), %vm191_vm1, %v2792_v0  ;;  %s2797_s23 = smov (!%p141_p2), 40   ;;  %s2798_s28 = smov (!%p141_p2), 48  }
   0x9   : > { %195 = vst.msk [vmem:[#allocation2 + $0x48] sm:$0x1] (!%p141_p2), %vm191_vm1, %v2792_v0  ;;  %196 = vst.msk [vmem:[#allocation2 + $0x60] sm:$0x1] (!%p141_p2), %vm191_vm1, %v2792_v0  ;;  %s2799_s10 = smov (!%p141_p2), 56   ;;  %s2800_s25 = smov (!%p141_p2), 64  }
   0xa   : > { %197 = vst.msk [vmem:[#allocation2 + $0x78] sm:$0x1] (!%p141_p2), %vm191_vm1, %v2792_v0  ;;  %198 = vst.msk [vmem:[#allocation2 + $0x90] sm:$0x1] (!%p141_p2), %vm191_vm1, %v2792_v0  ;;  %vm1289_vm7 = vcmask (!%p141_p2), 392512   ;;  %vm1483_vm8 = vcmask (!%p141_p2), 458112  }
   0xb   : > { %199 = vst.msk [vmem:[#allocation2 + $0xa8] sm:$0x1] (!%p141_p2), %vm191_vm1, %v2792_v0  ;;  %200 = vst.msk [vmem:[#allocation2 + $0xc0] sm:$0x1] (!%p141_p2), %vm191_vm1, %v2792_v0  ;;  %vm1676_vm9 = vcmask (!%p141_p2), 523712   ;;  %vm1869_vm10 = vcmask (!%p141_p2), 589312  }
   0xc   : > { %201 = vst.msk [vmem:[#allocation2 + $0xd8] sm:$0x1] (!%p141_p2), %vm191_vm1, %v2792_v0  ;;  %202 = vst.msk [vmem:[#allocation2 + $0xf0] sm:$0x1] (!%p141_p2), %vm191_vm1, %v2792_v0  ;;  %vm1943_vm11 = vcmask (!%p141_p2), 588800  }
   0xd   : > { %203 = vst.msk [vmem:[#allocation2 + $0x108] sm:$0x1] %vm191_vm1, %v2792_v0  ;;  %204 = vst.msk [vmem:[#allocation2 + $0x120] sm:$0x1] %vm191_vm1, %v2792_v0  ;;  %s4088_s13 = smov (!%p2831_p3, %s2588_s13), 1  ;;  %v357_v7 = vld [vmem:[#allocation2 + $0x1] sm:$0xff] }
   0xe   : > { %205 = vst.msk [vmem:[#allocation2 + $0x138] sm:$0x1] %vm191_vm1, %v2792_v0  ;;  %206 = vst.msk [vmem:[#allocation2 + $0x150] sm:$0x1] %vm191_vm1, %v2792_v0  ;;  %s2632_s15 = sshll.u32 %s4088_s13, 8  ;;  %421 = vrot.lane.b32.xlu0 %v357_v7, %s2793_s19  ;;  %v294_v49 = vld [vmem:[#allocation2 + $0x8] sm:$0xff] }
   0xf   : > { %207 = vst.msk [vmem:[#allocation2 + $0x168] sm:$0x1] %vm191_vm1, %v2792_v0  ;;  %208 = vst.msk [vmem:[#allocation2 + $0x180] sm:$0x1] %vm191_vm1, %v2792_v0  ;;  %s2889_s18 = scalar_lea.vmem %s4082_s0, %s2632_s15  ;;  %s3603_s27 = scalar_lea.vmem %s4084_s2, %s2632_s15 }
  0x10   : > { %211 = vst.msk [vmem:[#allocation2 + $0x29] sm:$0x1] %vm191_vm1, %v2792_v0  ;;  %212 = vst.msk [vmem:[#allocation2 + $0x41] sm:$0x1] %vm191_vm1, %v2792_v0  ;;  %v228_v1 = vld [vmem:[%s2889_s18] sm:$0xff]  ;;  %v230_v2 = vld [vmem:[%s2889_s18 + $0x10] sm:$0xff] }
  0x11   : > { %213 = vst.msk [vmem:[#allocation2 + $0x59] sm:$0x1] %vm191_vm1, %v2792_v0  ;;  %214 = vst.msk [vmem:[#allocation2 + $0x71] sm:$0x1] %vm191_vm1, %v2792_v0  ;;  %v229_v3 = vld [vmem:[%s2889_s18 + $0x8] sm:$0xff]  ;;  %v232_v4 = vld [vmem:[%s2889_s18 + $0x20] sm:$0xff] }
  0x12   : > { %215 = vst.msk [vmem:[#allocation2 + $0x89] sm:$0x1] %vm191_vm1, %v2792_v0  ;;  %216 = vst.msk [vmem:[#allocation2 + $0xa1] sm:$0x1] %vm191_vm1, %v2792_v0  ;;  %v231_v5 = vld [vmem:[%s2889_s18 + $0x18] sm:$0xff]  ;;  %v234_v6 = vld [vmem:[%s2889_s18 + $0x30] sm:$0xff] }
  0x13   : > { %217 = vst.msk [vmem:[#allocation2 + $0xb9] sm:$0x1] %vm191_vm1, %v2792_v0  ;;  %218 = vst.msk [vmem:[#allocation2 + $0xd1] sm:$0x1] %vm191_vm1, %v2792_v0  ;;  %v233_v9 = vld [vmem:[%s2889_s18 + $0x28] sm:$0xff]  ;;  %v236_v10 = vld [vmem:[%s2889_s18 + $0x40] sm:$0xff] }
  0x14   : > { %219 = vst.msk [vmem:[#allocation2 + $0xe9] sm:$0x1] %vm191_vm1, %v2792_v0  ;;  %220 = vst.msk [vmem:[#allocation2 + $0x101] sm:$0x1] %vm191_vm1, %v2792_v0  ;;  %v235_v11 = vld [vmem:[%s2889_s18 + $0x38] sm:$0xff]  ;;  %v238_v12 = vld [vmem:[%s2889_s18 + $0x50] sm:$0xff] }
  0x15   : > { %221 = vst.msk [vmem:[#allocation2 + $0x119] sm:$0x1] %vm191_vm1, %v2792_v0  ;;  %222 = vst.msk [vmem:[#allocation2 + $0x131] sm:$0x1] %vm191_vm1, %v2792_v0  ;;  %v237_v13 = vld [vmem:[%s2889_s18 + $0x48] sm:$0xff]  ;;  %v240_v14 = vld [vmem:[%s2889_s18 + $0x60] sm:$0xff] }
  0x16   : > { %223 = vst.msk [vmem:[#allocation2 + $0x149] sm:$0x1] %vm191_vm1, %v2792_v0  ;;  %224 = vst.msk [vmem:[#allocation2 + $0x161] sm:$0x1] %vm191_vm1, %v2792_v0  ;;  %v239_v15 = vld [vmem:[%s2889_s18 + $0x58] sm:$0xff]  ;;  %v242_v16 = vld [vmem:[%s2889_s18 + $0x70] sm:$0xff] }
  0x17   : > { %225 = vst.msk [vmem:[#allocation2 + $0x179] sm:$0x1] %vm191_vm1, %v2792_v0  ;;  %226 = vst.msk [vmem:[#allocation2 + $0x191] sm:$0x1] %vm191_vm1, %v2792_v0  ;;  %v241_v17 = vld [vmem:[%s2889_s18 + $0x68] sm:$0xff]  ;;  %v244_v18 = vld [vmem:[%s2889_s18 + $0x80] sm:$0xff] }
  0x18   : > { %186 = vst.msk [vmem:[#allocation2 + $0x10] sm:$0x3] %vm185_vm2, %v2792_v0  ;;  %190 = vst.msk [vmem:[#allocation2 + $0x1a8] sm:$0x3] %vm185_vm2, %v2792_v0  ;;  %v243_v19 = vld [vmem:[%s2889_s18 + $0x78] sm:$0xff]  ;;  %v246_v20 = vld [vmem:[%s2889_s18 + $0x90] sm:$0xff] }
  0x19   : > { %192 = vst.msk [vmem:[#allocation2] sm:$0x1] %vm191_vm1, %v2792_v0  ;;  %209 = vst.msk [vmem:[#allocation2 + $0x198] sm:$0x1] %vm191_vm1, %v2792_v0  ;;  %v245_v21 = vld [vmem:[%s2889_s18 + $0x88] sm:$0xff]  ;;  %v248_v22 = vld [vmem:[%s2889_s18 + $0xa0] sm:$0xff] }
  0x1a   : > { %210 = vst.msk [vmem:[#allocation2 + $0x11] sm:$0x1] %vm191_vm1, %v2792_v0  ;;  %227 = vst.msk [vmem:[#allocation2 + $0x1a9] sm:$0x1] %vm191_vm1, %v2792_v0  ;;  %v247_v23 = vld [vmem:[%s2889_s18 + $0x98] sm:$0xff]  ;;  %v250_v24 = vld [vmem:[%s2889_s18 + $0xb0] sm:$0xff] }
  0x1b   : > { %261 = vst.msk [vmem:[#allocation2 + $0x19] sm:$0xff] %vm182_vm0, %v228_v1  ;;  %263 = vst.msk [vmem:[#allocation2 + $0x31] sm:$0xff] %vm182_vm0, %v230_v2  ;;  %v249_v28 = vld [vmem:[%s2889_s18 + $0xa8] sm:$0xff]  ;;  %v252_v29 = vld [vmem:[%s2889_s18 + $0xc0] sm:$0xff]  ;;  %s2597_s15 = sshll.u32 %s4088_s13, 1 }
  0x1c   : > { %262 = vst.msk [vmem:[#allocation2 + $0x21] sm:$0xff] %vm182_vm0, %v229_v3  ;;  %265 = vst.msk [vmem:[#allocation2 + $0x49] sm:$0xff] %vm182_vm0, %v232_v4  ;;  %v251_v33 = vld [vmem:[%s2889_s18 + $0xb8] sm:$0xff]  ;;  %v254_v34 = vld [vmem:[%s2889_s18 + $0xd0] sm:$0xff] }
  0x1d   : > { %264 = vst.msk [vmem:[#allocation2 + $0x39] sm:$0xff] %vm182_vm0, %v231_v5  ;;  %267 = vst.msk [vmem:[#allocation2 + $0x61] sm:$0xff] %vm182_vm0, %v234_v6  ;;  %v253_v35 = vld [vmem:[%s2889_s18 + $0xc8] sm:$0xff]  ;;  %v256_v36 = vld [vmem:[%s2889_s18 + $0xe0] sm:$0xff] }
  0x1e   : > { %266 = vst.msk [vmem:[#allocation2 + $0x51] sm:$0xff] %vm182_vm0, %v233_v9  ;;  %269 = vst.msk [vmem:[#allocation2 + $0x79] sm:$0xff] %vm182_vm0, %v236_v10  ;;  %v255_v37 = vld [vmem:[%s2889_s18 + $0xd8] sm:$0xff]  ;;  %v257_v39 = vld [vmem:[%s2889_s18 + $0xe8] sm:$0xff] }
  0x1f   : > { %v358_v8 = vld [vmem:[#allocation2 + $0x9] sm:$0xff]  ;;  %268 = vst.msk [vmem:[#allocation2 + $0x69] sm:$0xff] %vm182_vm0, %v235_v11  ;;  %271 = vst.msk [vmem:[#allocation2 + $0x91] sm:$0xff] %vm182_vm0, %v238_v12 }
  0x20   : > { %270 = vst.msk [vmem:[#allocation2 + $0x81] sm:$0xff] %vm182_vm0, %v237_v13  ;;  %273 = vst.msk [vmem:[#allocation2 + $0xa9] sm:$0xff] %vm182_vm0, %v240_v14  ;;  %423 = vrot.lane.b32.xlu0 %v358_v8, %s2793_s19  ;;  %v293_v46 = vld [vmem:[#allocation2] sm:$0xff] }
  0x21   : > { %272 = vst.msk [vmem:[#allocation2 + $0x99] sm:$0xff] %vm182_vm0, %v239_v15  ;;  %275 = vst.msk [vmem:[#allocation2 + $0xc1] sm:$0xff] %vm182_vm0, %v242_v16 }
  0x22   : > { %274 = vst.msk [vmem:[#allocation2 + $0xb1] sm:$0xff] %vm182_vm0, %v241_v17  ;;  %277 = vst.msk [vmem:[#allocation2 + $0xd9] sm:$0xff] %vm182_vm0, %v244_v18  ;;  %v2934_v25 = vld [vmem:[#allocation2 + $0x19] sm:$0xff]  ;;  %v2936_v26 = vld [vmem:[#allocation2 + $0x31] sm:$0xff] }
  0x23   : > { %276 = vst.msk [vmem:[#allocation2 + $0xc9] sm:$0xff] %vm182_vm0, %v243_v19  ;;  %279 = vst.msk [vmem:[#allocation2 + $0xf1] sm:$0xff] %vm182_vm0, %v246_v20  ;;  %425 = vrot.lane.b32.xlu1 %v2934_v25, %s2793_s19  ;;  %v2943_v27 = vld [vmem:[#allocation2 + $0x21] sm:$0xff]  ;;  %v2951_v30 = vld [vmem:[#allocation2 + $0x49] sm:$0xff] }
  0x24   : > { %278 = vst.msk [vmem:[#allocation2 + $0xe1] sm:$0xff] %vm182_vm0, %v245_v21  ;;  %281 = vst.msk [vmem:[#allocation2 + $0x109] sm:$0xff] %vm182_vm0, %v248_v22  ;;  %429 = vrot.lane.b32.xlu0 %v2936_v26, %s2793_s19  ;;  %v2955_v31 = vld [vmem:[#allocation2 + $0x39] sm:$0xff]  ;;  %v2959_v32 = vld [vmem:[#allocation2 + $0x61] sm:$0xff] }
  0x25   : > { %280 = vst.msk [vmem:[#allocation2 + $0xf9] sm:$0xff] %vm182_vm0, %v247_v23  ;;  %283 = vst.msk [vmem:[#allocation2 + $0x121] sm:$0xff] %vm182_vm0, %v250_v24  ;;  %v2971_v38 = vld [vmem:[#allocation2 + $0x51] sm:$0xff]  ;;  %v2979_v40 = vld [vmem:[#allocation2 + $0x20] sm:$0xff] }
  0x26   : > { %282 = vst.msk [vmem:[#allocation2 + $0x111] sm:$0xff] %vm182_vm0, %v249_v28  ;;  %285 = vst.msk [vmem:[#allocation2 + $0x139] sm:$0xff] %vm182_vm0, %v252_v29  ;;  %v2981_v41 = vld [vmem:[#allocation2 + $0x79] sm:$0xff]  ;;  %v2985_v43 = vld [vmem:[#allocation2 + $0x30] sm:$0xff] }
  0x27   : > { %427 = vrot.lane.b32.xlu1 %v2943_v27, %s2793_s19  ;;  %284 = vst.msk [vmem:[#allocation2 + $0x129] sm:$0xff] %vm182_vm0, %v251_v33  ;;  %287 = vst.msk [vmem:[#allocation2 + $0x151] sm:$0xff] %vm182_vm0, %v254_v34  ;;  %v2983_v42 = vld [vmem:[#allocation2 + $0x18] sm:$0xff]  ;;  %v2991_v44 = vld [vmem:[#allocation2 + $0x69] sm:$0xff] }
  0x28   : > { %433 = vrot.lane.b32.xlu0 %v2951_v30, %s2793_s19  ;;  %286 = vst.msk [vmem:[#allocation2 + $0x141] sm:$0xff] %vm182_vm0, %v253_v35  ;;  %289 = vst.msk [vmem:[#allocation2 + $0x169] sm:$0xff] %vm182_vm0, %v256_v36  ;;  %v2993_v45 = vld [vmem:[#allocation2 + $0x38] sm:$0xff]  ;;  %v2999_v47 = vld [vmem:[#allocation2 + $0x48] sm:$0xff] }
  0x29   : > { %288 = vst.msk [vmem:[#allocation2 + $0x159] sm:$0xff] %vm182_vm0, %v255_v37  ;;  %290 = vst.msk [vmem:[#allocation2 + $0x171] sm:$0xff] %vm182_vm0, %v257_v39  ;;  %v3001_v48 = vld [vmem:[#allocation2 + $0x50] sm:$0xff]  ;;  %v3010_v50 = vld [vmem:[#allocation2 + $0x60] sm:$0xff] }
  0x2a   : > { %328 = vst.msk [vmem:[#allocation3 + $0x18] sm:$0xff] %vm182_vm0, %v2979_v40  ;;  %327 = vst.msk [vmem:[#allocation3 + $0x10] sm:$0xff] %vm182_vm0, %v2983_v42  ;;  %v3014_v51 = vld [vmem:[#allocation2 + $0x91] sm:$0xff]  ;;  %v3021_v52 = vld [vmem:[#allocation2 + $0x81] sm:$0xff] }
  0x2b   : > { %431 = vrot.lane.b32.xlu1 %v2955_v31, %s2793_s19  ;;  %329 = vst.msk [vmem:[#allocation3 + $0x20] sm:$0xff] %vm182_vm0, %v2985_v43  ;;  %330 = vst.msk [vmem:[#allocation3 + $0x28] sm:$0xff] %vm182_vm0, %v2993_v45  ;;  %v3023_v53 = vld [vmem:[#allocation2 + $0xa9] sm:$0xff]  ;;  %v3025_v54 = vld [vmem:[#allocation2 + $0x78] sm:$0xff] }
  0x2c   : > { %437 = vrot.lane.b32.xlu0 %v2959_v32, %s2793_s19  ;;  %325 = vst.msk [vmem:[#allocation3] sm:$0xff] %vm182_vm0, %v293_v46  ;;  %331 = vst.msk [vmem:[#allocation3 + $0x30] sm:$0xff] %vm182_vm0, %v2999_v47  ;;  %v3027_v55 = vld [vmem:[#allocation2 + $0x68] sm:$0xff]  ;;  %v3035_v56 = vld [vmem:[#allocation2 + $0x90] sm:$0xff] }
  0x2d   : > { %332 = vst.msk [vmem:[#allocation3 + $0x38] sm:$0xff] %vm182_vm0, %v3001_v48  ;;  %326 = vst.msk [vmem:[#allocation3 + $0x8] sm:$0xff] %vm182_vm0, %v294_v49  ;;  %v3037_v57 = vld [vmem:[#allocation2 + $0x80] sm:$0xff]  ;;  %v3039_v58 = vld [vmem:[#allocation2 + $0xa8] sm:$0xff] }
  0x2e   : > { %333 = vst.msk [vmem:[#allocation3 + $0x40] sm:$0xff] %vm182_vm0, %v3010_v50  ;;  %335 = vst.msk [vmem:[#allocation3 + $0x50] sm:$0xff] %vm182_vm0, %v3025_v54  ;;  %v3047_v59 = vld [vmem:[#allocation2 + $0x98] sm:$0xff]  ;;  %v3049_v60 = vld [vmem:[#allocation2 + $0xc0] sm:$0xff] }
  0x2f   : > { %435 = vrot.lane.b32.xlu1 %v2971_v38, %s2793_s19  ;;  %334 = vst.msk [vmem:[#allocation3 + $0x48] sm:$0xff] %vm182_vm0, %v3027_v55  ;;  %337 = vst.msk [vmem:[#allocation3 + $0x60] sm:$0xff] %vm182_vm0, %v3035_v56  ;;  %v3051_v61 = vld [vmem:[#allocation2 + $0xb0] sm:$0xff]  ;;  %v3061_v62 = vld [vmem:[#allocation2 + $0xd8] sm:$0xff] }
  0x30   : > { %441 = vrot.lane.b32.xlu0 %v2981_v41, %s2793_s19  ;;  %336 = vst.msk [vmem:[#allocation3 + $0x58] sm:$0xff] %vm182_vm0, %v3037_v57  ;;  %339 = vst.msk [vmem:[#allocation3 + $0x70] sm:$0xff] %vm182_vm0, %v3039_v58  ;;  %v3063_v63 = vld [vmem:[#allocation2 + $0xc8] sm:$0xff]  ;;  %v3065_v0 = vld [vmem:[#allocation2 + $0xf0] sm:$0xff] }
  0x31   : > { %338 = vst.msk [vmem:[#allocation3 + $0x68] sm:$0xff] %vm182_vm0, %v3047_v59  ;;  %341 = vst.msk [vmem:[#allocation3 + $0x80] sm:$0xff] %vm182_vm0, %v3049_v60  ;;  %v3067_v1 = vld [vmem:[#allocation2 + $0x99] sm:$0xff]  ;;  %v373_v3 = vld [vmem:[#allocation2 + $0xc1] sm:$0xff] }
  0x32   : > { %340 = vst.msk [vmem:[#allocation3 + $0x78] sm:$0xff] %vm182_vm0, %v3051_v61  ;;  %343 = vst.msk [vmem:[#allocation3 + $0x90] sm:$0xff] %vm182_vm0, %v3061_v62  ;;  %v3075_v2 = vld [vmem:[#allocation2 + $0xe0] sm:$0xff]  ;;  %v3081_v4 = vld [vmem:[#allocation2 + $0x108] sm:$0xff] }
  0x33   : > { %439 = vrot.lane.b32.xlu1 %v2991_v44, %s2793_s19  ;;  %342 = vst.msk [vmem:[#allocation3 + $0x88] sm:$0xff] %vm182_vm0, %v3063_v63  ;;  %345 = vst.msk [vmem:[#allocation3 + $0xa0] sm:$0xff] %vm182_vm0, %v3065_v0  ;;  %v3087_v5 = vld [vmem:[#allocation2 + $0xb1] sm:$0xff]  ;;  %v375_v7 = vld [vmem:[#allocation2 + $0xd9] sm:$0xff] }
  0x34   : > { %445 = vrot.lane.b32.xlu0 %v3014_v51, %s2793_s19  ;;  %344 = vst.msk [vmem:[#allocation3 + $0x98] sm:$0xff] %vm182_vm0, %v3075_v2  ;;  %347 = vst.msk [vmem:[#allocation3 + $0xb0] sm:$0xff] %vm182_vm0, %v3081_v4  ;;  %v3089_v6 = vld [vmem:[#allocation2 + $0xf8] sm:$0xff]  ;;  %v3094_v8 = vld [vmem:[#allocation2 + $0x120] sm:$0xff] }
  0x35   : > { %346 = vst.msk [vmem:[#allocation3 + $0xa8] sm:$0xff] %vm182_vm0, %v3089_v6  ;;  %349 = vst.msk [vmem:[#allocation3 + $0xc0] sm:$0xff] %vm182_vm0, %v3094_v8  ;;  %v3100_v9 = vld [vmem:[#allocation2 + $0xc9] sm:$0xff]  ;;  %v377_v11 = vld [vmem:[#allocation2 + $0xf1] sm:$0xff] }
  0x36   : > { %v3102_v10 = vld [vmem:[#allocation2 + $0x110] sm:$0xff]  ;;  %v319_v12 = vld [vmem:[#allocation2 + $0x138] sm:$0xff]  ;;  %v376_v13 = vld [vmem:[#allocation2 + $0xe1] sm:$0xff] }
  0x37   : > { %443 = vrot.lane.b32.xlu1 %v3021_v52, %s2793_s19  ;;  %348 = vst.msk [vmem:[#allocation3 + $0xb8] sm:$0xff] %vm182_vm0, %v3102_v10  ;;  %351 = vst.msk [vmem:[#allocation3 + $0xd0] sm:$0xff] %vm182_vm0, %v319_v12  ;;  %v3110_v14 = vld [vmem:[#allocation2 + $0x128] sm:$0xff]  ;;  %v321_v16 = vld [vmem:[#allocation2 + $0x150] sm:$0xff] }
  0x38   : > { %449 = vrot.lane.b32.xlu0 %v3023_v53, %s2793_s19  ;;  %350 = vst.msk [vmem:[#allocation3 + $0xc8] sm:$0xff] %vm182_vm0, %v3110_v14  ;;  %v379_v15 = vld [vmem:[#allocation2 + $0x109] sm:$0xff]  ;;  %353 = vst.msk [vmem:[#allocation3 + $0xe0] sm:$0xff] %vm182_vm0, %v321_v16  ;;  %v378_v17 = vld [vmem:[#allocation2 + $0xf9] sm:$0xff] }
  0x39   : > { %v320_v18 = vld [vmem:[#allocation2 + $0x140] sm:$0xff]  ;;  %v323_v20 = vld [vmem:[#allocation2 + $0x168] sm:$0xff]  ;;  %v380_v21 = vld [vmem:[#allocation2 + $0x111] sm:$0xff] }
  0x3a   : > { %352 = vst.msk [vmem:[#allocation3 + $0xd8] sm:$0xff] %vm182_vm0, %v320_v18  ;;  %v381_v19 = vld [vmem:[#allocation2 + $0x121] sm:$0xff]  ;;  %355 = vst.msk [vmem:[#allocation3 + $0xf0] sm:$0xff] %vm182_vm0, %v323_v20  ;;  %v322_v22 = vld [vmem:[#allocation2 + $0x158] sm:$0xff] }
  0x3b   : > { %447 = vrot.lane.b32.xlu1 %v3067_v1, %s2793_s19  ;;  %354 = vst.msk [vmem:[#allocation3 + $0xe8] sm:$0xff] %vm182_vm0, %v322_v22  ;;  %v383_v23 = vld [vmem:[#allocation2 + $0x139] sm:$0xff]  ;;  %v382_v24 = vld [vmem:[#allocation2 + $0x129] sm:$0xff]  ;;  %v385_v29 = vld [vmem:[#allocation2 + $0x151] sm:$0xff] }
  0x3c   : > { %453 = vrot.lane.b32.xlu0 %v373_v3, %s2793_s19  ;;  %v324_v28 = vld [vmem:[#allocation2 + $0x170] sm:$0xff]  ;;  %v384_v33 = vld [vmem:[#allocation2 + $0x141] sm:$0xff]  ;;  %v386_v35 = vld [vmem:[#allocation2 + $0x159] sm:$0xff] }
  0x3d   : > { %356 = vst.msk [vmem:[#allocation3 + $0xf8] sm:$0xff] %vm182_vm0, %v324_v28  ;;  %v387_v34 = vld [vmem:[#allocation2 + $0x169] sm:$0xff]  ;;  %v388_v37 = vld [vmem:[#allocation2 + $0x171] sm:$0xff]  ;;  %v552_v39 = vld [vmem:[#allocation2 + $0x1a] sm:$0xff] }
  0x3e   : > { %v550_v36 = vld [vmem:[#allocation2 + $0x2] sm:$0xff]  ;;  %v551_v46 = vld [vmem:[#allocation2 + $0xa] sm:$0xff]  ;;  %v1710_v18 = vld [vmem:[#allocation2 + $0x3a] sm:$0xff] }
  0x3f   : > { %451 = vrot.lane.b32.xlu1 %v3087_v5, %s2793_s19  ;;  %v1130_v49 = vld [vmem:[#allocation2 + $0x22] sm:$0xff] }
  0x40   : > { %457 = vrot.lane.b32.xlu0 %v375_v7, %s2793_s19  ;;  %v1939_v12 = vld [vmem:[%s4083_s1 + $0x28] sm:$0xff] }
  0x43   : > { %455 = vrot.lane.b32.xlu1 %v3100_v9, %s2793_s19 }
  0x44   : > { %461 = vrot.lane.b32.xlu0 %v377_v11, %s2793_s19  ;;  %v1938_v11 = vld [vmem:[%s4083_s1 + $0x20] sm:$0xff] }
  0x47   : > { %459 = vrot.lane.b32.xlu1 %v376_v13, %s2793_s19  ;;  %v2749_v13 = vpack.c.bf16 %v1939_v12, %v1938_v11 }
  0x48   : > { %465 = vrot.lane.b32.xlu0 %v379_v15, %s2793_s19  ;;  %v1941_v15 = vld [vmem:[%s4083_s1 + $0x38] sm:$0xff] }
  0x4b   : > { %463 = vrot.lane.b32.xlu1 %v378_v17, %s2793_s19  ;;  %v1942_v17 = vld [vmem:[%s4083_s1 + $0x40] sm:$0xff] }
  0x4c   : > { %469 = vrot.lane.b32.xlu0 %v381_v19, %s2793_s19 }
  0x4f   : > { %467 = vrot.lane.b32.xlu1 %v380_v21, %s2793_s19 }
  0x50   : > { %473 = vrot.lane.b32.xlu0 %v383_v23, %s2793_s19  ;;  %v1712_v23 = vld [vmem:[#allocation2 + $0x52] sm:$0xff] }
  0x53   : > { %471 = vrot.lane.b32.xlu1 %v382_v24, %s2793_s19 }
  0x54   : > { %477 = vrot.lane.b32.xlu0 %v385_v29, %s2793_s19 }
  0x57   : > { %475 = vrot.lane.b32.xlu1 %v384_v33, %s2793_s19 }
  0x58   : > { %481 = vrot.lane.b32.xlu0 %v387_v34, %s2793_s19 }
  0x5b   : > { %479 = vrot.lane.b32.xlu1 %v386_v35, %s2793_s19 }
  0x5c   : > { %614 = vrot.lane.b32.xlu0 %v550_v36, %s2794_s20 }
  0x5f   : > { %483 = vrot.lane.b32.xlu1 %v388_v37, %s2793_s19 }
  0x60   : > { %618 = vrot.lane.b32.xlu0 %v552_v39, %s2794_s20 }
  0x63   : > { %616 = vrot.lane.b32.xlu1 %v551_v46, %s2794_s20 }
  0x64   : > { %809 = vrot.lane.b32.xlu0 %v2979_v40, %s2795_s21  ;;  %v1934_v40 = vld [vmem:[%s4083_s1] sm:$0xff] }
  0x67   : > { %807 = vrot.lane.b32.xlu1 %v2983_v42, %s2795_s21  ;;  %v1935_v42 = vld [vmem:[%s4083_s1 + $0x8] sm:$0xff] }
  0x68   : > { %1002 = vrot.lane.b32.xlu0 %v2943_v27, %s2796_s22  ;;  %v2741_v3 = vpack.c.bf16 %v1935_v42, %v1934_v40  ;;  %v1937_v27 = vld [vmem:[%s4083_s1 + $0x18] sm:$0xff]  ;;  %v1714_v40 = vld [vmem:[#allocation2 + $0x6a] sm:$0xff] }
  0x6a   : > { %2742 = vmatprep.subr.bf16.mxu0 %v2741_v3  ;;  %2757 = vmatprep.subr.bf16.mxu1 %v2741_v3 }
  0x6b   : > { %1000 = vrot.lane.b32.xlu1 %v2934_v25, %s2796_s22  ;;  %2744 = vmatpush3.bf16.msra.mxu0 %v2741_v3  ;;  %v1936_v25 = vld [vmem:[%s4083_s1 + $0x10] sm:$0xff] }
  0x6c   : > { %1195 = vrot.lane.b32.xlu0 %v1130_v49, %s2797_s23  ;;  %v2745_v7 = vpack.c.bf16 %v1937_v27, %v1936_v25  ;;  %2762 = vmatpush3.bf16.msra.mxu1 %v2741_v3 }
  0x6e   : > { %2746 = vmatprep.subr.bf16.mxu0 %v2745_v7  ;;  %2758 = vmatprep.subr.bf16.mxu1 %v2745_v7 }
  0x6f   : > { %1193 = vrot.lane.b32.xlu1 %v552_v39, %s2797_s23  ;;  %2748 = vmatpush3.bf16.msra.mxu0 %v2745_v7 }
  0x70   : > { %620 = vrot.lane.b32.xlu0 %v1130_v49, %s2794_s20  ;;  %2763 = vmatpush3.bf16.msra.mxu1 %v2745_v7 }
  0x71   : > { %2750 = vmatprep.subr.bf16.mxu0 %v2749_v13  ;;  %2759 = vmatprep.subr.bf16.mxu1 %v2749_v13 }
  0x73   : > { %1387 = vrot.lane.b32.xlu1 %v2985_v43, %s2798_s28  ;;  %2752 = vmatpush3.bf16.msra.mxu0 %v2749_v13 }
  0x74   : > { %1389 = vrot.lane.b32.xlu0 %v2993_v45, %s2798_s28  ;;  %2764 = vmatpush3.bf16.msra.mxu1 %v2749_v13 }
  0x77   : > { %811 = vrot.lane.b32.xlu1 %v2985_v43, %s2795_s21  ;;  %v1940_v43 = vld [vmem:[%s4083_s1 + $0x30] sm:$0xff] }
  0x78   : > { %813 = vrot.lane.b32.xlu0 %v2993_v45, %s2795_s21  ;;  %v2753_v16 = vpack.c.bf16 %v1941_v15, %v1940_v43  ;;  %v1709_v45 = vld [vmem:[#allocation2 + $0x32] sm:$0xff] }
  0x7a   : > { %2754 = vmatprep.subr.bf16.mxu0 %v2753_v16  ;;  %2760 = vmatprep.subr.bf16.mxu1 %v2753_v16 }
  0x7b   : > { %1580 = vrot.lane.b32.xlu1 %v2936_v26, %s2799_s10  ;;  %2756 = vmatpush3.bf16.msra.mxu0 %v2753_v16 }
  0x7c   : > { %1582 = vrot.lane.b32.xlu0 %v2955_v31, %s2799_s10  ;;  %2765 = vmatpush3.bf16.msra.mxu1 %v2753_v16 }
  0x7d   : > { %2691 = vmatprep.subr.mxu0 %v1942_v17  ;;  %2761 = vmatprep.subr.mxu1 %v1942_v17 }
  0x7f   : > { %1004 = vrot.lane.b32.xlu1 %v2936_v26, %s2796_s22  ;;  %2692 = vmatpush3.msra.mxu0 %v1942_v17 }
  0x80   : > { %1006 = vrot.lane.b32.xlu0 %v2955_v31, %s2796_s22  ;;  %2766 = vmatpush3.msra.mxu1 %v1942_v17  ;;  %v422_v26 = vpop.permute.xlu0 %421 }
  0x81   : > { %518 = vst.msk [vmem:[#allocation3] sm:$0xff] %vm517_vm3, %v422_v26 }
  0x83   : > { %1773 = vrot.lane.b32.xlu1 %v1709_v45, %s2800_s25 }
  0x84   : > { %1775 = vrot.lane.b32.xlu0 %v1710_v18, %s2800_s25 }
  0x87   : > { %1197 = vrot.lane.b32.xlu1 %v1709_v45, %s2797_s23 }
  0x88   : > { %1199 = vrot.lane.b32.xlu0 %v1710_v18, %s2797_s23 }
  0x8b   : > { %622 = vrot.lane.b32.xlu1 %v1709_v45, %s2794_s20  ;;  %v1716_v45 = vld [vmem:[#allocation2 + $0x82] sm:$0xff] }
  0x8c   : > { %624 = vrot.lane.b32.xlu0 %v1710_v18, %s2794_s20 }
  0x8f   : > { %1391 = vrot.lane.b32.xlu1 %v2999_v47, %s2798_s28 }
  0x90   : > { %1393 = vrot.lane.b32.xlu0 %v3001_v48, %s2798_s28 }
  0x92   : > { %v424_v31 = vpop.permute.xlu0 %423 }
  0x93   : > { %815 = vrot.lane.b32.xlu1 %v2999_v47, %s2795_s21  ;;  %519 = vst.msk [vmem:[#allocation3 + $0x8] sm:$0xff] %vm517_vm3, %v424_v31 }
  0x94   : > { %817 = vrot.lane.b32.xlu0 %v3001_v48, %s2795_s21  ;;  %v1711_v48 = vld [vmem:[#allocation2 + $0x4a] sm:$0xff] }
  0x95   : > { %v426_v19 = vpop.permute.xlu1 %425 }
  0x96   : > { %520 = vst.msk [vmem:[#allocation3 + $0x10] sm:$0xff] %vm517_vm3, %v426_v19  ;;  %v430_v20 = vpop.permute.xlu0 %429 }
  0x97   : > { %1584 = vrot.lane.b32.xlu1 %v2951_v30, %s2799_s10  ;;  %522 = vst.msk [vmem:[#allocation3 + $0x20] sm:$0xff] %vm517_vm3, %v430_v20 }
  0x98   : > { %1586 = vrot.lane.b32.xlu0 %v2971_v38, %s2799_s10 }
  0x99   : > { %v428_v21 = vpop.permute.xlu1 %427 }
  0x9a   : > { %521 = vst.msk [vmem:[#allocation3 + $0x18] sm:$0xff] %vm517_vm3, %v428_v21  ;;  %v434_v47 = vpop.permute.xlu0 %433 }
  0x9b   : > { %1008 = vrot.lane.b32.xlu1 %v2951_v30, %s2796_s22  ;;  %524 = vst.msk [vmem:[#allocation3 + $0x30] sm:$0xff] %vm517_vm3, %v434_v47 }
  0x9c   : > { %1010 = vrot.lane.b32.xlu0 %v2971_v38, %s2796_s22 }
  0x9d   : > { %v432_v22 = vpop.permute.xlu1 %431 }
  0x9e   : > { %523 = vst.msk [vmem:[#allocation3 + $0x28] sm:$0xff] %vm517_vm3, %v432_v22  ;;  %v438_v24 = vpop.permute.xlu0 %437 }
  0x9f   : > { %1777 = vrot.lane.b32.xlu1 %v1711_v48, %s2800_s25  ;;  %526 = vst.msk [vmem:[#allocation3 + $0x40] sm:$0xff] %vm517_vm3, %v438_v24  ;;  %v1718_v24 = vld [vmem:[#allocation2 + $0x9a] sm:$0xff] }
  0xa0   : > { %1779 = vrot.lane.b32.xlu0 %v1712_v23, %s2800_s25 }
  0xa1   : > { %v436_v28 = vpop.permute.xlu1 %435 }
  0xa2   : > { %525 = vst.msk [vmem:[#allocation3 + $0x38] sm:$0xff] %vm517_vm3, %v436_v28  ;;  %v442_v30 = vpop.permute.xlu0 %441 }
  0xa3   : > { %1201 = vrot.lane.b32.xlu1 %v1711_v48, %s2797_s23  ;;  %528 = vst.msk [vmem:[#allocation3 + $0x50] sm:$0xff] %vm517_vm3, %v442_v30 }
  0xa4   : > { %1203 = vrot.lane.b32.xlu0 %v1712_v23, %s2797_s23 }
  0xa5   : > { %v440_v38 = vpop.permute.xlu1 %439 }
  0xa6   : > { %527 = vst.msk [vmem:[#allocation3 + $0x48] sm:$0xff] %vm517_vm3, %v440_v38  ;;  %v446_v29 = vpop.permute.xlu0 %445 }
  0xa7   : > { %626 = vrot.lane.b32.xlu1 %v1711_v48, %s2794_s20  ;;  %530 = vst.msk [vmem:[#allocation3 + $0x60] sm:$0xff] %vm517_vm3, %v446_v29 }
  0xa8   : > { %628 = vrot.lane.b32.xlu0 %v1712_v23, %s2794_s20 }
  0xa9   : > { %v444_v33 = vpop.permute.xlu1 %443 }
  0xaa   : > { %529 = vst.msk [vmem:[#allocation3 + $0x58] sm:$0xff] %vm517_vm3, %v444_v33  ;;  %v450_v34 = vpop.permute.xlu0 %449 }
  0xab   : > { %1395 = vrot.lane.b32.xlu1 %v3010_v50, %s2798_s28  ;;  %532 = vst.msk [vmem:[#allocation3 + $0x70] sm:$0xff] %vm517_vm3, %v450_v34 }
  0xac   : > { %1397 = vrot.lane.b32.xlu0 %v3027_v55, %s2798_s28 }
  0xad   : > { %v448_v35 = vpop.permute.xlu1 %447 }
  0xae   : > { %531 = vst.msk [vmem:[#allocation3 + $0x68] sm:$0xff] %vm517_vm3, %v448_v35  ;;  %v454_v36 = vpop.permute.xlu0 %453 }
  0xaf   : > { %819 = vrot.lane.b32.xlu1 %v3010_v50, %s2795_s21  ;;  %534 = vst.msk [vmem:[#allocation3 + $0x80] sm:$0xff] %vm517_vm3, %v454_v36 }
  0xb0   : > { %821 = vrot.lane.b32.xlu0 %v3027_v55, %s2795_s21  ;;  %v1713_v55 = vld [vmem:[#allocation2 + $0x62] sm:$0xff] }
  0xb1   : > { %v452_v37 = vpop.permute.xlu1 %451 }
  0xb2   : > { %533 = vst.msk [vmem:[#allocation3 + $0x78] sm:$0xff] %vm517_vm3, %v452_v37  ;;  %v458_v39 = vpop.permute.xlu0 %457 }
  0xb3   : > { %1588 = vrot.lane.b32.xlu1 %v2959_v32, %s2799_s10  ;;  %536 = vst.msk [vmem:[#allocation3 + $0x90] sm:$0xff] %vm517_vm3, %v458_v39 }
  0xb4   : > { %1590 = vrot.lane.b32.xlu0 %v2991_v44, %s2799_s10 }
  0xb5   : > { %v456_v46 = vpop.permute.xlu1 %455 }
  0xb6   : > { %535 = vst.msk [vmem:[#allocation3 + $0x88] sm:$0xff] %vm517_vm3, %v456_v46  ;;  %v462_v50 = vpop.permute.xlu0 %461 }
  0xb7   : > { %1012 = vrot.lane.b32.xlu1 %v2959_v32, %s2796_s22  ;;  %538 = vst.msk [vmem:[#allocation3 + $0xa0] sm:$0xff] %vm517_vm3, %v462_v50 }
  0xb8   : > { %1014 = vrot.lane.b32.xlu0 %v2991_v44, %s2796_s22 }
  0xb9   : > { %v460_v49 = vpop.permute.xlu1 %459 }
  0xba   : > { %537 = vst.msk [vmem:[#allocation3 + $0x98] sm:$0xff] %vm517_vm3, %v460_v49  ;;  %v466_v42 = vpop.permute.xlu0 %465  ;;  %v1720_v49 = vld [vmem:[#allocation2 + $0xb2] sm:$0xff] }
  0xbb   : > { %1781 = vrot.lane.b32.xlu1 %v1713_v55, %s2800_s25  ;;  %540 = vst.msk [vmem:[#allocation3 + $0xb0] sm:$0xff] %vm517_vm3, %v466_v42 }
  0xbc   : > { %1783 = vrot.lane.b32.xlu0 %v1714_v40, %s2800_s25 }
  0xbd   : > { %v464_v3 = vpop.permute.xlu1 %463 }
  0xbe   : > { %539 = vst.msk [vmem:[#allocation3 + $0xa8] sm:$0xff] %vm517_vm3, %v464_v3  ;;  %v470_v32 = vpop.permute.xlu0 %469 }
  0xbf   : > { %1205 = vrot.lane.b32.xlu1 %v1713_v55, %s2797_s23  ;;  %542 = vst.msk [vmem:[#allocation3 + $0xc0] sm:$0xff] %vm517_vm3, %v470_v32 }
  0xc0   : > { %1207 = vrot.lane.b32.xlu0 %v1714_v40, %s2797_s23 }
  0xc1   : > { %v468_v44 = vpop.permute.xlu1 %467 }
  0xc2   : > { %541 = vst.msk [vmem:[#allocation3 + $0xb8] sm:$0xff] %vm517_vm3, %v468_v44  ;;  %v474_v25 = vpop.permute.xlu0 %473 }
  0xc3   : > { %630 = vrot.lane.b32.xlu1 %v1713_v55, %s2794_s20  ;;  %544 = vst.msk [vmem:[#allocation3 + $0xd0] sm:$0xff] %vm517_vm3, %v474_v25 }
  0xc4   : > { %632 = vrot.lane.b32.xlu0 %v1714_v40, %s2794_s20 }
  0xc5   : > { %v472_v27 = vpop.permute.xlu1 %471 }
  0xc6   : > { %543 = vst.msk [vmem:[#allocation3 + $0xc8] sm:$0xff] %vm517_vm3, %v472_v27  ;;  %v478_v7 = vpop.permute.xlu0 %477 }
  0xc7   : > { %1399 = vrot.lane.b32.xlu1 %v3025_v54, %s2798_s28  ;;  %546 = vst.msk [vmem:[#allocation3 + $0xe0] sm:$0xff] %vm517_vm3, %v478_v7 }
  0xc8   : > { %1401 = vrot.lane.b32.xlu0 %v3037_v57, %s2798_s28 }
  0xc9   : > { %v476_v11 = vpop.permute.xlu1 %475 }
  0xca   : > { %545 = vst.msk [vmem:[#allocation3 + $0xd8] sm:$0xff] %vm517_vm3, %v476_v11  ;;  %v482_v12 = vpop.permute.xlu0 %481 }
  0xcb   : > { %823 = vrot.lane.b32.xlu1 %v3025_v54, %s2795_s21  ;;  %548 = vst.msk [vmem:[#allocation3 + $0xf0] sm:$0xff] %vm517_vm3, %v482_v12  ;;  %v1528_v12 = vld [vmem:[#allocation2 + $0xc1] sm:$0xff] }
  0xcc   : > { %825 = vrot.lane.b32.xlu0 %v3037_v57, %s2795_s21  ;;  %v1715_v57 = vld [vmem:[#allocation2 + $0x7a] sm:$0xff] }
  0xcd   : > { %v480_v13 = vpop.permute.xlu1 %479 }
  0xce   : > { %547 = vst.msk [vmem:[#allocation3 + $0xe8] sm:$0xff] %vm517_vm3, %v480_v13  ;;  %v615_v43 = vpop.permute.xlu0 %614 }
  0xcf   : > { %1592 = vrot.lane.b32.xlu1 %v2981_v41, %s2799_s10  ;;  %711 = vst.msk [vmem:[#allocation3] sm:$0xff] %vm710_vm4, %v615_v43 }
  0xd0   : > { %1594 = vrot.lane.b32.xlu0 %v3021_v52, %s2799_s10 }
  0xd1   : > { %v484_v15 = vpop.permute.xlu1 %483 }
  0xd2   : > { %549 = vst.msk [vmem:[#allocation3 + $0xf8] sm:$0xff] %vm517_vm3, %v484_v15  ;;  %v619_v54 = vpop.permute.xlu0 %618 }
  0xd3   : > { %1016 = vrot.lane.b32.xlu1 %v2981_v41, %s2796_s22  ;;  %713 = vst.msk [vmem:[#allocation3 + $0x10] sm:$0xff] %vm710_vm4, %v619_v54 }
  0xd4   : > { %1018 = vrot.lane.b32.xlu0 %v3021_v52, %s2796_s22 }
  0xd5   : > { %v617_v16 = vpop.permute.xlu1 %616 }
  0xd6   : > { %712 = vst.msk [vmem:[#allocation3 + $0x8] sm:$0xff] %vm710_vm4, %v617_v16  ;;  %v810_v17 = vpop.permute.xlu0 %809  ;;  %v1722_v16 = vld [vmem:[#allocation2 + $0xca] sm:$0xff] }
  0xd7   : > { %1785 = vrot.lane.b32.xlu1 %v1715_v57, %s2800_s25  ;;  %905 = vst.msk [vmem:[#allocation3 + $0x8] sm:$0xff] %vm903_vm5, %v810_v17 }
  0xd8   : > { %1787 = vrot.lane.b32.xlu0 %v1716_v45, %s2800_s25 }
  0xd9   : > { %v808_v18 = vpop.permute.xlu1 %807 }
  0xda   : > { %904 = vst.msk [vmem:[#allocation3] sm:$0xff] %vm903_vm5, %v808_v18  ;;  %v1003_v41 = vpop.permute.xlu0 %1002 }
  0xdb   : > { %1209 = vrot.lane.b32.xlu1 %v1715_v57, %s2797_s23  ;;  %1098 = vst.msk [vmem:[#allocation3 + $0x8] sm:$0xff] %vm1096_vm6, %v1003_v41 }
  0xdc   : > { %1211 = vrot.lane.b32.xlu0 %v1716_v45, %s2797_s23 }
  0xdd   : > { %v1001_v52 = vpop.permute.xlu1 %1000 }
  0xde   : > { %1097 = vst.msk [vmem:[#allocation3] sm:$0xff] %vm1096_vm6, %v1001_v52  ;;  %v1196_v26 = vpop.permute.xlu0 %1195 }
  0xdf   : > { %634 = vrot.lane.b32.xlu1 %v1715_v57, %s2794_s20  ;;  %1291 = vst.msk [vmem:[#allocation3 + $0x8] sm:$0xff] %vm1289_vm7, %v1196_v26 }
  0xe0   : > { %636 = vrot.lane.b32.xlu0 %v1716_v45, %s2794_s20 }
  0xe1   : > { %v1194_v31 = vpop.permute.xlu1 %1193 }
  0xe2   : > { %1290 = vst.msk [vmem:[#allocation3] sm:$0xff] %vm1289_vm7, %v1194_v31  ;;  %v621_v19 = vpop.permute.xlu0 %620 }
  0xe3   : > { %1403 = vrot.lane.b32.xlu1 %v3035_v56, %s2798_s28  ;;  %714 = vst.msk [vmem:[#allocation3 + $0x18] sm:$0xff] %vm710_vm4, %v621_v19 }
  0xe4   : > { %1405 = vrot.lane.b32.xlu0 %v3047_v59, %s2798_s28 }
  0xe5   : > { %v1388_v20 = vpop.permute.xlu1 %1387 }
  0xe6   : > { %1484 = vst.msk [vmem:[#allocation3] sm:$0xff] %vm1483_vm8, %v1388_v20  ;;  %v1390_v21 = vpop.permute.xlu0 %1389 }
  0xe7   : > { %827 = vrot.lane.b32.xlu1 %v3035_v56, %s2795_s21  ;;  %1485 = vst.msk [vmem:[#allocation3 + $0x8] sm:$0xff] %vm1483_vm8, %v1390_v21 }
  0xe8   : > { %829 = vrot.lane.b32.xlu0 %v3047_v59, %s2795_s21  ;;  %v1717_v59 = vld [vmem:[#allocation2 + $0x92] sm:$0xff] }
  0xe9   : > { %v812_v47 = vpop.permute.xlu1 %811 }
  0xea   : > { %906 = vst.msk [vmem:[#allocation3 + $0x10] sm:$0xff] %vm903_vm5, %v812_v47  ;;  %v814_v48 = vpop.permute.xlu0 %813  ;;  %v1530_v47 = vld [vmem:[#allocation2 + $0xd9] sm:$0xff] }
  0xeb   : > { %1596 = vrot.lane.b32.xlu1 %v3014_v51, %s2799_s10  ;;  %907 = vst.msk [vmem:[#allocation3 + $0x18] sm:$0xff] %vm903_vm5, %v814_v48 }
  0xec   : > { %1598 = vrot.lane.b32.xlu0 %v3067_v1, %s2799_s10 }
  0xed   : > { %v1581_v22 = vpop.permute.xlu1 %1580 }
  0xee   : > { %1677 = vst.msk [vmem:[#allocation3] sm:$0xff] %vm1676_vm9, %v1581_v22  ;;  %v1583_v56 = vpop.permute.xlu0 %1582  ;;  %v1531_v22 = vld [vmem:[#allocation2 + $0xe1] sm:$0xff] }
  0xef   : > { %1020 = vrot.lane.b32.xlu1 %v3014_v51, %s2796_s22  ;;  %1678 = vst.msk [vmem:[#allocation3 + $0x8] sm:$0xff] %vm1676_vm9, %v1583_v56 }
  0xf0   : > { %1022 = vrot.lane.b32.xlu0 %v3067_v1, %s2796_s22 }
  0xf1   : > { %v1005_v23 = vpop.permute.xlu1 %1004 }
  0xf2   : > { %1099 = vst.msk [vmem:[#allocation3 + $0x10] sm:$0xff] %vm1096_vm6, %v1005_v23  ;;  %v1007_v28 = vpop.permute.xlu0 %1006 }
  0xf3   : > { %1789 = vrot.lane.b32.xlu1 %v1717_v59, %s2800_s25  ;;  %1100 = vst.msk [vmem:[#allocation3 + $0x18] sm:$0xff] %vm1096_vm6, %v1007_v28 }
  0xf4   : > { %1791 = vrot.lane.b32.xlu0 %v1718_v24, %s2800_s25 }
  0xf5   : > { %v1774_v30 = vpop.permute.xlu1 %1773 }
  0xf6   : > { %1870 = vst.msk [vmem:[#allocation3] sm:$0xff] %vm1869_vm10, %v1774_v30  ;;  %v1776_v51 = vpop.permute.xlu0 %1775 }
  0xf7   : > { %1213 = vrot.lane.b32.xlu1 %v1717_v59, %s2797_s23  ;;  %1871 = vst.msk [vmem:[#allocation3 + $0x8] sm:$0xff] %vm1869_vm10, %v1776_v51 }
  0xf8   : > { %1215 = vrot.lane.b32.xlu0 %v1718_v24, %s2797_s23 }
  0xf9   : > { %v1198_v1 = vpop.permute.xlu1 %1197 }
  0xfa   : > { %1292 = vst.msk [vmem:[#allocation3 + $0x10] sm:$0xff] %vm1289_vm7, %v1198_v1  ;;  %v1200_v38 = vpop.permute.xlu0 %1199 }
  0xfb   : > { %638 = vrot.lane.b32.xlu1 %v1717_v59, %s2794_s20  ;;  %1293 = vst.msk [vmem:[#allocation3 + $0x18] sm:$0xff] %vm1289_vm7, %v1200_v38 }
  0xfc   : > { %640 = vrot.lane.b32.xlu0 %v1718_v24, %s2794_s20  ;;  %v1724_v24 = vld [vmem:[#allocation2 + $0xe2] sm:$0xff] }
  0xfd   : > { %v623_v29 = vpop.permute.xlu1 %622  ;;  %v1902_v33 = vld [vmem:[#allocation3] sm:$0xff] }
  0xfe   : > { %715 = vst.msk [vmem:[#allocation3 + $0x20] sm:$0xff] %vm710_vm4, %v623_v29  ;;  %2693 = vmatprep.mubr.msk.f32.mxu0 %vm1943_vm11, %v1902_v33  ;;  %v625_v34 = vpop.permute.xlu0 %624  ;;  %v1903_v35 = vld [vmem:[#allocation3 + $0x8] sm:$0xff] }
  0xff   : > { %1407 = vrot.lane.b32.xlu1 %v3039_v58, %s2798_s28  ;;  %716 = vst.msk [vmem:[#allocation3 + $0x28] sm:$0xff] %vm710_vm4, %v625_v34  ;;  %2694 = vmatmul.mubr.msk.f32.vlgmr.msra.gmra.mrb[0].mxu0 %vm1943_vm11, %v1903_v35 }
 0x100   : > { %1409 = vrot.lane.b32.xlu0 %v3051_v61, %s2798_s28 }
 0x101   : > { %v1392_v36 = vpop.permute.xlu1 %1391 }
 0x102   : > { %1486 = vst.msk [vmem:[#allocation3 + $0x10] sm:$0xff] %vm1483_vm8, %v1392_v36  ;;  %v1394_v37 = vpop.permute.xlu0 %1393 }
 0x103   : > { %831 = vrot.lane.b32.xlu1 %v3039_v58, %s2795_s21  ;;  %1487 = vst.msk [vmem:[#allocation3 + $0x18] sm:$0xff] %vm1483_vm8, %v1394_v37 }
 0x104   : > { %833 = vrot.lane.b32.xlu0 %v3051_v61, %s2795_s21  ;;  %v1719_v61 = vld [vmem:[#allocation2 + $0xaa] sm:$0xff] }
 0x105   : > { %v816_v39 = vpop.permute.xlu1 %815 }
 0x106   : > { %908 = vst.msk [vmem:[#allocation3 + $0x20] sm:$0xff] %vm903_vm5, %v816_v39  ;;  %v818_v46 = vpop.permute.xlu0 %817  ;;  %v1532_v39 = vld [vmem:[#allocation2 + $0xf1] sm:$0xff] }
 0x107   : > { %1600 = vrot.lane.b32.xlu1 %v3023_v53, %s2799_s10  ;;  %909 = vst.msk [vmem:[#allocation3 + $0x28] sm:$0xff] %vm903_vm5, %v818_v46 }
 0x108   : > { %1602 = vrot.lane.b32.xlu0 %v3087_v5, %s2799_s10 }
 0x109   : > { %v1585_v50 = vpop.permute.xlu1 %1584 }
 0x10a   : > { %1679 = vst.msk [vmem:[#allocation3 + $0x10] sm:$0xff] %vm1676_vm9, %v1585_v50  ;;  %v1587_v58 = vpop.permute.xlu0 %1586  ;;  %v1533_v50 = vld [vmem:[#allocation2 + $0xf9] sm:$0xff] }
 0x10b   : > { %1024 = vrot.lane.b32.xlu1 %v3023_v53, %s2796_s22  ;;  %1680 = vst.msk [vmem:[#allocation3 + $0x18] sm:$0xff] %vm1676_vm9, %v1587_v58 }
 0x10c   : > { %1026 = vrot.lane.b32.xlu0 %v3087_v5, %s2796_s22 }
 0x10d   : > { %v1009_v55 = vpop.permute.xlu1 %1008 }
 0x10e   : > { %1101 = vst.msk [vmem:[#allocation3 + $0x20] sm:$0xff] %vm1096_vm6, %v1009_v55  ;;  %v1011_v40 = vpop.permute.xlu0 %1010 }
 0x10f   : > { %1793 = vrot.lane.b32.xlu1 %v1719_v61, %s2800_s25  ;;  %1102 = vst.msk [vmem:[#allocation3 + $0x28] sm:$0xff] %vm1096_vm6, %v1011_v40 }
 0x110   : > { %1795 = vrot.lane.b32.xlu0 %v1720_v49, %s2800_s25 }
 0x111   : > { %v1778_v42 = vpop.permute.xlu1 %1777 }
 0x112   : > { %1872 = vst.msk [vmem:[#allocation3 + $0x10] sm:$0xff] %vm1869_vm10, %v1778_v42  ;;  %v1780_v53 = vpop.permute.xlu0 %1779 }
 0x113   : > { %1217 = vrot.lane.b32.xlu1 %v1719_v61, %s2797_s23  ;;  %1873 = vst.msk [vmem:[#allocation3 + $0x18] sm:$0xff] %vm1869_vm10, %v1780_v53 }
 0x114   : > { %1219 = vrot.lane.b32.xlu0 %v1720_v49, %s2797_s23 }
 0x115   : > { %v1202_v5 = vpop.permute.xlu1 %1201 }
 0x116   : > { %1294 = vst.msk [vmem:[#allocation3 + $0x20] sm:$0xff] %vm1289_vm7, %v1202_v5  ;;  %v1204_v3 = vpop.permute.xlu0 %1203 }
 0x117   : > { %642 = vrot.lane.b32.xlu1 %v1719_v61, %s2794_s20  ;;  %1295 = vst.msk [vmem:[#allocation3 + $0x28] sm:$0xff] %vm1289_vm7, %v1204_v3 }
 0x118   : > { %644 = vrot.lane.b32.xlu0 %v1720_v49, %s2794_s20  ;;  %v1726_v49 = vld [vmem:[#allocation2 + $0xfa] sm:$0xff] }
 0x119   : > { %v627_v32 = vpop.permute.xlu1 %626  ;;  %v1904_v44 = vld [vmem:[#allocation3 + $0x10] sm:$0xff] }
 0x11a   : > { %717 = vst.msk [vmem:[#allocation3 + $0x30] sm:$0xff] %vm710_vm4, %v627_v32  ;;  %2696 = vmatprep.mubr.msk.f32.mxu0 %vm1943_vm11, %v1904_v44  ;;  %v629_v25 = vpop.permute.xlu0 %628  ;;  %v1905_v27 = vld [vmem:[#allocation3 + $0x18] sm:$0xff] }
 0x11b   : > { %1411 = vrot.lane.b32.xlu1 %v3049_v60, %s2798_s28  ;;  %718 = vst.msk [vmem:[#allocation3 + $0x38] sm:$0xff] %vm710_vm4, %v629_v25  ;;  %2697 = vmatmul.mubr.msk.f32.gmra.mrb[2].mxu0 %vm1943_vm11, %v1905_v27 }
 0x11c   : > { %1413 = vrot.lane.b32.xlu0 %v3063_v63, %s2798_s28 }
 0x11d   : > { %v1396_v7 = vpop.permute.xlu1 %1395 }
 0x11e   : > { %1488 = vst.msk [vmem:[#allocation3 + $0x20] sm:$0xff] %vm1483_vm8, %v1396_v7  ;;  %v1398_v11 = vpop.permute.xlu0 %1397 }
 0x11f   : > { %835 = vrot.lane.b32.xlu1 %v3049_v60, %s2795_s21  ;;  %1489 = vst.msk [vmem:[#allocation3 + $0x28] sm:$0xff] %vm1483_vm8, %v1398_v11  ;;  %v951_v60 = vld [vmem:[#allocation2 + $0xc9] sm:$0xff] }
 0x120   : > { %837 = vrot.lane.b32.xlu0 %v3063_v63, %s2795_s21  ;;  %v1721_v63 = vld [vmem:[#allocation2 + $0xc2] sm:$0xff]  ;;  %v258_v11 = vld [vmem:[%s2889_s18 + $0xf0] sm:$0xff] }
 0x121   : > { %v820_v13 = vpop.permute.xlu1 %819  ;;  %291 = vst.msk [vmem:[#allocation2 + $0x181] sm:$0xff] %vm182_vm0, %v258_v11 }
 0x122   : > { %910 = vst.msk [vmem:[#allocation3 + $0x30] sm:$0xff] %vm903_vm5, %v820_v13  ;;  %v822_v43 = vpop.permute.xlu0 %821  ;;  %v1534_v13 = vld [vmem:[#allocation2 + $0x109] sm:$0xff] }
 0x123   : > { %1604 = vrot.lane.b32.xlu1 %v1528_v12, %s2799_s10  ;;  %911 = vst.msk [vmem:[#allocation3 + $0x38] sm:$0xff] %vm903_vm5, %v822_v43  ;;  %v259_v43 = vld [vmem:[%s2889_s18 + $0xf8] sm:$0xff] }
 0x124   : > { %1606 = vrot.lane.b32.xlu0 %v3100_v9, %s2799_s10  ;;  %292 = vst.msk [vmem:[#allocation2 + $0x189] sm:$0xff] %vm182_vm0, %v259_v43  ;;  %v1540_v43 = vld [vmem:[#allocation2 + $0x151] sm:$0xff] }
 0x125   : > { %v1589_v15 = vpop.permute.xlu1 %1588 }
 0x126   : > { %1681 = vst.msk [vmem:[#allocation3 + $0x20] sm:$0xff] %vm1676_vm9, %v1589_v15  ;;  %v1591_v54 = vpop.permute.xlu0 %1590 }
 0x127   : > { %1028 = vrot.lane.b32.xlu1 %v1528_v12, %s2796_s22  ;;  %1682 = vst.msk [vmem:[#allocation3 + $0x28] sm:$0xff] %vm1676_vm9, %v1591_v54 }
 0x128   : > { %1030 = vrot.lane.b32.xlu0 %v951_v60, %s2796_s22  ;;  %v1535_v60 = vld [vmem:[#allocation2 + $0x111] sm:$0xff] }
 0x129   : > { %v1013_v57 = vpop.permute.xlu1 %1012 }
 0x12a   : > { %1103 = vst.msk [vmem:[#allocation3 + $0x30] sm:$0xff] %vm1096_vm6, %v1013_v57  ;;  %v1015_v45 = vpop.permute.xlu0 %1014 }
 0x12b   : > { %1797 = vrot.lane.b32.xlu1 %v1721_v63, %s2800_s25  ;;  %1104 = vst.msk [vmem:[#allocation3 + $0x38] sm:$0xff] %vm1096_vm6, %v1015_v45 }
 0x12c   : > { %1799 = vrot.lane.b32.xlu0 %v1722_v16, %s2800_s25 }
 0x12d   : > { %v1782_v9 = vpop.permute.xlu1 %1781 }
 0x12e   : > { %1874 = vst.msk [vmem:[#allocation3 + $0x20] sm:$0xff] %vm1869_vm10, %v1782_v9  ;;  %v1784_v17 = vpop.permute.xlu0 %1783 }
 0x12f   : > { %1221 = vrot.lane.b32.xlu1 %v1721_v63, %s2797_s23  ;;  %1875 = vst.msk [vmem:[#allocation3 + $0x28] sm:$0xff] %vm1869_vm10, %v1784_v17 }
 0x130   : > { %1223 = vrot.lane.b32.xlu0 %v1722_v16, %s2797_s23 }
 0x131   : > { %v1206_v18 = vpop.permute.xlu1 %1205 }
 0x132   : > { %1296 = vst.msk [vmem:[#allocation3 + $0x30] sm:$0xff] %vm1289_vm7, %v1206_v18  ;;  %v1208_v41 = vpop.permute.xlu0 %1207 }
 0x133   : > { %646 = vrot.lane.b32.xlu1 %v1721_v63, %s2794_s20  ;;  %1297 = vst.msk [vmem:[#allocation3 + $0x38] sm:$0xff] %vm1289_vm7, %v1208_v41 }
 0x134   : > { %648 = vrot.lane.b32.xlu0 %v1722_v16, %s2794_s20  ;;  %v1728_v16 = vld [vmem:[#allocation2 + $0x112] sm:$0xff] }
 0x135   : > { %v631_v52 = vpop.permute.xlu1 %630  ;;  %v1906_v26 = vld [vmem:[#allocation3 + $0x20] sm:$0xff] }
 0x136   : > { %719 = vst.msk [vmem:[#allocation3 + $0x40] sm:$0xff] %vm710_vm4, %v631_v52  ;;  %2699 = vmatprep.mubr.msk.f32.mxu0 %vm1943_vm11, %v1906_v26  ;;  %v633_v31 = vpop.permute.xlu0 %632  ;;  %v1907_v19 = vld [vmem:[#allocation3 + $0x28] sm:$0xff] }
 0x137   : > { %1415 = vrot.lane.b32.xlu1 %v3061_v62, %s2798_s28  ;;  %720 = vst.msk [vmem:[#allocation3 + $0x48] sm:$0xff] %vm710_vm4, %v633_v31  ;;  %2700 = vmatmul.mubr.msk.f32.gmra.mrb[4].mxu0 %vm1943_vm11, %v1907_v19 }
 0x138   : > { %1417 = vrot.lane.b32.xlu0 %v3075_v2, %s2798_s28 }
 0x139   : > { %v1400_v20 = vpop.permute.xlu1 %1399 }
 0x13a   : > { %1490 = vst.msk [vmem:[#allocation3 + $0x30] sm:$0xff] %vm1483_vm8, %v1400_v20  ;;  %v1402_v21 = vpop.permute.xlu0 %1401 }
 0x13b   : > { %839 = vrot.lane.b32.xlu1 %v3061_v62, %s2795_s21  ;;  %1491 = vst.msk [vmem:[#allocation3 + $0x38] sm:$0xff] %vm1483_vm8, %v1402_v21 }
 0x13c   : > { %841 = vrot.lane.b32.xlu0 %v3075_v2, %s2795_s21  ;;  %v1723_v2 = vld [vmem:[#allocation2 + $0xda] sm:$0xff] }
 0x13d   : > { %v824_v48 = vpop.permute.xlu1 %823 }
 0x13e   : > { %912 = vst.msk [vmem:[#allocation3 + $0x40] sm:$0xff] %vm903_vm5, %v824_v48  ;;  %v826_v56 = vpop.permute.xlu0 %825 }
 0x13f   : > { %1608 = vrot.lane.b32.xlu1 %v1530_v47, %s2799_s10  ;;  %913 = vst.msk [vmem:[#allocation3 + $0x48] sm:$0xff] %vm903_vm5, %v826_v56 }
 0x140   : > { %1610 = vrot.lane.b32.xlu0 %v1531_v22, %s2799_s10 }
 0x141   : > { %v1593_v59 = vpop.permute.xlu1 %1592 }
 0x142   : > { %1683 = vst.msk [vmem:[#allocation3 + $0x30] sm:$0xff] %vm1676_vm9, %v1593_v59  ;;  %v1595_v62 = vpop.permute.xlu0 %1594 }
 0x143   : > { %1032 = vrot.lane.b32.xlu1 %v1530_v47, %s2796_s22  ;;  %1684 = vst.msk [vmem:[#allocation3 + $0x38] sm:$0xff] %vm1676_vm9, %v1595_v62  ;;  %v1536_v47 = vld [vmem:[#allocation2 + $0x121] sm:$0xff] }
 0x144   : > { %1034 = vrot.lane.b32.xlu0 %v1531_v22, %s2796_s22  ;;  %v1537_v22 = vld [vmem:[#allocation2 + $0x129] sm:$0xff] }
 0x145   : > { %v1017_v23 = vpop.permute.xlu1 %1016 }
 0x146   : > { %1105 = vst.msk [vmem:[#allocation3 + $0x40] sm:$0xff] %vm1096_vm6, %v1017_v23  ;;  %v1019_v28 = vpop.permute.xlu0 %1018 }
 0x147   : > { %1801 = vrot.lane.b32.xlu1 %v1723_v2, %s2800_s25  ;;  %1106 = vst.msk [vmem:[#allocation3 + $0x48] sm:$0xff] %vm1096_vm6, %v1019_v28 }
 0x148   : > { %1803 = vrot.lane.b32.xlu0 %v1724_v24, %s2800_s25 }
 0x149   : > { %v1786_v30 = vpop.permute.xlu1 %1785 }
 0x14a   : > { %1876 = vst.msk [vmem:[#allocation3 + $0x30] sm:$0xff] %vm1869_vm10, %v1786_v30  ;;  %v1788_v51 = vpop.permute.xlu0 %1787 }
 0x14b   : > { %1225 = vrot.lane.b32.xlu1 %v1723_v2, %s2797_s23  ;;  %1877 = vst.msk [vmem:[#allocation3 + $0x38] sm:$0xff] %vm1869_vm10, %v1788_v51 }
 0x14c   : > { %1227 = vrot.lane.b32.xlu0 %v1724_v24, %s2797_s23 }
 0x14d   : > { %v1210_v1 = vpop.permute.xlu1 %1209 }
 0x14e   : > { %1298 = vst.msk [vmem:[#allocation3 + $0x40] sm:$0xff] %vm1289_vm7, %v1210_v1  ;;  %v1212_v38 = vpop.permute.xlu0 %1211  ;;  %v1345_v1 = vld [vmem:[#allocation2 + $0x138] sm:$0xff] }
 0x14f   : > { %650 = vrot.lane.b32.xlu1 %v1723_v2, %s2794_s20  ;;  %1299 = vst.msk [vmem:[#allocation3 + $0x48] sm:$0xff] %vm1289_vm7, %v1212_v38  ;;  %v1730_v2 = vld [vmem:[#allocation2 + $0x12a] sm:$0xff] }
 0x150   : > { %652 = vrot.lane.b32.xlu0 %v1724_v24, %s2794_s20 }
 0x151   : > { %v635_v29 = vpop.permute.xlu1 %634  ;;  %v1908_v33 = vld [vmem:[#allocation3 + $0x30] sm:$0xff] }
 0x152   : > { %721 = vst.msk [vmem:[#allocation3 + $0x50] sm:$0xff] %vm710_vm4, %v635_v29  ;;  %2702 = vmatprep.mubr.msk.f32.mxu0 %vm1943_vm11, %v1908_v33  ;;  %v637_v34 = vpop.permute.xlu0 %636  ;;  %v1909_v35 = vld [vmem:[#allocation3 + $0x38] sm:$0xff]  ;;  %v1346_v33 = vld [vmem:[#allocation2 + $0x140] sm:$0xff] }
 0x153   : > { %1419 = vrot.lane.b32.xlu1 %v3065_v0, %s2798_s28  ;;  %722 = vst.msk [vmem:[#allocation3 + $0x58] sm:$0xff] %vm710_vm4, %v637_v34  ;;  %2703 = vmatmul.mubr.msk.f32.gmra.mrb[6].mxu0 %vm1943_vm11, %v1909_v35 }
 0x154   : > { %1421 = vrot.lane.b32.xlu0 %v3089_v6, %s2798_s28 }
 0x155   : > { %v1404_v36 = vpop.permute.xlu1 %1403 }
 0x156   : > { %1492 = vst.msk [vmem:[#allocation3 + $0x40] sm:$0xff] %vm1483_vm8, %v1404_v36  ;;  %v1406_v37 = vpop.permute.xlu0 %1405 }
 0x157   : > { %843 = vrot.lane.b32.xlu1 %v3065_v0, %s2795_s21  ;;  %1493 = vst.msk [vmem:[#allocation3 + $0x48] sm:$0xff] %vm1483_vm8, %v1406_v37 }
 0x158   : > { %845 = vrot.lane.b32.xlu0 %v3089_v6, %s2795_s21  ;;  %v1725_v6 = vld [vmem:[#allocation2 + $0xf2] sm:$0xff] }
 0x159   : > { %v828_v46 = vpop.permute.xlu1 %827 }
 0x15a   : > { %914 = vst.msk [vmem:[#allocation3 + $0x50] sm:$0xff] %vm903_vm5, %v828_v46  ;;  %v830_v58 = vpop.permute.xlu0 %829 }
 0x15b   : > { %1612 = vrot.lane.b32.xlu1 %v1532_v39, %s2799_s10  ;;  %915 = vst.msk [vmem:[#allocation3 + $0x58] sm:$0xff] %vm903_vm5, %v830_v58 }
 0x15c   : > { %1614 = vrot.lane.b32.xlu0 %v1533_v50, %s2799_s10 }
 0x15d   : > { %v1597_v61 = vpop.permute.xlu1 %1596 }
 0x15e   : > { %1685 = vst.msk [vmem:[#allocation3 + $0x40] sm:$0xff] %vm1676_vm9, %v1597_v61  ;;  %v1599_v0 = vpop.permute.xlu0 %1598 }
 0x15f   : > { %1036 = vrot.lane.b32.xlu1 %v1532_v39, %s2796_s22  ;;  %1686 = vst.msk [vmem:[#allocation3 + $0x48] sm:$0xff] %vm1676_vm9, %v1599_v0  ;;  %v1538_v39 = vld [vmem:[#allocation2 + $0x139] sm:$0xff] }
 0x160   : > { %1038 = vrot.lane.b32.xlu0 %v1533_v50, %s2796_s22  ;;  %v1539_v50 = vld [vmem:[#allocation2 + $0x141] sm:$0xff] }
 0x161   : > { %v1021_v55 = vpop.permute.xlu1 %1020 }
 0x162   : > { %1107 = vst.msk [vmem:[#allocation3 + $0x50] sm:$0xff] %vm1096_vm6, %v1021_v55  ;;  %v1023_v40 = vpop.permute.xlu0 %1022 }
 0x163   : > { %1805 = vrot.lane.b32.xlu1 %v1725_v6, %s2800_s25  ;;  %1108 = vst.msk [vmem:[#allocation3 + $0x58] sm:$0xff] %vm1096_vm6, %v1023_v40 }
 0x164   : > { %1807 = vrot.lane.b32.xlu0 %v1726_v49, %s2800_s25 }
 0x165   : > { %v1790_v42 = vpop.permute.xlu1 %1789 }
 0x166   : > { %1878 = vst.msk [vmem:[#allocation3 + $0x40] sm:$0xff] %vm1869_vm10, %v1790_v42  ;;  %v1792_v53 = vpop.permute.xlu0 %1791 }
 0x167   : > { %1229 = vrot.lane.b32.xlu1 %v1725_v6, %s2797_s23  ;;  %1879 = vst.msk [vmem:[#allocation3 + $0x48] sm:$0xff] %vm1869_vm10, %v1792_v53 }
 0x168   : > { %1231 = vrot.lane.b32.xlu0 %v1726_v49, %s2797_s23 }
 0x169   : > { %v1214_v5 = vpop.permute.xlu1 %1213 }
 0x16a   : > { %1300 = vst.msk [vmem:[#allocation3 + $0x50] sm:$0xff] %vm1289_vm7, %v1214_v5  ;;  %v1216_v3 = vpop.permute.xlu0 %1215 }
 0x16b   : > { %654 = vrot.lane.b32.xlu1 %v1725_v6, %s2794_s20  ;;  %1301 = vst.msk [vmem:[#allocation3 + $0x58] sm:$0xff] %vm1289_vm7, %v1216_v3  ;;  %v1731_v6 = vld [vmem:[#allocation2 + $0x13a] sm:$0xff] }
 0x16c   : > { %656 = vrot.lane.b32.xlu0 %v1726_v49, %s2794_s20  ;;  %v1732_v49 = vld [vmem:[#allocation2 + $0x142] sm:$0xff] }
 0x16d   : > { %v639_v32 = vpop.permute.xlu1 %638  ;;  %v1910_v44 = vld [vmem:[#allocation3 + $0x40] sm:$0xff] }
 0x16e   : > { %723 = vst.msk [vmem:[#allocation3 + $0x60] sm:$0xff] %vm710_vm4, %v639_v32  ;;  %2705 = vmatprep.mubr.msk.f32.mxu0 %vm1943_vm11, %v1910_v44  ;;  %v641_v25 = vpop.permute.xlu0 %640  ;;  %v1911_v27 = vld [vmem:[#allocation3 + $0x48] sm:$0xff]  ;;  %v1347_v32 = vld [vmem:[#allocation2 + $0x150] sm:$0xff] }
 0x16f   : > { %1423 = vrot.lane.b32.xlu1 %v3081_v4, %s2798_s28  ;;  %724 = vst.msk [vmem:[#allocation3 + $0x68] sm:$0xff] %vm710_vm4, %v641_v25  ;;  %2706 = vmatmul.mubr.msk.f32.gmra.mrb[8].mxu0 %vm1943_vm11, %v1911_v27  ;;  %v1348_v27 = vld [vmem:[#allocation2 + $0x158] sm:$0xff] }
 0x170   : > { %1425 = vrot.lane.b32.xlu0 %v3102_v10, %s2798_s28 }
 0x171   : > { %v1408_v7 = vpop.permute.xlu1 %1407 }
 0x172   : > { %1494 = vst.msk [vmem:[#allocation3 + $0x50] sm:$0xff] %vm1483_vm8, %v1408_v7  ;;  %v1410_v12 = vpop.permute.xlu0 %1409 }
 0x173   : > { %847 = vrot.lane.b32.xlu1 %v3081_v4, %s2795_s21  ;;  %1495 = vst.msk [vmem:[#allocation3 + $0x58] sm:$0xff] %vm1483_vm8, %v1410_v12 }
 0x174   : > { %849 = vrot.lane.b32.xlu0 %v3102_v10, %s2795_s21  ;;  %v1727_v10 = vld [vmem:[#allocation2 + $0x10a] sm:$0xff] }
 0x175   : > { %v832_v15 = vpop.permute.xlu1 %831 }
 0x176   : > { %916 = vst.msk [vmem:[#allocation3 + $0x60] sm:$0xff] %vm903_vm5, %v832_v15  ;;  %v834_v54 = vpop.permute.xlu0 %833 }
 0x177   : > { %1616 = vrot.lane.b32.xlu1 %v1534_v13, %s2799_s10  ;;  %917 = vst.msk [vmem:[#allocation3 + $0x68] sm:$0xff] %vm903_vm5, %v834_v54 }
 0x178   : > { %1618 = vrot.lane.b32.xlu0 %v1535_v60, %s2799_s10 }
 0x179   : > { %v1601_v4 = vpop.permute.xlu1 %1600 }
 0x17a   : > { %1687 = vst.msk [vmem:[#allocation3 + $0x50] sm:$0xff] %vm1676_vm9, %v1601_v4  ;;  %v1603_v63 = vpop.permute.xlu0 %1602 }
 0x17b   : > { %1040 = vrot.lane.b32.xlu1 %v1534_v13, %s2796_s22  ;;  %1688 = vst.msk [vmem:[#allocation3 + $0x58] sm:$0xff] %vm1676_vm9, %v1603_v63 }
 0x17c   : > { %1042 = vrot.lane.b32.xlu0 %v1535_v60, %s2796_s22  ;;  %v1541_v60 = vld [vmem:[#allocation2 + $0x159] sm:$0xff] }
 0x17d   : > { %v1025_v57 = vpop.permute.xlu1 %1024 }
 0x17e   : > { %1109 = vst.msk [vmem:[#allocation3 + $0x60] sm:$0xff] %vm1096_vm6, %v1025_v57  ;;  %v1027_v45 = vpop.permute.xlu0 %1026 }
 0x17f   : > { %1809 = vrot.lane.b32.xlu1 %v1727_v10, %s2800_s25  ;;  %1110 = vst.msk [vmem:[#allocation3 + $0x68] sm:$0xff] %vm1096_vm6, %v1027_v45 }
 0x180   : > { %1811 = vrot.lane.b32.xlu0 %v1728_v16, %s2800_s25 }
 0x181   : > { %v1794_v9 = vpop.permute.xlu1 %1793 }
 0x182   : > { %1880 = vst.msk [vmem:[#allocation3 + $0x50] sm:$0xff] %vm1869_vm10, %v1794_v9  ;;  %v1796_v17 = vpop.permute.xlu0 %1795 }
 0x183   : > { %1233 = vrot.lane.b32.xlu1 %v1727_v10, %s2797_s23  ;;  %1881 = vst.msk [vmem:[#allocation3 + $0x58] sm:$0xff] %vm1869_vm10, %v1796_v17 }
 0x184   : > { %1235 = vrot.lane.b32.xlu0 %v1728_v16, %s2797_s23 }
 0x185   : > { %v1218_v18 = vpop.permute.xlu1 %1217 }
 0x186   : > { %1302 = vst.msk [vmem:[#allocation3 + $0x60] sm:$0xff] %vm1289_vm7, %v1218_v18  ;;  %v1220_v41 = vpop.permute.xlu0 %1219 }
 0x187   : > { %658 = vrot.lane.b32.xlu1 %v1727_v10, %s2794_s20  ;;  %1303 = vst.msk [vmem:[#allocation3 + $0x68] sm:$0xff] %vm1289_vm7, %v1220_v41  ;;  %v1733_v10 = vld [vmem:[#allocation2 + $0x152] sm:$0xff] }
 0x188   : > { %660 = vrot.lane.b32.xlu0 %v1728_v16, %s2794_s20  ;;  %v1734_v16 = vld [vmem:[#allocation2 + $0x15a] sm:$0xff] }
 0x189   : > { %v643_v52 = vpop.permute.xlu1 %642  ;;  %v1912_v26 = vld [vmem:[#allocation3 + $0x50] sm:$0xff] }
 0x18a   : > { %725 = vst.msk [vmem:[#allocation3 + $0x70] sm:$0xff] %vm710_vm4, %v643_v52  ;;  %2708 = vmatprep.mubr.msk.f32.mxu0 %vm1943_vm11, %v1912_v26  ;;  %v645_v31 = vpop.permute.xlu0 %644  ;;  %v1913_v19 = vld [vmem:[#allocation3 + $0x58] sm:$0xff] }
 0x18b   : > { %1427 = vrot.lane.b32.xlu1 %v3094_v8, %s2798_s28  ;;  %726 = vst.msk [vmem:[#allocation3 + $0x78] sm:$0xff] %vm710_vm4, %v645_v31  ;;  %2709 = vmatmul.mubr.msk.f32.gmra.mrb[10].mxu0 %vm1943_vm11, %v1913_v19 }
 0x18c   : > { %1429 = vrot.lane.b32.xlu0 %v3110_v14, %s2798_s28 }
 0x18d   : > { %v1412_v20 = vpop.permute.xlu1 %1411 }
 0x18e   : > { %1496 = vst.msk [vmem:[#allocation3 + $0x60] sm:$0xff] %vm1483_vm8, %v1412_v20  ;;  %v1414_v21 = vpop.permute.xlu0 %1413 }
 0x18f   : > { %851 = vrot.lane.b32.xlu1 %v3094_v8, %s2795_s21  ;;  %1497 = vst.msk [vmem:[#allocation3 + $0x68] sm:$0xff] %vm1483_vm8, %v1414_v21  ;;  %v1349_v21 = vld [vmem:[#allocation2 + $0x168] sm:$0xff] }
 0x190   : > { %853 = vrot.lane.b32.xlu0 %v3110_v14, %s2795_s21  ;;  %v1729_v14 = vld [vmem:[#allocation2 + $0x122] sm:$0xff] }
 0x191   : > { %v836_v48 = vpop.permute.xlu1 %835 }
 0x192   : > { %918 = vst.msk [vmem:[#allocation3 + $0x70] sm:$0xff] %vm903_vm5, %v836_v48  ;;  %v838_v56 = vpop.permute.xlu0 %837 }
 0x193   : > { %1620 = vrot.lane.b32.xlu1 %v1536_v47, %s2799_s10  ;;  %919 = vst.msk [vmem:[#allocation3 + $0x78] sm:$0xff] %vm903_vm5, %v838_v56 }
 0x194   : > { %1622 = vrot.lane.b32.xlu0 %v1537_v22, %s2799_s10 }
 0x195   : > { %v1605_v59 = vpop.permute.xlu1 %1604 }
 0x196   : > { %1689 = vst.msk [vmem:[#allocation3 + $0x60] sm:$0xff] %vm1676_vm9, %v1605_v59  ;;  %v1607_v8 = vpop.permute.xlu0 %1606 }
 0x197   : > { %1044 = vrot.lane.b32.xlu1 %v1536_v47, %s2796_s22  ;;  %1690 = vst.msk [vmem:[#allocation3 + $0x68] sm:$0xff] %vm1676_vm9, %v1607_v8 }
 0x198   : > { %1046 = vrot.lane.b32.xlu0 %v1537_v22, %s2796_s22  ;;  %v1350_v22 = vld [vmem:[#allocation2 + $0x170] sm:$0xff] }
 0x199   : > { %v1029_v62 = vpop.permute.xlu1 %1028 }
 0x19a   : > { %1111 = vst.msk [vmem:[#allocation3 + $0x70] sm:$0xff] %vm1096_vm6, %v1029_v62  ;;  %v1031_v23 = vpop.permute.xlu0 %1030  ;;  %v1542_v62 = vld [vmem:[#allocation2 + $0x169] sm:$0xff] }
 0x19b   : > { %1813 = vrot.lane.b32.xlu1 %v1729_v14, %s2800_s25  ;;  %1112 = vst.msk [vmem:[#allocation3 + $0x78] sm:$0xff] %vm1096_vm6, %v1031_v23  ;;  %v1543_v23 = vld [vmem:[#allocation2 + $0x171] sm:$0xff] }
 0x19c   : > { %1815 = vrot.lane.b32.xlu0 %v1730_v2, %s2800_s25 }
 0x19d   : > { %v1798_v24 = vpop.permute.xlu1 %1797 }
 0x19e   : > { %1882 = vst.msk [vmem:[#allocation3 + $0x60] sm:$0xff] %vm1869_vm10, %v1798_v24  ;;  %v1800_v28 = vpop.permute.xlu0 %1799 }
 0x19f   : > { %1237 = vrot.lane.b32.xlu1 %v1729_v14, %s2797_s23  ;;  %1883 = vst.msk [vmem:[#allocation3 + $0x68] sm:$0xff] %vm1869_vm10, %v1800_v28 }
 0x1a0   : > { %1239 = vrot.lane.b32.xlu0 %v1730_v2, %s2797_s23 }
 0x1a1   : > { %v1222_v30 = vpop.permute.xlu1 %1221 }
 0x1a2   : > { %1304 = vst.msk [vmem:[#allocation3 + $0x70] sm:$0xff] %vm1289_vm7, %v1222_v30  ;;  %v1224_v51 = vpop.permute.xlu0 %1223 }
 0x1a3   : > { %662 = vrot.lane.b32.xlu1 %v1729_v14, %s2794_s20  ;;  %1305 = vst.msk [vmem:[#allocation3 + $0x78] sm:$0xff] %vm1289_vm7, %v1224_v51  ;;  %v1735_v51 = vld [vmem:[#allocation2 + $0x16a] sm:$0xff] }
 0x1a4   : > { %664 = vrot.lane.b32.xlu0 %v1730_v2, %s2794_s20 }
 0x1a5   : > { %v647_v38 = vpop.permute.xlu1 %646  ;;  %v1914_v29 = vld [vmem:[#allocation3 + $0x60] sm:$0xff] }
 0x1a6   : > { %727 = vst.msk [vmem:[#allocation3 + $0x80] sm:$0xff] %vm710_vm4, %v647_v38  ;;  %2711 = vmatprep.mubr.msk.f32.mxu0 %vm1943_vm11, %v1914_v29  ;;  %v649_v34 = vpop.permute.xlu0 %648  ;;  %v1915_v35 = vld [vmem:[#allocation3 + $0x68] sm:$0xff] }
 0x1a7   : > { %1431 = vrot.lane.b32.xlu1 %v1345_v1, %s2798_s28  ;;  %728 = vst.msk [vmem:[#allocation3 + $0x88] sm:$0xff] %vm710_vm4, %v649_v34  ;;  %2712 = vmatmul.mubr.msk.f32.gmra.mrb[12].mxu0 %vm1943_vm11, %v1915_v35  ;;  %v1736_v38 = vld [vmem:[#allocation2 + $0x172] sm:$0xff] }
 0x1a8   : > { %1433 = vrot.lane.b32.xlu0 %v1346_v33, %s2798_s28 }
 0x1a9   : > { %v1416_v36 = vpop.permute.xlu1 %1415 }
 0x1aa   : > { %1498 = vst.msk [vmem:[#allocation3 + $0x70] sm:$0xff] %vm1483_vm8, %v1416_v36  ;;  %v1418_v37 = vpop.permute.xlu0 %1417 }
 0x1ab   : > { %855 = vrot.lane.b32.xlu1 %v1345_v1, %s2795_s21  ;;  %1499 = vst.msk [vmem:[#allocation3 + $0x78] sm:$0xff] %vm1483_vm8, %v1418_v37 }
 0x1ac   : > { %857 = vrot.lane.b32.xlu0 %v1346_v33, %s2795_s21 }
 0x1ad   : > { %v840_v46 = vpop.permute.xlu1 %839 }
 0x1ae   : > { %920 = vst.msk [vmem:[#allocation3 + $0x80] sm:$0xff] %vm903_vm5, %v840_v46  ;;  %v842_v58 = vpop.permute.xlu0 %841 }
 0x1af   : > { %1624 = vrot.lane.b32.xlu1 %v1538_v39, %s2799_s10  ;;  %921 = vst.msk [vmem:[#allocation3 + $0x88] sm:$0xff] %vm903_vm5, %v842_v58 }
 0x1b0   : > { %1626 = vrot.lane.b32.xlu0 %v1539_v50, %s2799_s10 }
 0x1b1   : > { %v1609_v61 = vpop.permute.xlu1 %1608 }
 0x1b2   : > { %1691 = vst.msk [vmem:[#allocation3 + $0x70] sm:$0xff] %vm1676_vm9, %v1609_v61  ;;  %v1611_v0 = vpop.permute.xlu0 %1610 }
 0x1b3   : > { %1048 = vrot.lane.b32.xlu1 %v1538_v39, %s2796_s22  ;;  %1692 = vst.msk [vmem:[#allocation3 + $0x78] sm:$0xff] %vm1676_vm9, %v1611_v0  ;;  %v1351_v0 = vld [vmem:[#allocation2 + $0x180] sm:$0xff] }
 0x1b4   : > { %1050 = vrot.lane.b32.xlu0 %v1539_v50, %s2796_s22 }
 0x1b5   : > { %v1033_v55 = vpop.permute.xlu1 %1032 }
 0x1b6   : > { %1113 = vst.msk [vmem:[#allocation3 + $0x80] sm:$0xff] %vm1096_vm6, %v1033_v55  ;;  %v1035_v40 = vpop.permute.xlu0 %1034 }
 0x1b7   : > { %1817 = vrot.lane.b32.xlu1 %v1731_v6, %s2800_s25  ;;  %1114 = vst.msk [vmem:[#allocation3 + $0x88] sm:$0xff] %vm1096_vm6, %v1035_v40 }
 0x1b8   : > { %1819 = vrot.lane.b32.xlu0 %v1732_v49, %s2800_s25 }
 0x1b9   : > { %v1802_v42 = vpop.permute.xlu1 %1801 }
 0x1ba   : > { %1884 = vst.msk [vmem:[#allocation3 + $0x70] sm:$0xff] %vm1869_vm10, %v1802_v42  ;;  %v1804_v53 = vpop.permute.xlu0 %1803 }
 0x1bb   : > { %1241 = vrot.lane.b32.xlu1 %v1731_v6, %s2797_s23  ;;  %1885 = vst.msk [vmem:[#allocation3 + $0x78] sm:$0xff] %vm1869_vm10, %v1804_v53 }
 0x1bc   : > { %1243 = vrot.lane.b32.xlu0 %v1732_v49, %s2797_s23 }
 0x1bd   : > { %v1226_v5 = vpop.permute.xlu1 %1225 }
 0x1be   : > { %1306 = vst.msk [vmem:[#allocation3 + $0x80] sm:$0xff] %vm1289_vm7, %v1226_v5  ;;  %v1228_v3 = vpop.permute.xlu0 %1227 }
 0x1bf   : > { %666 = vrot.lane.b32.xlu1 %v1731_v6, %s2794_s20  ;;  %1307 = vst.msk [vmem:[#allocation3 + $0x88] sm:$0xff] %vm1289_vm7, %v1228_v3  ;;  %v1544_v3 = vld [vmem:[#allocation2 + $0x181] sm:$0xff] }
 0x1c0   : > { %668 = vrot.lane.b32.xlu0 %v1732_v49, %s2794_s20  ;;  %v1352_v49 = vld [vmem:[#allocation2 + $0x188] sm:$0xff] }
 0x1c1   : > { %v651_v44 = vpop.permute.xlu1 %650  ;;  %v1916_v25 = vld [vmem:[#allocation3 + $0x70] sm:$0xff] }
 0x1c2   : > { %729 = vst.msk [vmem:[#allocation3 + $0x90] sm:$0xff] %vm710_vm4, %v651_v44  ;;  %2714 = vmatprep.mubr.msk.f32.mxu0 %vm1943_vm11, %v1916_v25  ;;  %v653_v7 = vpop.permute.xlu0 %652  ;;  %v1917_v11 = vld [vmem:[#allocation3 + $0x78] sm:$0xff] }
 0x1c3   : > { %1435 = vrot.lane.b32.xlu1 %v1347_v32, %s2798_s28  ;;  %730 = vst.msk [vmem:[#allocation3 + $0x98] sm:$0xff] %vm710_vm4, %v653_v7  ;;  %2715 = vmatmul.mubr.msk.f32.gmra.mrb[14].mxu0 %vm1943_vm11, %v1917_v11  ;;  %v1545_v44 = vld [vmem:[#allocation2 + $0x189] sm:$0xff] }
 0x1c4   : > { %1437 = vrot.lane.b32.xlu0 %v1348_v27, %s2798_s28  ;;  %v1737_v11 = vld [vmem:[#allocation2 + $0x182] sm:$0xff] }
 0x1c5   : > { %v1420_v12 = vpop.permute.xlu1 %1419 }
 0x1c6   : > { %1500 = vst.msk [vmem:[#allocation3 + $0x80] sm:$0xff] %vm1483_vm8, %v1420_v12  ;;  %v1422_v13 = vpop.permute.xlu0 %1421 }
 0x1c7   : > { %859 = vrot.lane.b32.xlu1 %v1347_v32, %s2795_s21  ;;  %1501 = vst.msk [vmem:[#allocation3 + $0x88] sm:$0xff] %vm1483_vm8, %v1422_v13  ;;  %v1738_v13 = vld [vmem:[#allocation2 + $0x18a] sm:$0xff] }
 0x1c8   : > { %861 = vrot.lane.b32.xlu0 %v1348_v27, %s2795_s21 }
 0x1c9   : > { %v844_v15 = vpop.permute.xlu1 %843 }
 0x1ca   : > { %922 = vst.msk [vmem:[#allocation3 + $0x90] sm:$0xff] %vm903_vm5, %v844_v15  ;;  %v846_v54 = vpop.permute.xlu0 %845 }
 0x1cb   : > { %1628 = vrot.lane.b32.xlu1 %v1540_v43, %s2799_s10  ;;  %923 = vst.msk [vmem:[#allocation3 + $0x98] sm:$0xff] %vm903_vm5, %v846_v54 }
 0x1cc   : > { %1630 = vrot.lane.b32.xlu0 %v1541_v60, %s2799_s10 }
 0x1cd   : > { %v1613_v4 = vpop.permute.xlu1 %1612 }
 0x1ce   : > { %1693 = vst.msk [vmem:[#allocation3 + $0x80] sm:$0xff] %vm1676_vm9, %v1613_v4  ;;  %v1615_v63 = vpop.permute.xlu0 %1614 }
 0x1cf   : > { %1052 = vrot.lane.b32.xlu1 %v1540_v43, %s2796_s22  ;;  %1694 = vst.msk [vmem:[#allocation3 + $0x88] sm:$0xff] %vm1676_vm9, %v1615_v63 }
 0x1d0   : > { %1054 = vrot.lane.b32.xlu0 %v1541_v60, %s2796_s22 }
 0x1d1   : > { %v1037_v57 = vpop.permute.xlu1 %1036 }
 0x1d2   : > { %1115 = vst.msk [vmem:[#allocation3 + $0x90] sm:$0xff] %vm1096_vm6, %v1037_v57  ;;  %v1039_v45 = vpop.permute.xlu0 %1038  ;;  %v3607_v9 = vpop.f32.mrb[0].mxu0  ;;  %v1353_v57 = vld [vmem:[#allocation2 + $0x198] sm:$0xff] }
 0x1d3   : > { %1821 = vrot.lane.b32.xlu1 %v1733_v10, %s2800_s25  ;;  %1116 = vst.msk [vmem:[#allocation3 + $0x98] sm:$0xff] %vm1096_vm6, %v1039_v45  ;;  %v2266_v17 = vsel %vm182_vm0, %v3607_v9, 0.0  ;;  %v3615_v18 = vpop.f32.mrb[1].mxu0 }
 0x1d4   : > { %2471 = vst.msk [vmem:[%s3603_s27 + $0x8] sm:$0xff] %vm182_vm0, %v3607_v9  ;;  %1823 = vrot.lane.b32.xlu0 %v1734_v16, %s2800_s25  ;;  %v2265_v52 = vsel %vm182_vm0, %v3615_v18, 0.0  ;;  %2470 = vst.msk [vmem:[%s3603_s27] sm:$0xff] %vm182_vm0, %v3615_v18 }
 0x1d5   : > { %v1806_v41 = vpop.permute.xlu1 %1805  ;;  %v2267_v26 = vadd.f32 %v2266_v17, %v2265_v52 }
 0x1d6   : > { %1886 = vst.msk [vmem:[#allocation3 + $0x80] sm:$0xff] %vm1869_vm10, %v1806_v41  ;;  %v1808_v31 = vpop.permute.xlu0 %1807  ;;  %v1546_v41 = vld [vmem:[#allocation2 + $0x199] sm:$0xff] }
 0x1d7   : > { %1245 = vrot.lane.b32.xlu1 %v1733_v10, %s2797_s23  ;;  %1887 = vst.msk [vmem:[#allocation3 + $0x88] sm:$0xff] %vm1869_vm10, %v1808_v31 }
 0x1d8   : > { %1247 = vrot.lane.b32.xlu0 %v1734_v16, %s2797_s23 }
 0x1d9   : > { %v1230_v19 = vpop.permute.xlu1 %1229 }
 0x1da   : > { %1308 = vst.msk [vmem:[#allocation3 + $0x90] sm:$0xff] %vm1289_vm7, %v1230_v19  ;;  %v1232_v20 = vpop.permute.xlu0 %1231 }
 0x1db   : > { %670 = vrot.lane.b32.xlu1 %v1733_v10, %s2794_s20  ;;  %1309 = vst.msk [vmem:[#allocation3 + $0x98] sm:$0xff] %vm1289_vm7, %v1232_v20  ;;  %v1739_v20 = vld [vmem:[#allocation2 + $0x19a] sm:$0xff] }
 0x1dc   : > { %672 = vrot.lane.b32.xlu0 %v1734_v16, %s2794_s20 }
 0x1dd   : > { %v655_v47 = vpop.permute.xlu1 %654  ;;  %v1918_v48 = vld [vmem:[#allocation3 + $0x80] sm:$0xff] }
 0x1de   : > { %731 = vst.msk [vmem:[#allocation3 + $0xa0] sm:$0xff] %vm710_vm4, %v655_v47  ;;  %2717 = vmatprep.mubr.msk.f32.mxu1 %vm1943_vm11, %v1918_v48  ;;  %v657_v56 = vpop.permute.xlu0 %656  ;;  %v1919_v59 = vld [vmem:[#allocation3 + $0x88] sm:$0xff]  ;;  %v1547_v48 = vld [vmem:[#allocation2 + $0x1a1] sm:$0xff] }
 0x1df   : > { %1439 = vrot.lane.b32.xlu1 %v1349_v21, %s2798_s28  ;;  %732 = vst.msk [vmem:[#allocation3 + $0xa8] sm:$0xff] %vm710_vm4, %v657_v56  ;;  %2718 = vmatmul.mubr.msk.f32.vlgmr.msra.gmra.mrb[0].mxu1 %vm1943_vm11, %v1919_v59  ;;  %v1740_v59 = vld [vmem:[#allocation2 + $0x1a2] sm:$0xff] }
 0x1e0   : > { %1441 = vrot.lane.b32.xlu0 %v1350_v22, %s2798_s28 }
 0x1e1   : > { %v1424_v8 = vpop.permute.xlu1 %1423 }
 0x1e2   : > { %1502 = vst.msk [vmem:[#allocation3 + $0x90] sm:$0xff] %vm1483_vm8, %v1424_v8  ;;  %v1426_v14 = vpop.permute.xlu0 %1425 }
 0x1e3   : > { %863 = vrot.lane.b32.xlu1 %v1349_v21, %s2795_s21  ;;  %1503 = vst.msk [vmem:[#allocation3 + $0x98] sm:$0xff] %vm1483_vm8, %v1426_v14 }
 0x1e4   : > { %865 = vrot.lane.b32.xlu0 %v1350_v22, %s2795_s21 }
 0x1e5   : > { %v848_v2 = vpop.permute.xlu1 %847 }
 0x1e6   : > { %924 = vst.msk [vmem:[#allocation3 + $0xa0] sm:$0xff] %vm903_vm5, %v848_v2  ;;  %v850_v24 = vpop.permute.xlu0 %849 }
 0x1e7   : > { %1632 = vrot.lane.b32.xlu1 %v1542_v62, %s2799_s10  ;;  %925 = vst.msk [vmem:[#allocation3 + $0xa8] sm:$0xff] %vm903_vm5, %v850_v24 }
 0x1e8   : > { %1634 = vrot.lane.b32.xlu0 %v1543_v23, %s2799_s10 }
 0x1e9   : > { %v1617_v28 = vpop.permute.xlu1 %1616 }
 0x1ea   : > { %1695 = vst.msk [vmem:[#allocation3 + $0x90] sm:$0xff] %vm1676_vm9, %v1617_v28  ;;  %v1619_v30 = vpop.permute.xlu0 %1618 }
 0x1eb   : > { %1056 = vrot.lane.b32.xlu1 %v1542_v62, %s2796_s22  ;;  %1696 = vst.msk [vmem:[#allocation3 + $0x98] sm:$0xff] %vm1676_vm9, %v1619_v30 }
 0x1ec   : > { %1058 = vrot.lane.b32.xlu0 %v1543_v23, %s2796_s22 }
 0x1ed   : > { %v1041_v1 = vpop.permute.xlu1 %1040 }
 0x1ee   : > { %1117 = vst.msk [vmem:[#allocation3 + $0xa0] sm:$0xff] %vm1096_vm6, %v1041_v1  ;;  %v1043_v29 = vpop.permute.xlu0 %1042  ;;  %v3651_v33 = vpop.f32.mrb[2].mxu0 }
 0x1ef   : > { %1825 = vrot.lane.b32.xlu1 %v1735_v51, %s2800_s25  ;;  %1118 = vst.msk [vmem:[#allocation3 + $0xa8] sm:$0xff] %vm1096_vm6, %v1043_v29  ;;  %v3657_v34 = vpop.f32.mrb[3].mxu0  ;;  %v2270_v35 = vsel %vm182_vm0, %v3651_v33, 0.0 }
 0x1f0   : > { %2473 = vst.msk [vmem:[%s3603_s27 + $0x18] sm:$0xff] %vm182_vm0, %v3651_v33  ;;  %v2268_v36 = vsel %vm182_vm0, %v3657_v34, 0.0  ;;  %2472 = vst.msk [vmem:[%s3603_s27 + $0x10] sm:$0xff] %vm182_vm0, %v3657_v34  ;;  %1827 = vrot.lane.b32.xlu0 %v1736_v38, %s2800_s25 }
 0x1f1   : > { %v1810_v37 = vpop.permute.xlu1 %1809  ;;  %v2269_v39 = vadd.f32 %v2268_v36, %v2267_v26  ;;  %v1354_v26 = vld [vmem:[#allocation2 + $0x1a0] sm:$0xff] }
 0x1f2   : > { %1888 = vst.msk [vmem:[#allocation3 + $0x90] sm:$0xff] %vm1869_vm10, %v1810_v37  ;;  %v1812_v46 = vpop.permute.xlu0 %1811 }
 0x1f3   : > { %1249 = vrot.lane.b32.xlu1 %v1735_v51, %s2797_s23  ;;  %1889 = vst.msk [vmem:[#allocation3 + $0x98] sm:$0xff] %vm1869_vm10, %v1812_v46  ;;  %v2271_v50 = vadd.f32 %v2270_v35, %v2269_v39 }
 0x1f4   : > { %1251 = vrot.lane.b32.xlu0 %v1736_v38, %s2797_s23 }
 0x1f5   : > { %v1234_v58 = vpop.permute.xlu1 %1233 }
 0x1f6   : > { %1310 = vst.msk [vmem:[#allocation3 + $0xa0] sm:$0xff] %vm1289_vm7, %v1234_v58  ;;  %v1236_v61 = vpop.permute.xlu0 %1235 }
 0x1f7   : > { %674 = vrot.lane.b32.xlu1 %v1735_v51, %s2794_s20  ;;  %1311 = vst.msk [vmem:[#allocation3 + $0xa8] sm:$0xff] %vm1289_vm7, %v1236_v61 }
 0x1f8   : > { %676 = vrot.lane.b32.xlu0 %v1736_v38, %s2794_s20 }
 0x1f9   : > { %v659_v6 = vpop.permute.xlu1 %658  ;;  %v1920_v55 = vld [vmem:[#allocation3 + $0x90] sm:$0xff] }
 0x1fa   : > { %733 = vst.msk [vmem:[#allocation3 + $0xb0] sm:$0xff] %vm710_vm4, %v659_v6  ;;  %2720 = vmatprep.mubr.msk.f32.mxu1 %vm1943_vm11, %v1920_v55  ;;  %v661_v40 = vpop.permute.xlu0 %660  ;;  %v1921_v42 = vld [vmem:[#allocation3 + $0x98] sm:$0xff] }
 0x1fb   : > { %1443 = vrot.lane.b32.xlu1 %v1351_v0, %s2798_s28  ;;  %734 = vst.msk [vmem:[#allocation3 + $0xb8] sm:$0xff] %vm710_vm4, %v661_v40  ;;  %2721 = vmatmul.mubr.msk.f32.gmra.mrb[2].mxu1 %vm1943_vm11, %v1921_v42 }
 0x1fc   : > { %1445 = vrot.lane.b32.xlu0 %v1352_v49, %s2798_s28 }
 0x1fd   : > { %v1428_v53 = vpop.permute.xlu1 %1427 }
 0x1fe   : > { %1504 = vst.msk [vmem:[#allocation3 + $0xa0] sm:$0xff] %vm1483_vm8, %v1428_v53  ;;  %v1430_v5 = vpop.permute.xlu0 %1429 }
 0x1ff   : > { %867 = vrot.lane.b32.xlu1 %v1351_v0, %s2795_s21  ;;  %1505 = vst.msk [vmem:[#allocation3 + $0xa8] sm:$0xff] %vm1483_vm8, %v1430_v5 }
 0x200   : > { %869 = vrot.lane.b32.xlu0 %v1352_v49, %s2795_s21 }
 0x201   : > { %v852_v32 = vpop.permute.xlu1 %851 }
 0x202   : > { %926 = vst.msk [vmem:[#allocation3 + $0xb0] sm:$0xff] %vm903_vm5, %v852_v32  ;;  %v854_v25 = vpop.permute.xlu0 %853 }
 0x203   : > { %1636 = vrot.lane.b32.xlu1 %v1544_v3, %s2799_s10  ;;  %927 = vst.msk [vmem:[#allocation3 + $0xb8] sm:$0xff] %vm903_vm5, %v854_v25 }
 0x204   : > { %1638 = vrot.lane.b32.xlu0 %v1545_v44, %s2799_s10 }
 0x205   : > { %v1621_v27 = vpop.permute.xlu1 %1620 }
 0x206   : > { %1697 = vst.msk [vmem:[#allocation3 + $0xa0] sm:$0xff] %vm1676_vm9, %v1621_v27  ;;  %v1623_v7 = vpop.permute.xlu0 %1622 }
 0x207   : > { %1060 = vrot.lane.b32.xlu1 %v1544_v3, %s2796_s22  ;;  %1698 = vst.msk [vmem:[#allocation3 + $0xa8] sm:$0xff] %vm1676_vm9, %v1623_v7 }
 0x208   : > { %1062 = vrot.lane.b32.xlu0 %v1545_v44, %s2796_s22  ;;  %s3959_s22 = scalar_lea.vmem %s4085_s3, %s2597_s15 }
 0x209   : > { %v1045_v12 = vpop.permute.xlu1 %1044 }
 0x20a   : > { %1119 = vst.msk [vmem:[#allocation3 + $0xb0] sm:$0xff] %vm1096_vm6, %v1045_v12  ;;  %v1047_v43 = vpop.permute.xlu0 %1046  ;;  %v3695_v15 = vpop.f32.mrb[4].mxu0 }
 0x20b   : > { %1829 = vrot.lane.b32.xlu1 %v1737_v11, %s2800_s25  ;;  %1120 = vst.msk [vmem:[#allocation3 + $0xb8] sm:$0xff] %vm1096_vm6, %v1047_v43  ;;  %v3701_v60 = vpop.f32.mrb[5].mxu0  ;;  %v2274_v54 = vsel %vm182_vm0, %v3695_v15, 0.0 }
 0x20c   : > { %2475 = vst.msk [vmem:[%s3603_s27 + $0x28] sm:$0xff] %vm182_vm0, %v3695_v15  ;;  %v2272_v4 = vsel %vm182_vm0, %v3701_v60, 0.0  ;;  %2474 = vst.msk [vmem:[%s3603_s27 + $0x20] sm:$0xff] %vm182_vm0, %v3701_v60  ;;  %1831 = vrot.lane.b32.xlu0 %v1738_v13, %s2800_s25 }
 0x20d   : > { %v1814_v63 = vpop.permute.xlu1 %1813  ;;  %v2273_v10 = vadd.f32 %v2272_v4, %v2271_v50 }
 0x20e   : > { %1890 = vst.msk [vmem:[#allocation3 + $0xa0] sm:$0xff] %vm1869_vm10, %v1814_v63  ;;  %v1816_v16 = vpop.permute.xlu0 %1815 }
 0x20f   : > { %1253 = vrot.lane.b32.xlu1 %v1737_v11, %s2797_s23  ;;  %1891 = vst.msk [vmem:[#allocation3 + $0xa8] sm:$0xff] %vm1869_vm10, %v1816_v16  ;;  %v2275_v45 = vadd.f32 %v2274_v54, %v2273_v10 }
 0x210   : > { %1447 = vrot.lane.b32.xlu0 %v1353_v57, %s2798_s28 }
 0x211   : > { %v1238_v17 = vpop.permute.xlu1 %1237 }
 0x212   : > { %1312 = vst.msk [vmem:[#allocation3 + $0xb0] sm:$0xff] %vm1289_vm7, %v1238_v17  ;;  %v1240_v52 = vpop.permute.xlu0 %1239 }
 0x213   : > { %1255 = vrot.lane.b32.xlu1 %v1738_v13, %s2797_s23  ;;  %1313 = vst.msk [vmem:[#allocation3 + $0xb8] sm:$0xff] %vm1289_vm7, %v1240_v52 }
 0x214   : > { %1640 = vrot.lane.b32.xlu0 %v1546_v41, %s2799_s10 }
 0x215   : > { %v663_v31 = vpop.permute.xlu1 %662  ;;  %v1922_v19 = vld [vmem:[#allocation3 + $0xa0] sm:$0xff] }
 0x216   : > { %735 = vst.msk [vmem:[#allocation3 + $0xc0] sm:$0xff] %vm710_vm4, %v663_v31  ;;  %2723 = vmatprep.mubr.msk.f32.mxu1 %vm1943_vm11, %v1922_v19  ;;  %v665_v21 = vpop.permute.xlu0 %664  ;;  %v1923_v47 = vld [vmem:[#allocation3 + $0xa8] sm:$0xff] }
 0x217   : > { %1449 = vrot.lane.b32.xlu1 %v1354_v26, %s2798_s28  ;;  %736 = vst.msk [vmem:[#allocation3 + $0xc8] sm:$0xff] %vm710_vm4, %v665_v21  ;;  %2724 = vmatmul.mubr.msk.f32.gmra.mrb[4].mxu1 %vm1943_vm11, %v1923_v47 }
 0x218   : > { %1833 = vrot.lane.b32.xlu0 %v1739_v20, %s2800_s25 }
 0x219   : > { %v1432_v22 = vpop.permute.xlu1 %1431 }
 0x21a   : > { %1506 = vst.msk [vmem:[#allocation3 + $0xb0] sm:$0xff] %vm1483_vm8, %v1432_v22  ;;  %v1434_v56 = vpop.permute.xlu0 %1433 }
 0x21b   : > { %1642 = vrot.lane.b32.xlu1 %v1547_v48, %s2799_s10  ;;  %1507 = vst.msk [vmem:[#allocation3 + $0xb8] sm:$0xff] %vm1483_vm8, %v1434_v56 }
 0x21d   : > { %v856_v8 = vpop.permute.xlu1 %855 }
 0x21e   : > { %928 = vst.msk [vmem:[#allocation3 + $0xc0] sm:$0xff] %vm903_vm5, %v856_v8  ;;  %v858_v14 = vpop.permute.xlu0 %857 }
 0x21f   : > { %1835 = vrot.lane.b32.xlu1 %v1740_v59, %s2800_s25  ;;  %929 = vst.msk [vmem:[#allocation3 + $0xc8] sm:$0xff] %vm903_vm5, %v858_v14 }
 0x221   : > { %v1625_v62 = vpop.permute.xlu1 %1624 }
 0x222   : > { %1699 = vst.msk [vmem:[#allocation3 + $0xb0] sm:$0xff] %vm1676_vm9, %v1625_v62  ;;  %v1627_v2 = vpop.permute.xlu0 %1626 }
 0x223   : > { %1700 = vst.msk [vmem:[#allocation3 + $0xb8] sm:$0xff] %vm1676_vm9, %v1627_v2 }
 0x225   : > { %v1049_v23 = vpop.permute.xlu1 %1048 }
 0x226   : > { %1121 = vst.msk [vmem:[#allocation3 + $0xc0] sm:$0xff] %vm1096_vm6, %v1049_v23  ;;  %v1051_v24 = vpop.permute.xlu0 %1050  ;;  %v3734_v28 = vpop.f32.mrb[6].mxu0 }
 0x227   : > { %1122 = vst.msk [vmem:[#allocation3 + $0xc8] sm:$0xff] %vm1096_vm6, %v1051_v24  ;;  %v3740_v30 = vpop.f32.mrb[7].mxu0  ;;  %v2278_v51 = vsel %vm182_vm0, %v3734_v28, 0.0 }
 0x228   : > { %2477 = vst.msk [vmem:[%s3603_s27 + $0x38] sm:$0xff] %vm182_vm0, %v3734_v28  ;;  %v2276_v1 = vsel %vm182_vm0, %v3740_v30, 0.0  ;;  %2476 = vst.msk [vmem:[%s3603_s27 + $0x30] sm:$0xff] %vm182_vm0, %v3740_v30 }
 0x229   : > { %v1818_v38 = vpop.permute.xlu1 %1817  ;;  %v2277_v29 = vadd.f32 %v2276_v1, %v2275_v45 }
 0x22a   : > { %1892 = vst.msk [vmem:[#allocation3 + $0xb0] sm:$0xff] %vm1869_vm10, %v1818_v38  ;;  %v1820_v35 = vpop.permute.xlu0 %1819 }
 0x22b   : > { %1893 = vst.msk [vmem:[#allocation3 + $0xb8] sm:$0xff] %vm1869_vm10, %v1820_v35  ;;  %v2279_v36 = vadd.f32 %v2278_v51, %v2277_v29 }
 0x22d   : > { %v1242_v37 = vpop.permute.xlu1 %1241 }
 0x22e   : > { %1314 = vst.msk [vmem:[#allocation3 + $0xc0] sm:$0xff] %vm1289_vm7, %v1242_v37  ;;  %v1244_v39 = vpop.permute.xlu0 %1243 }
 0x22f   : > { %1315 = vst.msk [vmem:[#allocation3 + $0xc8] sm:$0xff] %vm1289_vm7, %v1244_v39 }
 0x231   : > { %v667_v46 = vpop.permute.xlu1 %666  ;;  %v1924_v50 = vld [vmem:[#allocation3 + $0xb0] sm:$0xff] }
 0x232   : > { %737 = vst.msk [vmem:[#allocation3 + $0xd0] sm:$0xff] %vm710_vm4, %v667_v46  ;;  %2726 = vmatprep.mubr.msk.f32.mxu1 %vm1943_vm11, %v1924_v50  ;;  %v669_v58 = vpop.permute.xlu0 %668  ;;  %v1925_v61 = vld [vmem:[#allocation3 + $0xb8] sm:$0xff] }
 0x233   : > { %738 = vst.msk [vmem:[#allocation3 + $0xd8] sm:$0xff] %vm710_vm4, %v669_v58  ;;  %2727 = vmatmul.mubr.msk.f32.gmra.mrb[6].mxu1 %vm1943_vm11, %v1925_v61 }
 0x235   : > { %v1436_v0 = vpop.permute.xlu1 %1435 }
 0x236   : > { %1508 = vst.msk [vmem:[#allocation3 + $0xc0] sm:$0xff] %vm1483_vm8, %v1436_v0  ;;  %v1438_v6 = vpop.permute.xlu0 %1437 }
 0x237   : > { %1509 = vst.msk [vmem:[#allocation3 + $0xc8] sm:$0xff] %vm1483_vm8, %v1438_v6 }
 0x239   : > { %v860_v55 = vpop.permute.xlu1 %859 }
 0x23a   : > { %930 = vst.msk [vmem:[#allocation3 + $0xd0] sm:$0xff] %vm903_vm5, %v860_v55  ;;  %v862_v49 = vpop.permute.xlu0 %861 }
 0x23b   : > { %931 = vst.msk [vmem:[#allocation3 + $0xd8] sm:$0xff] %vm903_vm5, %v862_v49 }
 0x23d   : > { %v1629_v40 = vpop.permute.xlu1 %1628 }
 0x23e   : > { %1701 = vst.msk [vmem:[#allocation3 + $0xc0] sm:$0xff] %vm1676_vm9, %v1629_v40  ;;  %v1631_v42 = vpop.permute.xlu0 %1630 }
 0x23f   : > { %1702 = vst.msk [vmem:[#allocation3 + $0xc8] sm:$0xff] %vm1676_vm9, %v1631_v42 }
 0x241   : > { %v1053_v53 = vpop.permute.xlu1 %1052 }
 0x242   : > { %1123 = vst.msk [vmem:[#allocation3 + $0xd0] sm:$0xff] %vm1096_vm6, %v1053_v53  ;;  %v1055_v5 = vpop.permute.xlu0 %1054  ;;  %v3764_v3 = vpop.f32.mrb[8].mxu0 }
 0x243   : > { %1124 = vst.msk [vmem:[#allocation3 + $0xd8] sm:$0xff] %vm1096_vm6, %v1055_v5  ;;  %v3770_v32 = vpop.f32.mrb[9].mxu0  ;;  %v2282_v44 = vsel %vm182_vm0, %v3764_v3, 0.0 }
 0x244   : > { %2479 = vst.msk [vmem:[%s3603_s27 + $0x48] sm:$0xff] %vm182_vm0, %v3764_v3  ;;  %v2280_v25 = vsel %vm182_vm0, %v3770_v32, 0.0  ;;  %2478 = vst.msk [vmem:[%s3603_s27 + $0x40] sm:$0xff] %vm182_vm0, %v3770_v32 }
 0x245   : > { %v1822_v27 = vpop.permute.xlu1 %1821  ;;  %v2281_v7 = vadd.f32 %v2280_v25, %v2279_v36 }
 0x246   : > { %1894 = vst.msk [vmem:[#allocation3 + $0xc0] sm:$0xff] %vm1869_vm10, %v1822_v27  ;;  %v1824_v11 = vpop.permute.xlu0 %1823 }
 0x247   : > { %1895 = vst.msk [vmem:[#allocation3 + $0xc8] sm:$0xff] %vm1869_vm10, %v1824_v11  ;;  %v2283_v12 = vadd.f32 %v2282_v44, %v2281_v7 }
 0x249   : > { %v1246_v13 = vpop.permute.xlu1 %1245 }
 0x24a   : > { %1316 = vst.msk [vmem:[#allocation3 + $0xd0] sm:$0xff] %vm1289_vm7, %v1246_v13  ;;  %v1248_v43 = vpop.permute.xlu0 %1247 }
 0x24b   : > { %1317 = vst.msk [vmem:[#allocation3 + $0xd8] sm:$0xff] %vm1289_vm7, %v1248_v43 }
 0x24d   : > { %v671_v54 = vpop.permute.xlu1 %670  ;;  %v1926_v4 = vld [vmem:[#allocation3 + $0xc0] sm:$0xff] }
 0x24e   : > { %739 = vst.msk [vmem:[#allocation3 + $0xe0] sm:$0xff] %vm710_vm4, %v671_v54  ;;  %2729 = vmatprep.mubr.msk.f32.mxu1 %vm1943_vm11, %v1926_v4  ;;  %v673_v63 = vpop.permute.xlu0 %672  ;;  %v1927_v10 = vld [vmem:[#allocation3 + $0xc8] sm:$0xff] }
 0x24f   : > { %740 = vst.msk [vmem:[#allocation3 + $0xe8] sm:$0xff] %vm710_vm4, %v673_v63  ;;  %2730 = vmatmul.mubr.msk.f32.gmra.mrb[8].mxu1 %vm1943_vm11, %v1927_v10 }
 0x251   : > { %v1440_v57 = vpop.permute.xlu1 %1439 }
 0x252   : > { %1510 = vst.msk [vmem:[#allocation3 + $0xd0] sm:$0xff] %vm1483_vm8, %v1440_v57  ;;  %v1442_v16 = vpop.permute.xlu0 %1441 }
 0x253   : > { %1511 = vst.msk [vmem:[#allocation3 + $0xd8] sm:$0xff] %vm1483_vm8, %v1442_v16 }
 0x255   : > { %v864_v45 = vpop.permute.xlu1 %863 }
 0x256   : > { %932 = vst.msk [vmem:[#allocation3 + $0xe0] sm:$0xff] %vm903_vm5, %v864_v45  ;;  %v866_v17 = vpop.permute.xlu0 %865 }
 0x257   : > { %933 = vst.msk [vmem:[#allocation3 + $0xe8] sm:$0xff] %vm903_vm5, %v866_v17 }
 0x259   : > { %v1633_v41 = vpop.permute.xlu1 %1632 }
 0x25a   : > { %1703 = vst.msk [vmem:[#allocation3 + $0xd0] sm:$0xff] %vm1676_vm9, %v1633_v41  ;;  %v1635_v52 = vpop.permute.xlu0 %1634 }
 0x25b   : > { %1704 = vst.msk [vmem:[#allocation3 + $0xd8] sm:$0xff] %vm1676_vm9, %v1635_v52 }
 0x25d   : > { %v1057_v26 = vpop.permute.xlu1 %1056 }
 0x25e   : > { %1125 = vst.msk [vmem:[#allocation3 + $0xe0] sm:$0xff] %vm1096_vm6, %v1057_v26  ;;  %v1059_v31 = vpop.permute.xlu0 %1058  ;;  %v3794_v19 = vpop.f32.mrb[10].mxu0 }
 0x25f   : > { %1126 = vst.msk [vmem:[#allocation3 + $0xe8] sm:$0xff] %vm1096_vm6, %v1059_v31  ;;  %v3800_v20 = vpop.f32.mrb[11].mxu0  ;;  %v2286_v21 = vsel %vm182_vm0, %v3794_v19, 0.0 }
 0x260   : > { %2481 = vst.msk [vmem:[%s3603_s27 + $0x58] sm:$0xff] %vm182_vm0, %v3794_v19  ;;  %v2284_v47 = vsel %vm182_vm0, %v3800_v20, 0.0  ;;  %2480 = vst.msk [vmem:[%s3603_s27 + $0x50] sm:$0xff] %vm182_vm0, %v3800_v20 }
 0x261   : > { %v1826_v48 = vpop.permute.xlu1 %1825  ;;  %v2285_v22 = vadd.f32 %v2284_v47, %v2283_v12 }
 0x262   : > { %1896 = vst.msk [vmem:[#allocation3 + $0xd0] sm:$0xff] %vm1869_vm10, %v1826_v48  ;;  %v1828_v56 = vpop.permute.xlu0 %1827 }
 0x263   : > { %1897 = vst.msk [vmem:[#allocation3 + $0xd8] sm:$0xff] %vm1869_vm10, %v1828_v56  ;;  %v2287_v59 = vadd.f32 %v2286_v21, %v2285_v22 }
 0x265   : > { %v1250_v8 = vpop.permute.xlu1 %1249 }
 0x266   : > { %1318 = vst.msk [vmem:[#allocation3 + $0xe0] sm:$0xff] %vm1289_vm7, %v1250_v8  ;;  %v1252_v14 = vpop.permute.xlu0 %1251 }
 0x267   : > { %1319 = vst.msk [vmem:[#allocation3 + $0xe8] sm:$0xff] %vm1289_vm7, %v1252_v14 }
 0x269   : > { %v675_v62 = vpop.permute.xlu1 %674  ;;  %v1928_v2 = vld [vmem:[#allocation3 + $0xd0] sm:$0xff] }
 0x26a   : > { %741 = vst.msk [vmem:[#allocation3 + $0xf0] sm:$0xff] %vm710_vm4, %v675_v62  ;;  %2732 = vmatprep.mubr.msk.f32.mxu1 %vm1943_vm11, %v1928_v2  ;;  %v677_v23 = vpop.permute.xlu0 %676  ;;  %v1929_v24 = vld [vmem:[#allocation3 + $0xd8] sm:$0xff] }
 0x26b   : > { %742 = vst.msk [vmem:[#allocation3 + $0xf8] sm:$0xff] %vm710_vm4, %v677_v23  ;;  %2733 = vmatmul.mubr.msk.f32.gmra.mrb[10].mxu1 %vm1943_vm11, %v1929_v24 }
 0x26d   : > { %v1444_v51 = vpop.permute.xlu1 %1443 }
 0x26e   : > { %1512 = vst.msk [vmem:[#allocation3 + $0xe0] sm:$0xff] %vm1483_vm8, %v1444_v51  ;;  %v1446_v1 = vpop.permute.xlu0 %1445 }
 0x26f   : > { %1513 = vst.msk [vmem:[#allocation3 + $0xe8] sm:$0xff] %vm1483_vm8, %v1446_v1 }
 0x271   : > { %v868_v38 = vpop.permute.xlu1 %867 }
 0x272   : > { %934 = vst.msk [vmem:[#allocation3 + $0xf0] sm:$0xff] %vm903_vm5, %v868_v38  ;;  %v870_v29 = vpop.permute.xlu0 %869 }
 0x273   : > { %935 = vst.msk [vmem:[#allocation3 + $0xf8] sm:$0xff] %vm903_vm5, %v870_v29 }
 0x275   : > { %v1637_v35 = vpop.permute.xlu1 %1636 }
 0x276   : > { %1705 = vst.msk [vmem:[#allocation3 + $0xe0] sm:$0xff] %vm1676_vm9, %v1637_v35  ;;  %v1639_v36 = vpop.permute.xlu0 %1638 }
 0x277   : > { %1706 = vst.msk [vmem:[#allocation3 + $0xe8] sm:$0xff] %vm1676_vm9, %v1639_v36 }
 0x279   : > { %v1061_v37 = vpop.permute.xlu1 %1060 }
 0x27a   : > { %1127 = vst.msk [vmem:[#allocation3 + $0xf0] sm:$0xff] %vm1096_vm6, %v1061_v37  ;;  %v1063_v39 = vpop.permute.xlu0 %1062  ;;  %v3824_v46 = vpop.f32.mrb[12].mxu0 }
 0x27b   : > { %1128 = vst.msk [vmem:[#allocation3 + $0xf8] sm:$0xff] %vm1096_vm6, %v1063_v39  ;;  %v3830_v50 = vpop.f32.mrb[13].mxu0  ;;  %v2290_v58 = vsel %vm182_vm0, %v3824_v46, 0.0 }
 0x27c   : > { %2483 = vst.msk [vmem:[%s3603_s27 + $0x68] sm:$0xff] %vm182_vm0, %v3824_v46  ;;  %v2288_v61 = vsel %vm182_vm0, %v3830_v50, 0.0  ;;  %2482 = vst.msk [vmem:[%s3603_s27 + $0x60] sm:$0xff] %vm182_vm0, %v3830_v50 }
 0x27d   : > { %v1830_v0 = vpop.permute.xlu1 %1829  ;;  %v2289_v6 = vadd.f32 %v2288_v61, %v2287_v59 }
 0x27e   : > { %1898 = vst.msk [vmem:[#allocation3 + $0xe0] sm:$0xff] %vm1869_vm10, %v1830_v0  ;;  %v1832_v55 = vpop.permute.xlu0 %1831 }
 0x27f   : > { %1899 = vst.msk [vmem:[#allocation3 + $0xe8] sm:$0xff] %vm1869_vm10, %v1832_v55  ;;  %v2291_v49 = vadd.f32 %v2290_v58, %v2289_v6 }
 0x281   : > { %v1254_v40 = vpop.permute.xlu1 %1253 }
 0x282   : > { %1320 = vst.msk [vmem:[#allocation3 + $0xf0] sm:$0xff] %vm1289_vm7, %v1254_v40  ;;  %v1448_v42 = vpop.permute.xlu0 %1447 }
 0x283   : > { %1514 = vst.msk [vmem:[#allocation3 + $0xf0] sm:$0xff] %vm1483_vm8, %v1448_v42 }
 0x285   : > { %v1256_v53 = vpop.permute.xlu1 %1255  ;;  %v1930_v5 = vld [vmem:[#allocation3 + $0xe0] sm:$0xff] }
 0x286   : > { %1321 = vst.msk [vmem:[#allocation3 + $0xf8] sm:$0xff] %vm1289_vm7, %v1256_v53  ;;  %2735 = vmatprep.mubr.msk.f32.mxu1 %vm1943_vm11, %v1930_v5  ;;  %v1931_v44 = vld [vmem:[#allocation3 + $0xe8] sm:$0xff]  ;;  %v1641_v25 = vpop.permute.xlu0 %1640 }
 0x287   : > { %2736 = vmatmul.mubr.msk.f32.gmra.mrb[12].mxu1 %vm1943_vm11, %v1931_v44  ;;  %1707 = vst.msk [vmem:[#allocation3 + $0xf0] sm:$0xff] %vm1676_vm9, %v1641_v25 }
 0x289   : > { %v1450_v27 = vpop.permute.xlu1 %1449 }
 0x28a   : > { %1515 = vst.msk [vmem:[#allocation3 + $0xf8] sm:$0xff] %vm1483_vm8, %v1450_v27  ;;  %v1834_v7 = vpop.permute.xlu0 %1833 }
 0x28b   : > { %1900 = vst.msk [vmem:[#allocation3 + $0xf0] sm:$0xff] %vm1869_vm10, %v1834_v7 }
 0x28d   : > { %v1643_v11 = vpop.permute.xlu1 %1642 }
 0x28e   : > { %1708 = vst.msk [vmem:[#allocation3 + $0xf8] sm:$0xff] %vm1676_vm9, %v1643_v11 }
 0x291   : > { %v1836_v12 = vpop.permute.xlu1 %1835 }
 0x292   : > { %1901 = vst.msk [vmem:[#allocation3 + $0xf8] sm:$0xff] %vm1869_vm10, %v1836_v12  ;;  %v1932_v13 = vld [vmem:[#allocation3 + $0xf0] sm:$0xff] }
 0x293   : > { %2738 = vmatprep.mubr.msk.f32.mxu1 %vm1943_vm11, %v1932_v13 }
 0x296   : > { %v3852_v43 = vpop.f32.mrb[14].mxu0 }
 0x297   : > { %2485 = vst.msk [vmem:[%s3603_s27 + $0x78] sm:$0xff] %vm182_vm0, %v3852_v43  ;;  %v3857_v54 = vpop.f32.mrb[15].mxu0  ;;  %v2294_v4 = vsel %vm182_vm0, %v3852_v43, 0.0 }
 0x298   : > { %v2292_v63 = vsel %vm182_vm0, %v3857_v54, 0.0  ;;  %2484 = vst.msk [vmem:[%s3603_s27 + $0x70] sm:$0xff] %vm182_vm0, %v3857_v54 }
 0x299   : > { %v1933_v10 = vld [vmem:[#allocation3 + $0xf8] sm:$0xff]  ;;  %v2293_v57 = vadd.f32 %v2292_v63, %v2291_v49 }
 0x29a   : > { %2739 = vmatmul.mubr.msk.f32.gmra.mrb[14].mxu1 %vm1943_vm11, %v1933_v10 }
 0x29b   : > { %v2295_v16 = vadd.f32 %v2294_v4, %v2293_v57 }
 0x2b2   : > { %v3867_v45 = vpop.f32.mrb[0].mxu1 }
 0x2b3   : > { %2487 = vst.msk [vmem:[%s3603_s27 + $0x88] sm:$0xff] %vm182_vm0, %v3867_v45  ;;  %v3872_v17 = vpop.f32.mrb[1].mxu1  ;;  %v2298_v41 = vsel %vm182_vm0, %v3867_v45, 0.0 }
 0x2b4   : > { %v2296_v52 = vsel %vm182_vm0, %v3872_v17, 0.0  ;;  %2486 = vst.msk [vmem:[%s3603_s27 + $0x80] sm:$0xff] %vm182_vm0, %v3872_v17 }
 0x2b5   : > { %v2297_v26 = vadd.f32 %v2296_v52, %v2295_v16 }
 0x2b7   : > { %v2299_v31 = vadd.f32 %v2298_v41, %v2297_v26 }
 0x2ce   : > { %v3881_v21 = vpop.f32.mrb[2].mxu1 }
 0x2cf   : > { %2489 = vst.msk [vmem:[%s3603_s27 + $0x98] sm:$0xff] %vm182_vm0, %v3881_v21  ;;  %v3886_v47 = vpop.f32.mrb[3].mxu1  ;;  %v2302_v48 = vsel %vm182_vm0, %v3881_v21, 0.0 }
 0x2d0   : > { %v2300_v22 = vsel %vm182_vm0, %v3886_v47, 0.0  ;;  %2488 = vst.msk [vmem:[%s3603_s27 + $0x90] sm:$0xff] %vm182_vm0, %v3886_v47 }
 0x2d1   : > { %v2301_v56 = vadd.f32 %v2300_v22, %v2299_v31 }
 0x2d3   : > { %v2303_v59 = vadd.f32 %v2302_v48, %v2301_v56 }
 0x2ea   : > { %v3895_v8 = vpop.f32.mrb[4].mxu1 }
 0x2eb   : > { %2491 = vst.msk [vmem:[%s3603_s27 + $0xa8] sm:$0xff] %vm182_vm0, %v3895_v8  ;;  %v3900_v14 = vpop.f32.mrb[5].mxu1  ;;  %v2306_v62 = vsel %vm182_vm0, %v3895_v8, 0.0 }
 0x2ec   : > { %v2304_v2 = vsel %vm182_vm0, %v3900_v14, 0.0  ;;  %2490 = vst.msk [vmem:[%s3603_s27 + $0xa0] sm:$0xff] %vm182_vm0, %v3900_v14 }
 0x2ed   : > { %v2305_v23 = vadd.f32 %v2304_v2, %v2303_v59 }
 0x2ef   : > { %v2307_v24 = vadd.f32 %v2306_v62, %v2305_v23 }
 0x306   : > { %v3909_v51 = vpop.f32.mrb[6].mxu1 }
 0x307   : > { %2493 = vst.msk [vmem:[%s3603_s27 + $0xb8] sm:$0xff] %vm182_vm0, %v3909_v51  ;;  %v3914_v1 = vpop.f32.mrb[7].mxu1  ;;  %v2310_v38 = vsel %vm182_vm0, %v3909_v51, 0.0 }
 0x308   : > { %v2308_v29 = vsel %vm182_vm0, %v3914_v1, 0.0  ;;  %2492 = vst.msk [vmem:[%s3603_s27 + $0xb0] sm:$0xff] %vm182_vm0, %v3914_v1 }
 0x309   : > { %v2309_v35 = vadd.f32 %v2308_v29, %v2307_v24 }
 0x30b   : > { %v2311_v36 = vadd.f32 %v2310_v38, %v2309_v35 }
 0x322   : > { %v3923_v37 = vpop.f32.mrb[8].mxu1 }
 0x323   : > { %2495 = vst.msk [vmem:[%s3603_s27 + $0xc8] sm:$0xff] %vm182_vm0, %v3923_v37  ;;  %v3928_v39 = vpop.f32.mrb[9].mxu1  ;;  %v2314_v58 = vsel %vm182_vm0, %v3923_v37, 0.0 }
 0x324   : > { %v2312_v61 = vsel %vm182_vm0, %v3928_v39, 0.0  ;;  %2494 = vst.msk [vmem:[%s3603_s27 + $0xc0] sm:$0xff] %vm182_vm0, %v3928_v39 }
 0x325   : > { %v2313_v0 = vadd.f32 %v2312_v61, %v2311_v36 }
 0x327   : > { %v2315_v6 = vadd.f32 %v2314_v58, %v2313_v0 }
 0x33e   : > { %v2734_v55 = vpop.f32.mrb[10].mxu1 }
 0x33f   : > { %2497 = vst.msk [vmem:[%s3603_s27 + $0xd8] sm:$0xff] %vm182_vm0, %v2734_v55  ;;  %v2236_v49 = vpop.f32.mrb[11].mxu1  ;;  %v2318_v40 = vsel %vm182_vm0, %v2734_v55, 0.0 }
 0x340   : > { %v2316_v42 = vsel %vm182_vm0, %v2236_v49, 0.0  ;;  %2496 = vst.msk [vmem:[%s3603_s27 + $0xd0] sm:$0xff] %vm182_vm0, %v2236_v49 }
 0x341   : > { %v2317_v53 = vadd.f32 %v2316_v42, %v2315_v6 }
 0x343   : > { %v2319_v5 = vadd.f32 %v2318_v40, %v2317_v53 }
 0x35a   : > { %v2737_v44 = vpop.f32.mrb[12].mxu1 }
 0x35b   : > { %2499 = vst.msk [vmem:[%s3603_s27 + $0xe8] sm:$0xff] %vm182_vm0, %v2737_v44  ;;  %v2246_v25 = vpop.f32.mrb[13].mxu1  ;;  %v2322_v27 = vsel %vm182_vm0, %v2737_v44, 0.0 }
 0x35c   : > { %v2320_v7 = vsel %vm182_vm0, %v2246_v25, 0.0  ;;  %2498 = vst.msk [vmem:[%s3603_s27 + $0xe0] sm:$0xff] %vm182_vm0, %v2246_v25 }
 0x35d   : > { %v2321_v11 = vadd.f32 %v2320_v7, %v2319_v5 }
 0x35f   : > { %v2323_v12 = vadd.f32 %v2322_v27, %v2321_v11 }
 0x36d   : > { %v2740_v13 = vpop.f32.mrb[14].mxu1 }
 0x36e   : > { %2501 = vst.msk [vmem:[%s3603_s27 + $0xf8] sm:$0xff] %vm182_vm0, %v2740_v13  ;;  %v2256_v4 = vpop.f32.mrb[15].mxu1  ;;  %v2326_v57 = vsel %vm182_vm0, %v2740_v13, 0.0 }
 0x36f   : > { %v2324_v63 = vsel %vm182_vm0, %v2256_v4, 0.0  ;;  %2500 = vst.msk [vmem:[%s3603_s27 + $0xf0] sm:$0xff] %vm182_vm0, %v2256_v4 }
 0x370   : > { %v2325_v10 = vadd.f32 %v2324_v63, %v2323_v12 }
 0x372   : > { %v2327_v16 = vadd.f32 %v2326_v57, %v2325_v10 }
 0x374   : > { %v2328_v41 = vrot.slane %v2327_v16, 4 }
 0x376   : > { %v2329_v52 = vadd.f32 %v2328_v41, %v2327_v16 }
 0x378   : > { %v2330_v26 = vrot.slane %v2329_v52, 2 }
 0x37a   : > { %v2331_v31 = vadd.f32 %v2330_v26, %v2329_v52 }
 0x37c   : > { %v2332_v48 = vrot.slane %v2331_v31, 1 }
 0x37e   : > { %v2333_v22 = vadd.f32 %v2332_v48, %v2331_v31 }
 0x380   : > { %v2334_v56 = vmul.f32 0.00390625, %v2333_v22  ;;  %2468 = vst.msk [vmem:[%s3959_s22] sm:$0x1] %vm191_vm1, %v2333_v22 }
 0x382   : > { %v2335_v59 = vsub.f32 %v3615_v18, %v2334_v56  ;;  %v2336_v62 = vsub.f32 %v3607_v9, %v2334_v56  ;;  %v2337_v2 = vsub.f32 %v3657_v34, %v2334_v56  ;;  %v2338_v23 = vsub.f32 %v3651_v33, %v2334_v56 }
 0x383   : > { %v2339_v24 = vsub.f32 %v3701_v60, %v2334_v56  ;;  %v2340_v38 = vsub.f32 %v3695_v15, %v2334_v56  ;;  %v2341_v29 = vsub.f32 %v3740_v30, %v2334_v56  ;;  %v2342_v35 = vsub.f32 %v3734_v28, %v2334_v56 }
 0x384   : > { %v2343_v36 = vsub.f32 %v3770_v32, %v2334_v56  ;;  %v2344_v58 = vsub.f32 %v3764_v3, %v2334_v56  ;;  %v2345_v18 = vsub.f32 %v3800_v20, %v2334_v56  ;;  %v2346_v9 = vsub.f32 %v3794_v19, %v2334_v56 }
 0x385   : > { %v2347_v34 = vsub.f32 %v3830_v50, %v2334_v56  ;;  %v2348_v33 = vsub.f32 %v3824_v46, %v2334_v56  ;;  %v2349_v60 = vsub.f32 %v3857_v54, %v2334_v56  ;;  %v2350_v15 = vsub.f32 %v3852_v43, %v2334_v56 }
 0x386   : > { %v2351_v30 = vsub.f32 %v3872_v17, %v2334_v56  ;;  %v2352_v28 = vsub.f32 %v3867_v45, %v2334_v56  ;;  %v3982_v32 = vsub.f32 %v3886_v47, %v2334_v56  ;;  %v3985_v3 = vsub.f32 %v3881_v21, %v2334_v56 }
 0x387   : > { %v3988_v19 = vsub.f32 %v3900_v14, %v2334_v56  ;;  %v3991_v20 = vsub.f32 %v3895_v8, %v2334_v56  ;;  %v3994_v46 = vsub.f32 %v3914_v1, %v2334_v56  ;;  %v3997_v50 = vsub.f32 %v3909_v51, %v2334_v56 }
 0x388   : > { %v4000_v43 = vsub.f32 %v3928_v39, %v2334_v56  ;;  %v4003_v54 = vsub.f32 %v3923_v37, %v2334_v56  ;;  %v4005_v45 = vsub.f32 %v2236_v49, %v2334_v56  ;;  %v4007_v17 = vsub.f32 %v2734_v55, %v2334_v56 }
 0x389   : > { %v4009_v21 = vsub.f32 %v2246_v25, %v2334_v56  ;;  %v4011_v47 = vsub.f32 %v2737_v44, %v2334_v56  ;;  %v4013_v8 = vsub.f32 %v2256_v4, %v2334_v56  ;;  %v4015_v14 = vsub.f32 %v2740_v13, %v2334_v56 }
 0x38a   : > { %v2367_v51 = vmul.f32 %v2335_v59, %v2335_v59  ;;  %v2368_v1 = vmul.f32 %v2336_v62, %v2336_v62  ;;  %v2369_v61 = vmul.f32 %v2337_v2, %v2337_v2  ;;  %v2370_v39 = vmul.f32 %v2338_v23, %v2338_v23 }
 0x38b   : > { %v2371_v49 = vmul.f32 %v2339_v24, %v2339_v24  ;;  %v2372_v42 = vmul.f32 %v2340_v38, %v2340_v38  ;;  %v2373_v44 = vmul.f32 %v2341_v29, %v2341_v29  ;;  %v2374_v7 = vmul.f32 %v2342_v35, %v2342_v35 }
 0x38c   : > { %v2399_v0 = vsel %vm182_vm0, %v2367_v51, 0.0  ;;  %v2400_v37 = vsel %vm182_vm0, %v2368_v1, 0.0  ;;  %v2402_v55 = vsel %vm182_vm0, %v2369_v61, 0.0  ;;  %v2404_v53 = vsel %vm182_vm0, %v2370_v39, 0.0 }
 0x38d   : > { %v2401_v6 = vadd.f32 %v2400_v37, %v2399_v0  ;;  %v2406_v25 = vsel %vm182_vm0, %v2371_v49, 0.0  ;;  %v2408_v11 = vsel %vm182_vm0, %v2372_v42, 0.0  ;;  %v2375_v13 = vmul.f32 %v2343_v36, %v2343_v36 }
 0x38e   : > { %v2410_v4 = vsel %vm182_vm0, %v2373_v44, 0.0  ;;  %v2376_v10 = vmul.f32 %v2344_v58, %v2344_v58  ;;  %v2412_v57 = vsel %vm182_vm0, %v2374_v7, 0.0  ;;  %v2377_v41 = vmul.f32 %v2345_v18, %v2345_v18 }
 0x38f   : > { %v2403_v40 = vadd.f32 %v2402_v55, %v2401_v6  ;;  %v2414_v52 = vsel %vm182_vm0, %v2375_v13, 0.0  ;;  %v2378_v31 = vmul.f32 %v2346_v9, %v2346_v9  ;;  %v2379_v56 = vmul.f32 %v2347_v34, %v2347_v34 }
 0x390   : > { %v2416_v48 = vsel %vm182_vm0, %v2376_v10, 0.0  ;;  %v2418_v59 = vsel %vm182_vm0, %v2377_v41, 0.0  ;;  %v2380_v2 = vmul.f32 %v2348_v33, %v2348_v33  ;;  %v2381_v38 = vmul.f32 %v2349_v60, %v2349_v60 }
 0x391   : > { %v2405_v5 = vadd.f32 %v2404_v53, %v2403_v40  ;;  %v2420_v23 = vsel %vm182_vm0, %v2378_v31, 0.0  ;;  %v2422_v29 = vsel %vm182_vm0, %v2379_v56, 0.0  ;;  %v2382_v36 = vmul.f32 %v2350_v15, %v2350_v15 }
 0x392   : > { %v2424_v58 = vsel %vm182_vm0, %v2380_v2, 0.0  ;;  %v2383_v9 = vmul.f32 %v2351_v30, %v2351_v30  ;;  %v2426_v51 = vsel %vm182_vm0, %v2381_v38, 0.0  ;;  %v2384_v34 = vmul.f32 %v2352_v28, %v2352_v28 }
 0x393   : > { %v2407_v27 = vadd.f32 %v2406_v25, %v2405_v5  ;;  %v2428_v61 = vsel %vm182_vm0, %v2382_v36, 0.0  ;;  %v2385_v33 = vmul.f32 %v3982_v32, %v3982_v32  ;;  %v2386_v15 = vmul.f32 %v3985_v3, %v3985_v3 }
 0x394   : > { %v2430_v60 = vsel %vm182_vm0, %v2383_v9, 0.0  ;;  %v2432_v37 = vsel %vm182_vm0, %v2384_v34, 0.0  ;;  %v2387_v30 = vmul.f32 %v3988_v19, %v3988_v19  ;;  %v2388_v55 = vmul.f32 %v3991_v20, %v3991_v20 }
 0x395   : > { %v2409_v12 = vadd.f32 %v2408_v11, %v2407_v27  ;;  %v2434_v28 = vsel %vm182_vm0, %v2385_v33, 0.0  ;;  %v2436_v32 = vsel %vm182_vm0, %v2386_v15, 0.0  ;;  %v2389_v42 = vmul.f32 %v3994_v46, %v3994_v46 }
 0x396   : > { %v2438_v3 = vsel %vm182_vm0, %v2387_v30, 0.0  ;;  %v2390_v5 = vmul.f32 %v3997_v50, %v3997_v50  ;;  %v2440_v19 = vsel %vm182_vm0, %v2388_v55, 0.0  ;;  %v2391_v25 = vmul.f32 %v4000_v43, %v4000_v43 }
 0x397   : > { %v2411_v63 = vadd.f32 %v2410_v4, %v2409_v12  ;;  %v2442_v20 = vsel %vm182_vm0, %v2389_v42, 0.0  ;;  %v2392_v7 = vmul.f32 %v4003_v54, %v4003_v54  ;;  %v2393_v12 = vmul.f32 %v4005_v45, %v4005_v45 }
 0x398   : > { %v2444_v46 = vsel %vm182_vm0, %v2390_v5, 0.0  ;;  %v2446_v50 = vsel %vm182_vm0, %v2391_v25, 0.0  ;;  %v2394_v4 = vmul.f32 %v4007_v17, %v4007_v17  ;;  %v2395_v10 = vmul.f32 %v4009_v21, %v4009_v21 }
 0x399   : > { %v2413_v16 = vadd.f32 %v2412_v57, %v2411_v63  ;;  %v2448_v43 = vsel %vm182_vm0, %v2392_v7, 0.0  ;;  %v2450_v54 = vsel %vm182_vm0, %v2393_v12, 0.0  ;;  %v2398_v31 = vmul.f32 %v4015_v14, %v4015_v14 }
 0x39a   : > { %v2452_v45 = vsel %vm182_vm0, %v2394_v4, 0.0  ;;  %v2454_v17 = vsel %vm182_vm0, %v2395_v10, 0.0 }
 0x39b   : > { %v2415_v26 = vadd.f32 %v2414_v52, %v2413_v16  ;;  %v2396_v16 = vmul.f32 %v4011_v47, %v4011_v47  ;;  %v2397_v52 = vmul.f32 %v4013_v8, %v4013_v8  ;;  %v2460_v47 = vsel %vm182_vm0, %v2398_v31, 0.0 }
 0x39d   : > { %v2417_v22 = vadd.f32 %v2416_v48, %v2415_v26  ;;  %v2456_v21 = vsel %vm182_vm0, %v2396_v16, 0.0 }
 0x39f   : > { %v2419_v62 = vadd.f32 %v2418_v59, %v2417_v22  ;;  %v2458_v22 = vsel %vm182_vm0, %v2397_v52, 0.0 }
 0x3a1   : > { %v2421_v24 = vadd.f32 %v2420_v23, %v2419_v62 }
 0x3a3   : > { %v2423_v35 = vadd.f32 %v2422_v29, %v2421_v24 }
 0x3a5   : > { %v2425_v18 = vadd.f32 %v2424_v58, %v2423_v35 }
 0x3a7   : > { %v2427_v1 = vadd.f32 %v2426_v51, %v2425_v18 }
 0x3a9   : > { %v2429_v39 = vadd.f32 %v2428_v61, %v2427_v1 }
 0x3ab   : > { %v2431_v0 = vadd.f32 %v2430_v60, %v2429_v39 }
 0x3ad   : > { %v2433_v6 = vadd.f32 %v2432_v37, %v2431_v0 }
 0x3af   : > { %v2435_v49 = vadd.f32 %v2434_v28, %v2433_v6 }
 0x3b1   : > { %v2437_v40 = vadd.f32 %v2436_v32, %v2435_v49 }
 0x3b3   : > { %v2439_v53 = vadd.f32 %v2438_v3, %v2437_v40 }
 0x3b5   : > { %v2441_v44 = vadd.f32 %v2440_v19, %v2439_v53 }
 0x3b7   : > { %v2443_v27 = vadd.f32 %v2442_v20, %v2441_v44 }
 0x3b9   : > { %v2445_v11 = vadd.f32 %v2444_v46, %v2443_v27 }
 0x3bb   : > { %v2447_v13 = vadd.f32 %v2446_v50, %v2445_v11 }
 0x3bd   : > { %v2449_v63 = vadd.f32 %v2448_v43, %v2447_v13 }
 0x3bf   : > { %v2451_v57 = vadd.f32 %v2450_v54, %v2449_v63 }
 0x3c1   : > { %v2453_v41 = vadd.f32 %v2452_v45, %v2451_v57 }
 0x3c3   : > { %v2455_v26 = vadd.f32 %v2454_v17, %v2453_v41 }
 0x3c5   : > { %v2457_v48 = vadd.f32 %v2456_v21, %v2455_v26 }
 0x3c7   : > { %v2459_v56 = vadd.f32 %v2458_v22, %v2457_v48 }
 0x3c9   : > { %v2461_v59 = vadd.f32 %v2460_v47, %v2459_v56 }
 0x3cb   : > { %v2462_v62 = vrot.slane %v2461_v59, 4 }
 0x3cd   : > { %v2463_v2 = vadd.f32 %v2462_v62, %v2461_v59 }
 0x3cf   : > { %v2464_v23 = vrot.slane %v2463_v2, 2 }
 0x3d1   : > { %v2465_v8 = vadd.f32 %v2464_v23, %v2463_v2 }
 0x3d3   : > { %v2466_v24 = vrot.slane %v2465_v8, 1 }
 0x3d5   : > { %v2467_v38 = vadd.f32 %v2466_v24, %v2465_v8 }
 0x3d7   : > { %2469 = vst.msk [vmem:[%s3959_s22 + $0x1] sm:$0x1] %vm191_vm1, %v2467_v38 }
 0x3d8 PF: > { %s14_s12 = sadd.s32 1, %s2790_s12  }
 0x3d9   : > { %p11_p4 = scmp.ge.s32.totalorder %s14_s12, 4  }
 0x3db   :  { %13 = sbr.rel (!%p11_p4) target bundleno = 1 (0x1), region = 73 }

</bundles_post_ra>
